<compile_context>
chip_gen: v5e
topology: v5e:2x2
jax: 0.10.0
libtpu: 0.0.40
codegen_flags: <defaults>
</compile_context>

<pallas_src>
import functools

import jax
import jax.numpy as jnp
from jax.experimental import pallas as pl
from jax.experimental.pallas import tpu as pltpu

EPS = 1e-5
IN_RAW = 784          # 28*28
IN_PAD = 896          # next multiple of 128
OUT_RAW = 10
OUT_PAD = 128         # lane-dense output width


def _batchnorm_train(h, gamma, beta):
    # PyTorch BatchNorm1d (training): biased variance over the batch axis. f32.
    mean = jnp.mean(h, axis=0, keepdims=True)
    var = jnp.mean((h - mean) * (h - mean), axis=0, keepdims=True)
    inv = jax.lax.rsqrt(var + EPS)
    return (h - mean) * inv * gamma + beta


def mlp_kernel(x_ref,
               w1_ref, b1_ref,
               w2_ref, b2_ref, g2_ref, be2_ref,
               w3_ref, b3_ref, g3_ref, be3_ref,
               w4_ref, b4_ref,
               o_ref):
    # Layer 1: Linear(784->512 with K padded to 896) + ReLU
    h = jnp.dot(x_ref[...], w1_ref[...],
                preferred_element_type=jnp.float32) + b1_ref[...]
    h = jnp.maximum(h, 0.0)

    # Layer 2: Linear(512, 512) + BatchNorm1d(512) + ReLU
    h = jnp.dot(h.astype(jnp.bfloat16), w2_ref[...],
                preferred_element_type=jnp.float32) + b2_ref[...]
    h = _batchnorm_train(h, g2_ref[...], be2_ref[...])
    h = jnp.maximum(h, 0.0)

    # Layer 3: Linear(512, 512) + BatchNorm1d(512) + ReLU
    h = jnp.dot(h.astype(jnp.bfloat16), w3_ref[...],
                preferred_element_type=jnp.float32) + b3_ref[...]
    h = _batchnorm_train(h, g3_ref[...], be3_ref[...])
    h = jnp.maximum(h, 0.0)

    # Layer 4: Linear(512, 10), N padded to 128 lanes (wrapper slices [:, :10])
    out = jnp.dot(h.astype(jnp.bfloat16), w4_ref[...],
                  preferred_element_type=jnp.float32) + b4_ref[...]
    o_ref[...] = out.astype(o_ref.dtype)


@jax.jit
def net_forward(x_nchw, params):
    B = x_nchw.shape[0]
    x = x_nchw.reshape(B, -1)                              # torch.flatten(x, 1)
    x = jnp.pad(x, ((0, 0), (0, IN_PAD - IN_RAW)))         # lane-align K once
    x = x.astype(jnp.bfloat16)

    args = (
        x,
        params["w1"], params["b1"],
        params["w2"], params["b2"], params["g2"], params["be2"],
        params["w3"], params["b3"], params["g3"], params["be3"],
        params["w4"], params["b4"],
    )
    vmem = pl.BlockSpec(memory_space=pltpu.MemorySpace.VMEM)
    out_padded = pl.pallas_call(
        mlp_kernel,
        out_shape=jax.ShapeDtypeStruct((B, OUT_PAD), jnp.float32),
        in_specs=[vmem] * len(args),
        out_specs=vmem,
        compiler_params=pltpu.CompilerParams(vmem_limit_bytes=16 << 20),
    )(*args)
    return out_padded[:, :OUT_RAW]


def init_params(key):
    """Deterministic parameter init with PyTorch-like shapes/ranges.

    Linear weights/biases: uniform(-1/sqrt(fan_in), 1/sqrt(fan_in)).
    BatchNorm gamma=1, beta=0.  Weights stored as [in, out] in bfloat16;
    w1 K-padded 784->896, w4/b4 N-padded 10->128 (zeros).
    """
    def linear(key, fan_in, fan_out):
        kw, kb = jax.random.split(key)
        bound = 1.0 / jnp.sqrt(float(fan_in))
        w = jax.random.uniform(kw, (fan_in, fan_out), jnp.float32, -bound, bound)
        b = jax.random.uniform(kb, (1, fan_out), jnp.float32, -bound, bound)
        return w, b

    k1, k2, k3, k4 = jax.random.split(key, 4)
    w1, b1 = linear(k1, IN_RAW, 512)
    w2, b2 = linear(k2, 512, 512)
    w3, b3 = linear(k3, 512, 512)
    w4, b4 = linear(k4, 512, OUT_RAW)

    # Pad w1 along K (extra input rows are zero -> no effect on output).
    w1 = jnp.pad(w1, ((0, IN_PAD - IN_RAW), (0, 0)))
    # Pad w4/b4 along N to a lane-dense 128; padded outputs are sliced away.
    w4 = jnp.pad(w4, ((0, 0), (0, OUT_PAD - OUT_RAW)))
    b4 = jnp.pad(b4, ((0, 0), (0, OUT_PAD - OUT_RAW)))

    bf = jnp.bfloat16
    return {
        "w1": w1.astype(bf), "b1": b1,
        "w2": w2.astype(bf), "b2": b2,
        "g2": jnp.ones((1, 512), jnp.float32), "be2": jnp.zeros((1, 512), jnp.float32),
        "w3": w3.astype(bf), "b3": b3,
        "g3": jnp.ones((1, 512), jnp.float32), "be3": jnp.zeros((1, 512), jnp.float32),
        "w4": w4.astype(bf), "b4": b4,
    }


def reference_forward(x_nchw, params):
    """Pure-JAX reference mirroring the kernel math (bf16 matmul operands,
    f32 accumulation, training-mode BN in f32)."""
    bf = jnp.bfloat16
    B = x_nchw.shape[0]
    x = x_nchw.reshape(B, -1)
    x = jnp.pad(x, ((0, 0), (0, IN_PAD - IN_RAW))).astype(bf)

    h = jnp.dot(x, params["w1"], preferred_element_type=jnp.float32) + params["b1"]
    h = jnp.maximum(h, 0.0)

    h = jnp.dot(h.astype(bf), params["w2"],
                preferred_element_type=jnp.float32) + params["b2"]
    h = _batchnorm_train(h, params["g2"], params["be2"])
    h = jnp.maximum(h, 0.0)

    h = jnp.dot(h.astype(bf), params["w3"],
                preferred_element_type=jnp.float32) + params["b3"]
    h = _batchnorm_train(h, params["g3"], params["be3"])
    h = jnp.maximum(h, 0.0)

    out = jnp.dot(h.astype(bf), params["w4"],
                  preferred_element_type=jnp.float32) + params["b4"]
    return out[:, :OUT_RAW]


if __name__ == "__main__":
    key = jax.random.PRNGKey(0)
    kx, kp = jax.random.split(key)

    B = 8
    x = jax.random.normal(kx, (B, 1, 28, 28), jnp.float32)  # NCHW
    params = init_params(kp)

    out = net_forward(x, params)
    out = jax.block_until_ready(out)
    assert out.shape == (B, OUT_RAW), out.shape

    ref = reference_forward(x, params)
    assert jnp.allclose(out, ref, atol=2e-3, rtol=2e-3), float(
        jnp.max(jnp.abs(out - ref)))

    print("KERNEL_OK")
</pallas_src>

<mosaic_0001>
module attributes {stable_mosaic.version = 11 : i64} {
  func.func @mlp_kernel(%arg0: memref<8x896xbf16, #tpu.memory_space<vmem>>, %arg1: memref<896x512xbf16, #tpu.memory_space<vmem>>, %arg2: memref<1x512xf32, #tpu.memory_space<vmem>>, %arg3: memref<512x512xbf16, #tpu.memory_space<vmem>>, %arg4: memref<1x512xf32, #tpu.memory_space<vmem>>, %arg5: memref<1x512xf32, #tpu.memory_space<vmem>>, %arg6: memref<1x512xf32, #tpu.memory_space<vmem>>, %arg7: memref<512x512xbf16, #tpu.memory_space<vmem>>, %arg8: memref<1x512xf32, #tpu.memory_space<vmem>>, %arg9: memref<1x512xf32, #tpu.memory_space<vmem>>, %arg10: memref<1x512xf32, #tpu.memory_space<vmem>>, %arg11: memref<512x128xbf16, #tpu.memory_space<vmem>>, %arg12: memref<1x128xf32, #tpu.memory_space<vmem>>, %arg13: memref<8x128xf32, #tpu.memory_space<vmem>>) attributes {dimension_semantics = [], scalar_prefetch = 0 : i64, scratch_operands = 0 : i64, tpu.core_type = #tpu.core_type<tc>} {
    %c0 = arith.constant 0 : index
    %c0_0 = arith.constant 0 : index
    %0 = vector.load %arg0[%c0, %c0_0] : memref<8x896xbf16, #tpu.memory_space<vmem>>, vector<8x896xbf16>
    %c0_1 = arith.constant 0 : index
    %c0_2 = arith.constant 0 : index
    %1 = vector.load %arg1[%c0_1, %c0_2] : memref<896x512xbf16, #tpu.memory_space<vmem>>, vector<896x512xbf16>
    %cst = arith.constant dense<0.000000e+00> : vector<8x512xf32>
    %2 = tpu.matmul %0, %1, %cst {dimension_numbers = #tpu.dot_dimension_numbers<[1], [0], [0], [1], [0, 0, 1, 1], [], []>} : vector<8x896xbf16>, vector<896x512xbf16>, vector<8x512xf32> -> vector<8x512xf32>
    %c0_3 = arith.constant 0 : index
    %c0_4 = arith.constant 0 : index
    %3 = vector.load %arg2[%c0_3, %c0_4] : memref<1x512xf32, #tpu.memory_space<vmem>>, vector<1x512xf32>
    %4 = vector.broadcast %3 : vector<1x512xf32> to vector<8x512xf32>
    %5 = arith.addf %2, %4 : vector<8x512xf32>
    %cst_5 = arith.constant 0.000000e+00 : f32
    %6 = vector.broadcast %cst_5 : f32 to vector<8x512xf32>
    %7 = arith.maximumf %5, %6 : vector<8x512xf32>
    %8 = arith.truncf %7 : vector<8x512xf32> to vector<8x512xbf16>
    %c0_6 = arith.constant 0 : index
    %c0_7 = arith.constant 0 : index
    %9 = vector.load %arg3[%c0_6, %c0_7] : memref<512x512xbf16, #tpu.memory_space<vmem>>, vector<512x512xbf16>
    %cst_8 = arith.constant dense<0.000000e+00> : vector<8x512xf32>
    %10 = tpu.matmul %8, %9, %cst_8 {dimension_numbers = #tpu.dot_dimension_numbers<[1], [0], [0], [1], [0, 0, 1, 1], [], []>} : vector<8x512xbf16>, vector<512x512xbf16>, vector<8x512xf32> -> vector<8x512xf32>
    %c0_9 = arith.constant 0 : index
    %c0_10 = arith.constant 0 : index
    %11 = vector.load %arg4[%c0_9, %c0_10] : memref<1x512xf32, #tpu.memory_space<vmem>>, vector<1x512xf32>
    %12 = vector.broadcast %11 : vector<1x512xf32> to vector<8x512xf32>
    %13 = arith.addf %10, %12 : vector<8x512xf32>
    %c0_11 = arith.constant 0 : index
    %c0_12 = arith.constant 0 : index
    %14 = vector.load %arg5[%c0_11, %c0_12] : memref<1x512xf32, #tpu.memory_space<vmem>>, vector<1x512xf32>
    %c0_13 = arith.constant 0 : index
    %c0_14 = arith.constant 0 : index
    %15 = vector.load %arg6[%c0_13, %c0_14] : memref<1x512xf32, #tpu.memory_space<vmem>>, vector<1x512xf32>
    %cst_15 = arith.constant dense<0.000000e+00> : vector<512xf32>
    %16 = vector.multi_reduction <add>, %13, %cst_15 [0] : vector<8x512xf32> to vector<512xf32>
    %17 = vector.shape_cast %16 : vector<512xf32> to vector<1x512xf32>
    %cst_16 = arith.constant 8.000000e+00 : f32
    %18 = vector.broadcast %cst_16 : f32 to vector<1x512xf32>
    %19 = arith.divf %17, %18 : vector<1x512xf32>
    %20 = vector.broadcast %19 : vector<1x512xf32> to vector<8x512xf32>
    %21 = arith.subf %13, %20 : vector<8x512xf32>
    %22 = vector.broadcast %19 : vector<1x512xf32> to vector<8x512xf32>
    %23 = arith.subf %13, %22 : vector<8x512xf32>
    %24 = arith.mulf %21, %23 : vector<8x512xf32>
    %cst_17 = arith.constant dense<0.000000e+00> : vector<512xf32>
    %25 = vector.multi_reduction <add>, %24, %cst_17 [0] : vector<8x512xf32> to vector<512xf32>
    %26 = vector.shape_cast %25 : vector<512xf32> to vector<1x512xf32>
    %cst_18 = arith.constant 8.000000e+00 : f32
    %27 = vector.broadcast %cst_18 : f32 to vector<1x512xf32>
    %28 = arith.divf %26, %27 : vector<1x512xf32>
    %cst_19 = arith.constant 9.99999974E-6 : f32
    %29 = vector.broadcast %cst_19 : f32 to vector<1x512xf32>
    %30 = arith.addf %28, %29 : vector<1x512xf32>
    %31 = math.rsqrt %30 : vector<1x512xf32>
    %32 = vector.broadcast %19 : vector<1x512xf32> to vector<8x512xf32>
    %33 = arith.subf %13, %32 : vector<8x512xf32>
    %34 = vector.broadcast %31 : vector<1x512xf32> to vector<8x512xf32>
    %35 = arith.mulf %33, %34 : vector<8x512xf32>
    %36 = vector.broadcast %14 : vector<1x512xf32> to vector<8x512xf32>
    %37 = arith.mulf %35, %36 : vector<8x512xf32>
    %38 = vector.broadcast %15 : vector<1x512xf32> to vector<8x512xf32>
    %39 = arith.addf %37, %38 : vector<8x512xf32>
    %cst_20 = arith.constant 0.000000e+00 : f32
    %40 = vector.broadcast %cst_20 : f32 to vector<8x512xf32>
    %41 = arith.maximumf %39, %40 : vector<8x512xf32>
    %42 = arith.truncf %41 : vector<8x512xf32> to vector<8x512xbf16>
    %c0_21 = arith.constant 0 : index
    %c0_22 = arith.constant 0 : index
    %43 = vector.load %arg7[%c0_21, %c0_22] : memref<512x512xbf16, #tpu.memory_space<vmem>>, vector<512x512xbf16>
    %cst_23 = arith.constant dense<0.000000e+00> : vector<8x512xf32>
    %44 = tpu.matmul %42, %43, %cst_23 {dimension_numbers = #tpu.dot_dimension_numbers<[1], [0], [0], [1], [0, 0, 1, 1], [], []>} : vector<8x512xbf16>, vector<512x512xbf16>, vector<8x512xf32> -> vector<8x512xf32>
    %c0_24 = arith.constant 0 : index
    %c0_25 = arith.constant 0 : index
    %45 = vector.load %arg8[%c0_24, %c0_25] : memref<1x512xf32, #tpu.memory_space<vmem>>, vector<1x512xf32>
    %46 = vector.broadcast %45 : vector<1x512xf32> to vector<8x512xf32>
    %47 = arith.addf %44, %46 : vector<8x512xf32>
    %c0_26 = arith.constant 0 : index
    %c0_27 = arith.constant 0 : index
    %48 = vector.load %arg9[%c0_26, %c0_27] : memref<1x512xf32, #tpu.memory_space<vmem>>, vector<1x512xf32>
    %c0_28 = arith.constant 0 : index
    %c0_29 = arith.constant 0 : index
    %49 = vector.load %arg10[%c0_28, %c0_29] : memref<1x512xf32, #tpu.memory_space<vmem>>, vector<1x512xf32>
    %cst_30 = arith.constant dense<0.000000e+00> : vector<512xf32>
    %50 = vector.multi_reduction <add>, %47, %cst_30 [0] : vector<8x512xf32> to vector<512xf32>
    %51 = vector.shape_cast %50 : vector<512xf32> to vector<1x512xf32>
    %cst_31 = arith.constant 8.000000e+00 : f32
    %52 = vector.broadcast %cst_31 : f32 to vector<1x512xf32>
    %53 = arith.divf %51, %52 : vector<1x512xf32>
    %54 = vector.broadcast %53 : vector<1x512xf32> to vector<8x512xf32>
    %55 = arith.subf %47, %54 : vector<8x512xf32>
    %56 = vector.broadcast %53 : vector<1x512xf32> to vector<8x512xf32>
    %57 = arith.subf %47, %56 : vector<8x512xf32>
    %58 = arith.mulf %55, %57 : vector<8x512xf32>
    %cst_32 = arith.constant dense<0.000000e+00> : vector<512xf32>
    %59 = vector.multi_reduction <add>, %58, %cst_32 [0] : vector<8x512xf32> to vector<512xf32>
    %60 = vector.shape_cast %59 : vector<512xf32> to vector<1x512xf32>
    %cst_33 = arith.constant 8.000000e+00 : f32
    %61 = vector.broadcast %cst_33 : f32 to vector<1x512xf32>
    %62 = arith.divf %60, %61 : vector<1x512xf32>
    %cst_34 = arith.constant 9.99999974E-6 : f32
    %63 = vector.broadcast %cst_34 : f32 to vector<1x512xf32>
    %64 = arith.addf %62, %63 : vector<1x512xf32>
    %65 = math.rsqrt %64 : vector<1x512xf32>
    %66 = vector.broadcast %53 : vector<1x512xf32> to vector<8x512xf32>
    %67 = arith.subf %47, %66 : vector<8x512xf32>
    %68 = vector.broadcast %65 : vector<1x512xf32> to vector<8x512xf32>
    %69 = arith.mulf %67, %68 : vector<8x512xf32>
    %70 = vector.broadcast %48 : vector<1x512xf32> to vector<8x512xf32>
    %71 = arith.mulf %69, %70 : vector<8x512xf32>
    %72 = vector.broadcast %49 : vector<1x512xf32> to vector<8x512xf32>
    %73 = arith.addf %71, %72 : vector<8x512xf32>
    %cst_35 = arith.constant 0.000000e+00 : f32
    %74 = vector.broadcast %cst_35 : f32 to vector<8x512xf32>
    %75 = arith.maximumf %73, %74 : vector<8x512xf32>
    %76 = arith.truncf %75 : vector<8x512xf32> to vector<8x512xbf16>
    %c0_36 = arith.constant 0 : index
    %c0_37 = arith.constant 0 : index
    %77 = vector.load %arg11[%c0_36, %c0_37] : memref<512x128xbf16, #tpu.memory_space<vmem>>, vector<512x128xbf16>
    %cst_38 = arith.constant dense<0.000000e+00> : vector<8x128xf32>
    %78 = tpu.matmul %76, %77, %cst_38 {dimension_numbers = #tpu.dot_dimension_numbers<[1], [0], [0], [1], [0, 0, 1, 1], [], []>} : vector<8x512xbf16>, vector<512x128xbf16>, vector<8x128xf32> -> vector<8x128xf32>
    %c0_39 = arith.constant 0 : index
    %c0_40 = arith.constant 0 : index
    %79 = vector.load %arg12[%c0_39, %c0_40] : memref<1x128xf32, #tpu.memory_space<vmem>>, vector<1x128xf32>
    %80 = vector.broadcast %79 : vector<1x128xf32> to vector<8x128xf32>
    %81 = arith.addf %78, %80 : vector<8x128xf32>
    %c0_41 = arith.constant 0 : index
    %c0_42 = arith.constant 0 : index
    %82 = vector.load %arg13[%c0_41, %c0_42] : memref<8x128xf32, #tpu.memory_space<vmem>>, vector<8x128xf32>
    tpu.vector_store %arg13[%c0_41, %c0_42], %81 {strides = array<i32>} : memref<8x128xf32, #tpu.memory_space<vmem>>, vector<8x128xf32>,
    return
  }
}

</mosaic_0001>

<bundles_post_ra>
// kernel: net_forward.1
= control target key start
LH: loop header
LB: loop body
LE: loop exit
PB: predicated region body
PF: predicated region fallthrough
CT: control target
= control target key end

     0   :  { %18 = vsyncpa [#allocation3], 0  ;;  %s7693_s0 = inlined_call_operand.vmem [shape: bf16[8,896], index: 0, kind: input, shape index: {}]   ;;  %s7694_s1 = inlined_call_operand.hbm [shape: bf16[896,512], index: 1, kind: input, shape index: {}]   ;;  %s7695_s2 = inlined_call_operand.vmem [shape: f32[1,512], index: 2, kind: input, shape index: {}]   ;;  %s7696_s3 = inlined_call_operand.hbm [shape: bf16[512,512], index: 3, kind: input, shape index: {}]   ;;  %s7697_s4 = inlined_call_operand.vmem [shape: f32[1,512], index: 4, kind: input, shape index: {}]   ;;  %s7698_s5 = inlined_call_operand.vmem [shape: f32[1,512], index: 5, kind: input, shape index: {}]   ;;  %s7699_s6 = inlined_call_operand.vmem [shape: f32[1,512], index: 6, kind: input, shape index: {}]   ;;  %s7700_s7 = inlined_call_operand.hbm [shape: bf16[512,512], index: 7, kind: input, shape index: {}]   ;;  %s7701_s8 = inlined_call_operand.vmem [shape: f32[1,512], index: 8, kind: input, shape index: {}]   ;;  %s7702_s9 = inlined_call_operand.vmem [shape: f32[1,512], index: 9, kind: input, shape index: {}]   ;;  %s7703_s10 = inlined_call_operand.vmem [shape: f32[1,512], index: 10, kind: input, shape index: {}]   ;;  %s7704_s11 = inlined_call_operand.vmem [shape: bf16[512,128], index: 11, kind: input, shape index: {}]   ;;  %s7705_s12 = inlined_call_operand.vmem [shape: f32[1,128], index: 12, kind: input, shape index: {}]   ;;  %s7706_s13 = inlined_call_operand.hbm [shape: f32[8,128], index: 13, kind: output, shape index: {}]  }
   0x1   :  { %19 = vsyncpa [#allocation6], 0 }
   0x2   :  { %20 = vsyncpa [#allocation4], 0  ;;  %s42_s27 = sshll.u32 %s7696_s3, 4  ;;  %s7142_s28 = smov [#allocation5]   ;;  %s43_s27 = int_to_ptr.hbm [resolvable:$true] %s42_s27 }
   0x3   :  { %s44_s29 = sshll.u32 %s7142_s28, 4  ;;  %s27_s15 = sshll.u32 %s7694_s1, 4  ;;  %s45_s29 = int_to_ptr.vmem [resolvable:$true] %s44_s29  ;;  %s28_s15 = int_to_ptr.hbm [resolvable:$true] %s27_s15 }
   0x4   :  { %s7143_s16 = smov 256   ;;  %s7144_s17 = smov 16  }
   0x5   :  { %50 = dma.hbm_to_vmem [thread:$0]  %s43_s27, 16384, %s45_s29, [#allocation6], %s7143_s16, %s7143_s16, %s7144_s17  }
   0x6   :  { %s7145_s18 = smov [#allocation2]   ;;  %s61_s22 = sshll.u32 %s7700_s7, 4  ;;  %s62_s22 = int_to_ptr.hbm [resolvable:$true] %s61_s22 }
   0x7   :  { %s29_s19 = sshll.u32 %s7145_s18, 4  ;;  %s7146_s3 = smov [#allocation7]   ;;  %s30_s19 = int_to_ptr.vmem [resolvable:$true] %s29_s19 }
   0x8   :  { %35 = dma.hbm_to_vmem [thread:$0]  %s28_s15, 28672, %s30_s19, [#allocation3], %s7143_s16, %s7143_s16, %s7144_s17  }
   0x9   :  { %s63_s23 = sshll.u32 %s7146_s3, 4  ;;  %s64_s23 = int_to_ptr.vmem [resolvable:$true] %s63_s23 }
   0xa   :  { %69 = dma.hbm_to_vmem [thread:$0]  %s62_s22, 16384, %s64_s23, [#allocation6], %s7143_s16, %s7143_s16, %s7144_s17  }
   0xb   :  { %7136 = dma.done.wait [#allocation3], 28672  }
   0xc   :  { %7137 = vsyncadd [#allocation3], 4294938624 }
   0xd   :  { %7138 = dma.done.wait [#allocation6], 32768  }
   0xe   :  { %7139 = vsyncadd [#allocation6], 4294934528  ;;  %v4567_v0 = vld [vmem:[#allocation2 + $0xe0] sm:$0xf]  ;;  %v6531_v1 = vld [vmem:[#allocation2 + $0xec] sm:$0xf0] }
   0xf   :  { %v4695_v2 = vld [vmem:[#allocation2 + $0x1e0] sm:$0xf]  ;;  %v4568_v3 = vor.u32 %v6531_v1, %v4567_v0  ;;  %v6563_v4 = vld [vmem:[#allocation2 + $0x1ec] sm:$0xf0]  ;;  %s7148_s30 = smov [#allocation8]   ;;  %s4442_s16 = sshll.u32 %s7706_s13, 4  ;;  %s4443_s16 = int_to_ptr.hbm [resolvable:$true] %s4442_s16 }
  0x10   :  { %v4823_v5 = vld [vmem:[#allocation2 + $0x2e0] sm:$0xf]  ;;  %v6595_v6 = vld [vmem:[#allocation2 + $0x2ec] sm:$0xf0]  ;;  %v4696_v7 = vor.u32 %v6563_v4, %v4695_v2  ;;  %s4440_s14 = sshll.u32 %s7148_s30, 4  ;;  %s4441_s14 = int_to_ptr.vmem [resolvable:$true] %s4440_s14 }
  0x11   :  { %v4824_v8 = vor.u32 %v6595_v6, %v4823_v5  ;;  %v4951_v9 = vld [vmem:[#allocation2 + $0x3e0] sm:$0xf]  ;;  %v6627_v10 = vld [vmem:[#allocation2 + $0x3ec] sm:$0xf0]  ;;  %1475 = vmatpush.bf16.msra.mxu0 %v4568_v3 }
  0x12   :  { %v4551_v11 = vld [vmem:[#allocation2 + $0xc0] sm:$0xf]  ;;  %v4952_v12 = vor.u32 %v6627_v10, %v4951_v9  ;;  %v6527_v13 = vld [vmem:[#allocation2 + $0xcc] sm:$0xf0]  ;;  %1488 = vmatpush.bf16.msra.mxu1 %v4696_v7 }
  0x13   :  { %v4679_v14 = vld [vmem:[#allocation2 + $0x1c0] sm:$0xf]  ;;  %v6559_v15 = vld [vmem:[#allocation2 + $0x1cc] sm:$0xf0]  ;;  %1501 = vmatpush.bf16.msra.mxu2 %v4824_v8  ;;  %v4552_v16 = vor.u32 %v6527_v13, %v4551_v11 }
  0x14   :  { %v4680_v17 = vor.u32 %v6559_v15, %v4679_v14  ;;  %v4807_v18 = vld [vmem:[#allocation2 + $0x2c0] sm:$0xf]  ;;  %v6591_v19 = vld [vmem:[#allocation2 + $0x2cc] sm:$0xf0]  ;;  %1514 = vmatpush.bf16.msra.mxu3 %v4952_v12 }
  0x15   :  { %v4935_v20 = vld [vmem:[#allocation2 + $0x3c0] sm:$0xf]  ;;  %v4808_v21 = vor.u32 %v6591_v19, %v4807_v18  ;;  %v6623_v22 = vld [vmem:[#allocation2 + $0x3cc] sm:$0xf0]  ;;  %1476 = vmatpush.bf16.msra.mxu0 %v4552_v16 }
  0x16   :  { %v4535_v23 = vld [vmem:[#allocation2 + $0xa0] sm:$0xf]  ;;  %v6523_v24 = vld [vmem:[#allocation2 + $0xac] sm:$0xf0]  ;;  %v4936_v25 = vor.u32 %v6623_v22, %v4935_v20  ;;  %1489 = vmatpush.bf16.msra.mxu1 %v4680_v17 }
  0x17   :  { %v4663_v26 = vld [vmem:[#allocation2 + $0x1a0] sm:$0xf]  ;;  %v6555_v27 = vld [vmem:[#allocation2 + $0x1ac] sm:$0xf0]  ;;  %v4536_v29 = vor.u32 %v6523_v24, %v4535_v23  ;;  %1502 = vmatpush.bf16.msra.mxu2 %v4808_v21 }
  0x18   :  { %v4791_v28 = vld [vmem:[#allocation2 + $0x2a0] sm:$0xf]  ;;  %v6587_v30 = vld [vmem:[#allocation2 + $0x2ac] sm:$0xf0]  ;;  %v4664_v33 = vor.u32 %v6555_v27, %v4663_v26  ;;  %1515 = vmatpush.bf16.msra.mxu3 %v4936_v25 }
  0x19   :  { %v4919_v31 = vld [vmem:[#allocation2 + $0x3a0] sm:$0xf]  ;;  %v6619_v32 = vld [vmem:[#allocation2 + $0x3ac] sm:$0xf0]  ;;  %v4792_v34 = vor.u32 %v6587_v30, %v4791_v28  ;;  %1477 = vmatpush.bf16.msra.mxu0 %v4536_v29 }
  0x1a   :  { %v4519_v35 = vld [vmem:[#allocation2 + $0x80] sm:$0xf]  ;;  %v6519_v36 = vld [vmem:[#allocation2 + $0x8c] sm:$0xf0]  ;;  %v4920_v38 = vor.u32 %v6619_v32, %v4919_v31  ;;  %1490 = vmatpush.bf16.msra.mxu1 %v4664_v33 }
  0x1b   :  { %v4647_v37 = vld [vmem:[#allocation2 + $0x180] sm:$0xf]  ;;  %v6551_v39 = vld [vmem:[#allocation2 + $0x18c] sm:$0xf0]  ;;  %v4520_v44 = vor.u32 %v6519_v36, %v4519_v35  ;;  %1503 = vmatpush.bf16.msra.mxu2 %v4792_v34 }
  0x1c   :  { %v4775_v40 = vld [vmem:[#allocation2 + $0x280] sm:$0xf]  ;;  %v6583_v41 = vld [vmem:[#allocation2 + $0x28c] sm:$0xf0]  ;;  %v4648_v45 = vor.u32 %v6551_v39, %v4647_v37  ;;  %1516 = vmatpush.bf16.msra.mxu3 %v4920_v38  ;;  %v6529_v37 = vld [vmem:[#allocation2 + $0xe4] sm:$0xf] }
  0x1d   :  { %v4903_v42 = vld [vmem:[#allocation2 + $0x380] sm:$0xf]  ;;  %v6615_v43 = vld [vmem:[#allocation2 + $0x38c] sm:$0xf0]  ;;  %v4776_v46 = vor.u32 %v6583_v41, %v4775_v40  ;;  %1478 = vmatpush.bf16.msra.mxu0 %v4520_v44  ;;  %v4569_v38 = vld [vmem:[#allocation2 + $0xf0] sm:$0xf0] }
  0x1e   :  { %v4503_v47 = vld [vmem:[#allocation2 + $0x60] sm:$0xf]  ;;  %v6515_v48 = vld [vmem:[#allocation2 + $0x6c] sm:$0xf0]  ;;  %v4904_v50 = vor.u32 %v6615_v43, %v4903_v42  ;;  %1491 = vmatpush.bf16.msra.mxu1 %v4648_v45 }
  0x1f   :  { %v4631_v49 = vld [vmem:[#allocation2 + $0x160] sm:$0xf]  ;;  %v6547_v51 = vld [vmem:[#allocation2 + $0x16c] sm:$0xf0]  ;;  %v4504_v56 = vor.u32 %v6515_v48, %v4503_v47  ;;  %1504 = vmatpush.bf16.msra.mxu2 %v4776_v46  ;;  %v4572_v46 = vor.u32 %v6529_v37, %v4569_v38 }
  0x20   :  { %v4759_v52 = vld [vmem:[#allocation2 + $0x260] sm:$0xf]  ;;  %v6579_v53 = vld [vmem:[#allocation2 + $0x26c] sm:$0xf0]  ;;  %v4632_v57 = vor.u32 %v6547_v51, %v4631_v49  ;;  %1517 = vmatpush.bf16.msra.mxu3 %v4904_v50  ;;  %v6525_v50 = vld [vmem:[#allocation2 + $0xc4] sm:$0xf] }
  0x21   :  { %v4887_v54 = vld [vmem:[#allocation2 + $0x360] sm:$0xf]  ;;  %v6611_v55 = vld [vmem:[#allocation2 + $0x36c] sm:$0xf0]  ;;  %v4760_v58 = vor.u32 %v6579_v53, %v4759_v52  ;;  %1479 = vmatpush.bf16.msra.mxu0 %v4504_v56  ;;  %v4553_v51 = vld [vmem:[#allocation2 + $0xd0] sm:$0xf0] }
  0x22   :  { %v4487_v59 = vld [vmem:[#allocation2 + $0x40] sm:$0xf]  ;;  %v6511_v60 = vld [vmem:[#allocation2 + $0x4c] sm:$0xf0]  ;;  %v4888_v62 = vor.u32 %v6611_v55, %v4887_v54  ;;  %1492 = vmatpush.bf16.msra.mxu1 %v4632_v57 }
  0x23   :  { %v4615_v61 = vld [vmem:[#allocation2 + $0x140] sm:$0xf]  ;;  %v6543_v63 = vld [vmem:[#allocation2 + $0x14c] sm:$0xf0]  ;;  %v4488_v4 = vor.u32 %v6511_v60, %v4487_v59  ;;  %1505 = vmatpush.bf16.msra.mxu2 %v4760_v58  ;;  %v4556_v59 = vor.u32 %v6525_v50, %v4553_v51 }
  0x24   :  { %v4743_v0 = vld [vmem:[#allocation2 + $0x240] sm:$0xf]  ;;  %v6575_v1 = vld [vmem:[#allocation2 + $0x24c] sm:$0xf0]  ;;  %v4616_v5 = vor.u32 %v6543_v63, %v4615_v61  ;;  %1518 = vmatpush.bf16.msra.mxu3 %v4888_v62  ;;  %v6521_v62 = vld [vmem:[#allocation2 + $0xa4] sm:$0xf] }
  0x25   :  { %v4871_v2 = vld [vmem:[#allocation2 + $0x340] sm:$0xf]  ;;  %v6607_v3 = vld [vmem:[#allocation2 + $0x34c] sm:$0xf0]  ;;  %v4744_v6 = vor.u32 %v6575_v1, %v4743_v0  ;;  %1480 = vmatpush.bf16.msra.mxu0 %v4488_v4  ;;  %v4537_v63 = vld [vmem:[#allocation2 + $0xb0] sm:$0xf0] }
  0x26   :  { %v4471_v7 = vld [vmem:[#allocation2 + $0x20] sm:$0xf]  ;;  %v6507_v8 = vld [vmem:[#allocation2 + $0x2c] sm:$0xf0]  ;;  %v4872_v10 = vor.u32 %v6607_v3, %v4871_v2  ;;  %1493 = vmatpush.bf16.msra.mxu1 %v4616_v5  ;;  %v93_v2 = vld [vmem:[%s7693_s0 + $0x8] sm:$0xff] }
  0x27   :  { %v4599_v9 = vld [vmem:[#allocation2 + $0x120] sm:$0xf]  ;;  %v6539_v11 = vld [vmem:[#allocation2 + $0x12c] sm:$0xf0]  ;;  %v4472_v16 = vor.u32 %v6507_v8, %v4471_v7  ;;  %1506 = vmatpush.bf16.msra.mxu2 %v4744_v6  ;;  %v336_v8 = vunpack.c.l.b16 %v93_v2 }
  0x28   :  { %v4727_v12 = vld [vmem:[#allocation2 + $0x220] sm:$0xf]  ;;  %v6571_v13 = vld [vmem:[#allocation2 + $0x22c] sm:$0xf0]  ;;  %v4600_v19 = vor.u32 %v6539_v11, %v4599_v9  ;;  %1519 = vmatpush.bf16.msra.mxu3 %v4872_v10  ;;  %v337_v10 = vunpack.c.h.b16 %v93_v2  ;;  %v4540_v11 = vor.u32 %v6521_v62, %v4537_v63 }
  0x29   :  { %v4855_v14 = vld [vmem:[#allocation2 + $0x320] sm:$0xf]  ;;  %v6603_v15 = vld [vmem:[#allocation2 + $0x32c] sm:$0xf0]  ;;  %v4728_v20 = vor.u32 %v6571_v13, %v4727_v12  ;;  %1481 = vmatpush.bf16.msra.mxu0 %v4472_v16  ;;  %v6517_v16 = vld [vmem:[#allocation2 + $0x84] sm:$0xf] }
  0x2a   :  { %v4455_v17 = vld [vmem:[#allocation2] sm:$0xf]  ;;  %v6503_v18 = vld [vmem:[#allocation2 + $0xc] sm:$0xf0]  ;;  %v4856_v24 = vor.u32 %v6603_v15, %v4855_v14  ;;  %1494 = vmatpush.bf16.msra.mxu1 %v4600_v19 }
  0x2b   :  { %v4583_v21 = vld [vmem:[#allocation2 + $0x100] sm:$0xf]  ;;  %v6535_v22 = vld [vmem:[#allocation2 + $0x10c] sm:$0xf0]  ;;  %v4456_v31 = vor.u32 %v6503_v18, %v4455_v17  ;;  %1507 = vmatpush.bf16.msra.mxu2 %v4728_v20  ;;  %v4521_v17 = vld [vmem:[#allocation2 + $0x90] sm:$0xf0]  ;;  %v7234_v18 = vpack.c.b16 %v336_v8, %v336_v8  ;;  %v7238_v20 = vpack.c.b16 %v337_v10, %v337_v10 }
  0x2c   :  { %v4711_v23 = vld [vmem:[#allocation2 + $0x200] sm:$0xf]  ;;  %v6567_v25 = vld [vmem:[#allocation2 + $0x20c] sm:$0xf0]  ;;  %v4584_v35 = vor.u32 %v6535_v22, %v4583_v21  ;;  %1520 = vmatpush.bf16.msra.mxu3 %v4856_v24  ;;  %v6561_v8 = vld [vmem:[#allocation2 + $0x1e4] sm:$0xf] }
  0x2d   :  { %v4839_v26 = vld [vmem:[#allocation2 + $0x300] sm:$0xf]  ;;  %v6599_v27 = vld [vmem:[#allocation2 + $0x30c] sm:$0xf0]  ;;  %v4712_v36 = vor.u32 %v6567_v25, %v4711_v23  ;;  %1482 = vmatpush.bf16.msra.mxu0 %v4456_v31  ;;  %v6593_v10 = vld [vmem:[#allocation2 + $0x2e4] sm:$0xf] }
  0x2e   :  { %v5079_v28 = vld [vmem:[#allocation2 + $0x4e0] sm:$0xf]  ;;  %v6659_v29 = vld [vmem:[#allocation2 + $0x4ec] sm:$0xf0]  ;;  %v4840_v39 = vor.u32 %v6599_v27, %v4839_v26  ;;  %1495 = vmatpush.bf16.msra.mxu1 %v4584_v35 }
  0x2f   :  { %v5207_v30 = vld [vmem:[#allocation2 + $0x5e0] sm:$0xf]  ;;  %v6691_v32 = vld [vmem:[#allocation2 + $0x5ec] sm:$0xf0]  ;;  %v5080_v40 = vor.u32 %v6659_v29, %v5079_v28  ;;  %1508 = vmatpush.bf16.msra.mxu2 %v4712_v36  ;;  %v4524_v28 = vor.u32 %v6517_v16, %v4521_v17 }
  0x30   :  { %v5335_v33 = vld [vmem:[#allocation2 + $0x6e0] sm:$0xf]  ;;  %v6723_v34 = vld [vmem:[#allocation2 + $0x6ec] sm:$0xf0]  ;;  %v5208_v41 = vor.u32 %v6691_v32, %v5207_v30  ;;  %1521 = vmatpush.bf16.msra.mxu3 %v4840_v39  ;;  %v6513_v32 = vld [vmem:[#allocation2 + $0x64] sm:$0xf] }
  0x31   :  { %v5336_v42 = vor.u32 %v6723_v34, %v5335_v33  ;;  %v5063_v43 = vld [vmem:[#allocation2 + $0x4c0] sm:$0xf]  ;;  %v6655_v44 = vld [vmem:[#allocation2 + $0x4cc] sm:$0xf0]  ;;  %1527 = vmatpush.bf16.msrb.mxu0 %v5080_v40  ;;  %v4505_v33 = vld [vmem:[#allocation2 + $0x70] sm:$0xf0] }
  0x32   :  { %v5191_v45 = vld [vmem:[#allocation2 + $0x5c0] sm:$0xf]  ;;  %v6687_v47 = vld [vmem:[#allocation2 + $0x5cc] sm:$0xf0]  ;;  %v5064_v52 = vor.u32 %v6655_v44, %v5063_v43  ;;  %1540 = vmatpush.bf16.msrb.mxu1 %v5208_v41  ;;  %1509 = vmatmul.bf16.vlgmr.msra.gmra.mxu2 %v7234_v18  ;;  %v4508_v40 = vor.u32 %v6513_v32, %v4505_v33  ;;  %v6509_v44 = vld [vmem:[#allocation2 + $0x44] sm:$0xf] }
  0x33   :  { %v5319_v48 = vld [vmem:[#allocation2 + $0x6c0] sm:$0xf]  ;;  %v6719_v49 = vld [vmem:[#allocation2 + $0x6cc] sm:$0xf0]  ;;  %1553 = vmatpush.bf16.msrb.mxu2 %v5336_v42  ;;  %v5192_v54 = vor.u32 %v6687_v47, %v5191_v45  ;;  %1522 = vmatmul.bf16.vlgmr.msra.gmra.mxu3 %v7238_v20  ;;  %v4489_v45 = vld [vmem:[#allocation2 + $0x50] sm:$0xf0] }
  0x34   :  { %v5047_v53 = vld [vmem:[#allocation2 + $0x4a0] sm:$0xf]  ;;  %v5320_v55 = vor.u32 %v6719_v49, %v5319_v48  ;;  %v6651_v56 = vld [vmem:[#allocation2 + $0x4ac] sm:$0xf0]  ;;  %1566 = vmatpush.bf16.msrb.mxu3 %v4572_v46  ;;  %v6589_v32 = vld [vmem:[#allocation2 + $0x2c4] sm:$0xf] }
  0x35   :  { %v5175_v57 = vld [vmem:[#allocation2 + $0x5a0] sm:$0xf]  ;;  %v6683_v58 = vld [vmem:[#allocation2 + $0x5ac] sm:$0xf0]  ;;  %1528 = vmatpush.bf16.msrb.mxu0 %v5064_v52  ;;  %v5048_v0 = vor.u32 %v6651_v56, %v5047_v53  ;;  %v4492_v52 = vor.u32 %v6509_v44, %v4489_v45  ;;  %v6505_v56 = vld [vmem:[#allocation2 + $0x24] sm:$0xf] }
  0x36   :  { %v5303_v60 = vld [vmem:[#allocation2 + $0x6a0] sm:$0xf]  ;;  %v6715_v61 = vld [vmem:[#allocation2 + $0x6ac] sm:$0xf0]  ;;  %v5176_v1 = vor.u32 %v6683_v58, %v5175_v57  ;;  %1541 = vmatpush.bf16.msrb.mxu1 %v5192_v54  ;;  %v4473_v57 = vld [vmem:[#allocation2 + $0x30] sm:$0xf0] }
  0x37   :  { %v92_v3 = vld [vmem:[%s7693_s0] sm:$0xff]  ;;  %1554 = vmatpush.bf16.msrb.mxu2 %v5320_v55  ;;  %v5304_v4 = vor.u32 %v6715_v61, %v5303_v60  ;;  %v6647_v6 = vld [vmem:[#allocation2 + $0x48c] sm:$0xf0] }
  0x38   :  { %v5031_v5 = vld [vmem:[#allocation2 + $0x480] sm:$0xf]  ;;  %v334_v9 = vunpack.c.l.b16 %v92_v3  ;;  %1567 = vmatpush.bf16.msrb.mxu3 %v4556_v59  ;;  %v6679_v12 = vld [vmem:[#allocation2 + $0x58c] sm:$0xf0]  ;;  %v335_v15 = vunpack.c.h.b16 %v92_v3  ;;  %v95_v3 = vld [vmem:[%s7693_s0 + $0x18] sm:$0xf] }
  0x39   :  { %v5159_v7 = vld [vmem:[#allocation2 + $0x580] sm:$0xf]  ;;  %v6711_v14 = vld [vmem:[#allocation2 + $0x68c] sm:$0xf0]  ;;  %1529 = vmatpush.bf16.msrb.mxu0 %v5048_v0  ;;  %v5032_v21 = vor.u32 %v6647_v6, %v5031_v5  ;;  %v6501_v5 = vld [vmem:[#allocation2 + $0x4] sm:$0xf] }
  0x3a   :  { %v5287_v13 = vld [vmem:[#allocation2 + $0x680] sm:$0xf]  ;;  %v7236_v19 = vpack.c.b16 %v334_v9, %v334_v9  ;;  %v7240_v22 = vpack.c.b16 %v335_v15, %v335_v15  ;;  %1542 = vmatpush.bf16.msrb.mxu1 %v5176_v1  ;;  %v5160_v23 = vor.u32 %v6679_v12, %v5159_v7  ;;  %v6643_v26 = vld [vmem:[#allocation2 + $0x46c] sm:$0xf0]  ;;  %v4457_v6 = vld [vmem:[#allocation2 + $0x10] sm:$0xf0]  ;;  %v340_v15 = vunpack.c.l.b16 %v95_v3 }
  0x3b   :  { %1555 = vmatpush.bf16.msrb.mxu2 %v5304_v4  ;;  %v5288_v24 = vor.u32 %v6711_v14, %v5287_v13  ;;  %v5015_v25 = vld [vmem:[#allocation2 + $0x460] sm:$0xf]  ;;  %v6675_v29 = vld [vmem:[#allocation2 + $0x56c] sm:$0xf0]  ;;  %v4476_v4 = vor.u32 %v6505_v56, %v4473_v57  ;;  %v4697_v9 = vld [vmem:[#allocation2 + $0x1f0] sm:$0xf0] }
  0x3c   :  { %v5143_v27 = vld [vmem:[#allocation2 + $0x560] sm:$0xf]  ;;  %1568 = vmatpush.bf16.msrb.mxu3 %v4540_v11  ;;  %v6707_v31 = vld [vmem:[#allocation2 + $0x66c] sm:$0xf0]  ;;  %1483 = vmatmul.bf16.vlgmr.msra.gmra.mxu0 %v7236_v19  ;;  %v5016_v34 = vor.u32 %v6643_v26, %v5015_v25  ;;  %v4825_v12 = vld [vmem:[#allocation2 + $0x2f0] sm:$0xf0]  ;;  %v4460_v26 = vor.u32 %v6501_v5, %v4457_v6 }
  0x3d   :  { %v5271_v30 = vld [vmem:[#allocation2 + $0x660] sm:$0xf]  ;;  %1530 = vmatpush.bf16.msrb.mxu0 %v5032_v21  ;;  %1496 = vmatmul.bf16.vlgmr.msra.gmra.mxu1 %v7240_v22  ;;  %v5144_v35 = vor.u32 %v6675_v29, %v5143_v27  ;;  %v6639_v38 = vld [vmem:[#allocation2 + $0x44c] sm:$0xf0]  ;;  %v6625_v13 = vld [vmem:[#allocation2 + $0x3e4] sm:$0xf]  ;;  %v4700_v27 = vor.u32 %v6561_v8, %v4697_v9 }
  0x3e   :  { %1543 = vmatpush.bf16.msrb.mxu1 %v5160_v23  ;;  %v5272_v36 = vor.u32 %v6707_v31, %v5271_v30  ;;  %v4999_v37 = vld [vmem:[#allocation2 + $0x440] sm:$0xf]  ;;  %v6671_v41 = vld [vmem:[#allocation2 + $0x54c] sm:$0xf0]  ;;  %v4953_v14 = vld [vmem:[#allocation2 + $0x3f0] sm:$0xf0] }
  0x3f   :  { %1556 = vmatpush.bf16.msrb.mxu2 %v5288_v24  ;;  %v5127_v39 = vld [vmem:[#allocation2 + $0x540] sm:$0xf]  ;;  %v6703_v43 = vld [vmem:[#allocation2 + $0x64c] sm:$0xf0]  ;;  %v5000_v46 = vor.u32 %v6639_v38, %v4999_v37  ;;  %v6657_v21 = vld [vmem:[#allocation2 + $0x4e4] sm:$0xf]  ;;  %v4956_v29 = vor.u32 %v6625_v13, %v4953_v14  ;;  %v7252_v37 = vpack.c.b16 %v340_v15, %v340_v15 }
  0x40   :  { %1569 = vmatpush.bf16.msrb.mxu3 %v4524_v28  ;;  %v5255_v42 = vld [vmem:[#allocation2 + $0x640] sm:$0xf]  ;;  %v5128_v47 = vor.u32 %v6671_v41, %v5127_v39  ;;  %v6635_v50 = vld [vmem:[#allocation2 + $0x42c] sm:$0xf0]  ;;  %v5081_v23 = vld [vmem:[#allocation2 + $0x4f0] sm:$0xf0]  ;;  %v4828_v28 = vor.u32 %v6593_v10, %v4825_v12 }
  0x41   :  { %1531 = vmatpush.bf16.msrb.mxu0 %v5016_v34  ;;  %v5256_v48 = vor.u32 %v6703_v43, %v5255_v42  ;;  %v4983_v49 = vld [vmem:[#allocation2 + $0x420] sm:$0xf]  ;;  %v6667_v53 = vld [vmem:[#allocation2 + $0x52c] sm:$0xf0]  ;;  %v6557_v30 = vld [vmem:[#allocation2 + $0x1c4] sm:$0xf]  ;;  %v5084_v33 = vor.u32 %v6657_v21, %v5081_v23 }
  0x42   :  { %1544 = vmatpush.bf16.msrb.mxu1 %v5144_v35  ;;  %v5111_v51 = vld [vmem:[#allocation2 + $0x520] sm:$0xf]  ;;  %v6699_v55 = vld [vmem:[#allocation2 + $0x62c] sm:$0xf0]  ;;  %v4984_v59 = vor.u32 %v6635_v50, %v4983_v49  ;;  %v4681_v31 = vld [vmem:[#allocation2 + $0x1d0] sm:$0xf0] }
  0x43   :  { %1557 = vmatpush.bf16.msrb.mxu2 %v5272_v36  ;;  %v5239_v54 = vld [vmem:[#allocation2 + $0x620] sm:$0xf]  ;;  %v6631_v60 = vld [vmem:[#allocation2 + $0x40c] sm:$0xf0]  ;;  %v5112_v63 = vor.u32 %v6667_v53, %v5111_v51  ;;  %v4809_v34 = vld [vmem:[#allocation2 + $0x2d0] sm:$0xf0]  ;;  %v4684_v42 = vor.u32 %v6557_v30, %v4681_v31 }
  0x44   :  { %1570 = vmatpush.bf16.msrb.mxu3 %v4508_v40  ;;  %v4967_v58 = vld [vmem:[#allocation2 + $0x400] sm:$0xf]  ;;  %v6663_v62 = vld [vmem:[#allocation2 + $0x50c] sm:$0xf0]  ;;  %v5240_v0 = vor.u32 %v6699_v55, %v5239_v54  ;;  %v6621_v35 = vld [vmem:[#allocation2 + $0x3c4] sm:$0xf]  ;;  %v4812_v43 = vor.u32 %v6589_v32, %v4809_v34 }
  0x45   :  { %1532 = vmatpush.bf16.msrb.mxu0 %v5000_v46  ;;  %v5095_v61 = vld [vmem:[#allocation2 + $0x500] sm:$0xf]  ;;  %v6695_v2 = vld [vmem:[#allocation2 + $0x60c] sm:$0xf0]  ;;  %v4968_v11 = vor.u32 %v6631_v60, %v4967_v58  ;;  %v4937_v36 = vld [vmem:[#allocation2 + $0x3d0] sm:$0xf0] }
  0x46   :  { %1545 = vmatpush.bf16.msrb.mxu1 %v5128_v47  ;;  %v5223_v1 = vld [vmem:[#allocation2 + $0x600] sm:$0xf]  ;;  %v94_v7 = vld [vmem:[%s7693_s0 + $0x10] sm:$0xff]  ;;  %v5096_v16 = vor.u32 %v6663_v62, %v5095_v61  ;;  %v6653_v38 = vld [vmem:[#allocation2 + $0x4c4] sm:$0xf]  ;;  %v4940_v44 = vor.u32 %v6621_v35, %v4937_v36 }
  0x47   :  { %1558 = vmatpush.bf16.msrb.mxu2 %v5256_v48  ;;  %v5224_v17 = vor.u32 %v6695_v2, %v5223_v1  ;;  %v338_v24 = vunpack.c.l.b16 %v94_v7  ;;  %v339_v25 = vunpack.c.h.b16 %v94_v7  ;;  %v5065_v39 = vld [vmem:[#allocation2 + $0x4d0] sm:$0xf0]  ;;  %v6553_v45 = vld [vmem:[#allocation2 + $0x1a4] sm:$0xf] }
  0x48   :  { %1571 = vmatpush.bf16.msrb.mxu3 %v4492_v52  ;;  %v4665_v46 = vld [vmem:[#allocation2 + $0x1b0] sm:$0xf0]  ;;  %v6585_v47 = vld [vmem:[#allocation2 + $0x2a4] sm:$0xf]  ;;  %v5068_v48 = vor.u32 %v6653_v38, %v5065_v39 }
  0x49   :  { %1533 = vmatpush.bf16.msrb.mxu0 %v4984_v59  ;;  %v7254_v40 = vpack.c.b16 %v338_v24, %v338_v24  ;;  %v7256_v41 = vpack.c.b16 %v339_v25, %v339_v25  ;;  %v4793_v49 = vld [vmem:[#allocation2 + $0x2b0] sm:$0xf0]  ;;  %v6617_v50 = vld [vmem:[#allocation2 + $0x3a4] sm:$0xf]  ;;  %v4668_v54 = vor.u32 %v6553_v45, %v4665_v46 }
  0x4a   :  { %1546 = vmatpush.bf16.msrb.mxu1 %v5112_v63  ;;  %v4921_v51 = vld [vmem:[#allocation2 + $0x3b0] sm:$0xf0]  ;;  %v6649_v52 = vld [vmem:[#allocation2 + $0x4a4] sm:$0xf]  ;;  %v4796_v55 = vor.u32 %v6585_v47, %v4793_v49 }
  0x4b   :  { %1559 = vmatpush.bf16.msrb.mxu2 %v5240_v0  ;;  %v5049_v53 = vld [vmem:[#allocation2 + $0x4b0] sm:$0xf0]  ;;  %v4924_v56 = vor.u32 %v6617_v50, %v4921_v51  ;;  %v6549_v57 = vld [vmem:[#allocation2 + $0x184] sm:$0xf] }
  0x4c   :  { %1572 = vmatpush.bf16.msrb.mxu3 %v4476_v4  ;;  %v4649_v58 = vld [vmem:[#allocation2 + $0x190] sm:$0xf0]  ;;  %v6581_v59 = vld [vmem:[#allocation2 + $0x284] sm:$0xf]  ;;  %v5052_v60 = vor.u32 %v6649_v52, %v5049_v53 }
  0x4d   :  { %1534 = vmatpush.bf16.msrb.mxu0 %v4968_v11  ;;  %v4777_v61 = vld [vmem:[#allocation2 + $0x290] sm:$0xf0]  ;;  %v6613_v62 = vld [vmem:[#allocation2 + $0x384] sm:$0xf]  ;;  %v4652_v2 = vor.u32 %v6549_v57, %v4649_v58 }
  0x4e   :  { %1547 = vmatpush.bf16.msrb.mxu1 %v5096_v16  ;;  %v4905_v63 = vld [vmem:[#allocation2 + $0x390] sm:$0xf0]  ;;  %v6645_v0 = vld [vmem:[#allocation2 + $0x484] sm:$0xf]  ;;  %v4780_v3 = vor.u32 %v6581_v59, %v4777_v61 }
  0x4f   :  { %1560 = vmatpush.bf16.msrb.mxu2 %v5224_v17  ;;  %v5033_v1 = vld [vmem:[#allocation2 + $0x490] sm:$0xf0]  ;;  %v4908_v4 = vor.u32 %v6613_v62, %v4905_v63  ;;  %v6545_v5 = vld [vmem:[#allocation2 + $0x164] sm:$0xf]  ;;  %v4575_v62 = vld [vmem:[#allocation2 + $0xe8] sm:$0xf] }
  0x50   :  { %1573 = vmatpush.bf16.msrb.mxu3 %v4460_v26  ;;  %1535 = vmatmul.bf16.vlgmr.msrb.gmra.mxu0 %v7254_v40  ;;  %v4633_v6 = vld [vmem:[#allocation2 + $0x170] sm:$0xf0]  ;;  %v6577_v7 = vld [vmem:[#allocation2 + $0x264] sm:$0xf]  ;;  %v5036_v8 = vor.u32 %v6645_v0, %v5033_v1  ;;  %v6532_v63 = vld [vmem:[#allocation2 + $0xf4] sm:$0xf0] }
  0x51   :  { %1579 = vmatpush.bf16.msra.mxu0 %v4700_v27  ;;  %1548 = vmatmul.bf16.vlgmr.msrb.gmra.mxu1 %v7256_v41  ;;  %v4761_v9 = vld [vmem:[#allocation2 + $0x270] sm:$0xf0]  ;;  %v6609_v10 = vld [vmem:[#allocation2 + $0x364] sm:$0xf]  ;;  %v4636_v14 = vor.u32 %v6545_v5, %v4633_v6 }
  0x52   :  { %1592 = vmatpush.bf16.msra.mxu1 %v4828_v28  ;;  %1561 = vmatmul.bf16.vlgmr.msrb.gmra.mxu2 %v7252_v37  ;;  %v4889_v11 = vld [vmem:[#allocation2 + $0x370] sm:$0xf0]  ;;  %v6641_v12 = vld [vmem:[#allocation2 + $0x464] sm:$0xf]  ;;  %v4764_v15 = vor.u32 %v6577_v7, %v4761_v9  ;;  %v4576_v7 = vor.u32 %v6532_v63, %v4575_v62 }
  0x53   :  { %1605 = vmatpush.bf16.msra.mxu2 %v4956_v29  ;;  %1574 = vmatmul.bf16.vlgmr.msrb.gmra.mxu3 %v7236_v19  ;;  %v5017_v13 = vld [vmem:[#allocation2 + $0x470] sm:$0xf0]  ;;  %v4892_v16 = vor.u32 %v6609_v10, %v4889_v11  ;;  %v6541_v17 = vld [vmem:[#allocation2 + $0x144] sm:$0xf] }
  0x54   :  { %1618 = vmatpush.bf16.msra.mxu3 %v5084_v33  ;;  %v4617_v21 = vld [vmem:[#allocation2 + $0x150] sm:$0xf0]  ;;  %v6573_v23 = vld [vmem:[#allocation2 + $0x244] sm:$0xf]  ;;  %v5020_v24 = vor.u32 %v6641_v12, %v5017_v13  ;;  %v4559_v13 = vld [vmem:[#allocation2 + $0xc8] sm:$0xf] }
  0x55   :  { %1580 = vmatpush.bf16.msra.mxu0 %v4684_v42  ;;  %v4745_v25 = vld [vmem:[#allocation2 + $0x250] sm:$0xf0]  ;;  %v6605_v26 = vld [vmem:[#allocation2 + $0x344] sm:$0xf]  ;;  %v4620_v30 = vor.u32 %v6541_v17, %v4617_v21 }
  0x56   :  { %1593 = vmatpush.bf16.msra.mxu1 %v4812_v43  ;;  %v4873_v27 = vld [vmem:[#allocation2 + $0x350] sm:$0xf0]  ;;  %v6637_v28 = vld [vmem:[#allocation2 + $0x444] sm:$0xf]  ;;  %v4748_v31 = vor.u32 %v6573_v23, %v4745_v25 }
  0x57   :  { %1606 = vmatpush.bf16.msra.mxu2 %v4940_v44  ;;  %v5001_v29 = vld [vmem:[#allocation2 + $0x450] sm:$0xf0]  ;;  %v4876_v32 = vor.u32 %v6605_v26, %v4873_v27  ;;  %v6537_v33 = vld [vmem:[#allocation2 + $0x124] sm:$0xf] }
  0x58   :  { %1619 = vmatpush.bf16.msra.mxu3 %v5068_v48  ;;  %v4601_v34 = vld [vmem:[#allocation2 + $0x130] sm:$0xf0]  ;;  %v6569_v35 = vld [vmem:[#allocation2 + $0x224] sm:$0xf]  ;;  %v5004_v36 = vor.u32 %v6637_v28, %v5001_v29  ;;  %v4543_v29 = vld [vmem:[#allocation2 + $0xa8] sm:$0xf] }
  0x59   :  { %1581 = vmatpush.bf16.msra.mxu0 %v4668_v54  ;;  %v4729_v38 = vld [vmem:[#allocation2 + $0x230] sm:$0xf0]  ;;  %v6601_v39 = vld [vmem:[#allocation2 + $0x324] sm:$0xf]  ;;  %v4604_v45 = vor.u32 %v6537_v33, %v4601_v34 }
  0x5a   :  { %1594 = vmatpush.bf16.msra.mxu1 %v4796_v55  ;;  %v4857_v42 = vld [vmem:[#allocation2 + $0x330] sm:$0xf0]  ;;  %v6633_v43 = vld [vmem:[#allocation2 + $0x424] sm:$0xf]  ;;  %v4732_v48 = vor.u32 %v6569_v35, %v4729_v38 }
  0x5b   :  { %1607 = vmatpush.bf16.msra.mxu2 %v4924_v56  ;;  %v4985_v44 = vld [vmem:[#allocation2 + $0x430] sm:$0xf0]  ;;  %v6533_v46 = vld [vmem:[#allocation2 + $0x104] sm:$0xf]  ;;  %v4860_v49 = vor.u32 %v6601_v39, %v4857_v42 }
  0x5c   :  { %1620 = vmatpush.bf16.msra.mxu3 %v5052_v60  ;;  %v4585_v47 = vld [vmem:[#allocation2 + $0x110] sm:$0xf0]  ;;  %v6565_v50 = vld [vmem:[#allocation2 + $0x204] sm:$0xf]  ;;  %v4988_v53 = vor.u32 %v6633_v43, %v4985_v44  ;;  %v4527_v44 = vld [vmem:[#allocation2 + $0x88] sm:$0xf] }
  0x5d   :  { %1582 = vmatpush.bf16.msra.mxu0 %v4652_v2  ;;  %v4713_v51 = vld [vmem:[#allocation2 + $0x210] sm:$0xf0]  ;;  %v6597_v52 = vld [vmem:[#allocation2 + $0x304] sm:$0xf]  ;;  %v4588_v60 = vor.u32 %v6533_v46, %v4585_v47  ;;  %v4703_v2 = vld [vmem:[#allocation2 + $0x1e8] sm:$0xf] }
  0x5e   :  { %1595 = vmatpush.bf16.msra.mxu1 %v4780_v3  ;;  %v4841_v54 = vld [vmem:[#allocation2 + $0x310] sm:$0xf0]  ;;  %v6629_v55 = vld [vmem:[#allocation2 + $0x404] sm:$0xf]  ;;  %v4716_v0 = vor.u32 %v6565_v50, %v4713_v51  ;;  %v6564_v3 = vld [vmem:[#allocation2 + $0x1f4] sm:$0xf0] }
  0x5f   :  { %1608 = vmatpush.bf16.msra.mxu2 %v4908_v4  ;;  %v4969_v56 = vld [vmem:[#allocation2 + $0x410] sm:$0xf0]  ;;  %v6689_v57 = vld [vmem:[#allocation2 + $0x5e4] sm:$0xf]  ;;  %v4844_v1 = vor.u32 %v6597_v52, %v4841_v54  ;;  %v4704_v11 = vor.u32 %v6564_v3, %v4703_v2  ;;  %v4655_v46 = vld [vmem:[#allocation2 + $0x188] sm:$0xf] }
  0x60   :  { %1621 = vmatpush.bf16.msra.mxu3 %v5036_v8  ;;  %v5209_v58 = vld [vmem:[#allocation2 + $0x5f0] sm:$0xf0]  ;;  %v6721_v59 = vld [vmem:[#allocation2 + $0x6e4] sm:$0xf]  ;;  %v4972_v4 = vor.u32 %v6629_v55, %v4969_v56  ;;  %v6552_v47 = vld [vmem:[#allocation2 + $0x194] sm:$0xf0] }
  0x61   :  { %1583 = vmatpush.bf16.msra.mxu0 %v4636_v14  ;;  %v5337_v61 = vld [vmem:[#allocation2 + $0x6f0] sm:$0xf0]  ;;  %v5212_v5 = vor.u32 %v6689_v57, %v5209_v58  ;;  %v6685_v8 = vld [vmem:[#allocation2 + $0x5c4] sm:$0xf]  ;;  %v6528_v14 = vld [vmem:[#allocation2 + $0xd4] sm:$0xf0]  ;;  %v4656_v54 = vor.u32 %v6552_v47, %v4655_v46 }
  0x62   :  { %1596 = vmatpush.bf16.msra.mxu1 %v4764_v15  ;;  %v5340_v6 = vor.u32 %v6721_v59, %v5337_v61  ;;  %v5193_v9 = vld [vmem:[#allocation2 + $0x5d0] sm:$0xf0]  ;;  %v6717_v10 = vld [vmem:[#allocation2 + $0x6c4] sm:$0xf]  ;;  %v4687_v15 = vld [vmem:[#allocation2 + $0x1c8] sm:$0xf]  ;;  %v4560_v23 = vor.u32 %v6528_v14, %v4559_v13 }
  0x63   :  { %1609 = vmatpush.bf16.msra.mxu2 %v4892_v16  ;;  %v5321_v12 = vld [vmem:[#allocation2 + $0x6d0] sm:$0xf0]  ;;  %v6560_v16 = vld [vmem:[#allocation2 + $0x1d4] sm:$0xf0]  ;;  %v5196_v17 = vor.u32 %v6685_v8, %v5193_v9  ;;  %v6713_v26 = vld [vmem:[#allocation2 + $0x6a4] sm:$0xf] }
  0x64   :  { %1622 = vmatpush.bf16.msra.mxu3 %v5020_v24  ;;  %v5324_v21 = vor.u32 %v6717_v10, %v5321_v12  ;;  %v6681_v24 = vld [vmem:[#allocation2 + $0x5a4] sm:$0xf]  ;;  %v5177_v25 = vld [vmem:[#allocation2 + $0x5b0] sm:$0xf0]  ;;  %v4688_v27 = vor.u32 %v6560_v16, %v4687_v15  ;;  %v4511_v56 = vld [vmem:[#allocation2 + $0x68] sm:$0xf] }
  0x65   :  { %1584 = vmatpush.bf16.msra.mxu0 %v4620_v30  ;;  %v5305_v28 = vld [vmem:[#allocation2 + $0x6b0] sm:$0xf0]  ;;  %v6524_v30 = vld [vmem:[#allocation2 + $0xb4] sm:$0xf0]  ;;  %v5180_v33 = vor.u32 %v6681_v24, %v5177_v25  ;;  %v6709_v39 = vld [vmem:[#allocation2 + $0x684] sm:$0xf] }
  0x66   :  { %1597 = vmatpush.bf16.msra.mxu1 %v4748_v31  ;;  %v4671_v31 = vld [vmem:[#allocation2 + $0x1a8] sm:$0xf]  ;;  %v5308_v34 = vor.u32 %v6713_v26, %v5305_v28  ;;  %v4544_v35 = vor.u32 %v6524_v30, %v4543_v29  ;;  %v5161_v38 = vld [vmem:[#allocation2 + $0x590] sm:$0xf0]  ;;  %v6673_v51 = vld [vmem:[#allocation2 + $0x564] sm:$0xf] }
  0x67   :  { %1610 = vmatpush.bf16.msra.mxu2 %v4876_v32  ;;  %v6556_v32 = vld [vmem:[#allocation2 + $0x1b4] sm:$0xf0]  ;;  %v5289_v43 = vld [vmem:[#allocation2 + $0x690] sm:$0xf0]  ;;  %v4639_v58 = vld [vmem:[#allocation2 + $0x168] sm:$0xf] }
  0x68   :  { %1623 = vmatpush.bf16.msra.mxu3 %v5004_v36  ;;  %v6677_v36 = vld [vmem:[#allocation2 + $0x584] sm:$0xf]  ;;  %v4672_v42 = vor.u32 %v6556_v32, %v4671_v31  ;;  %v5145_v52 = vld [vmem:[#allocation2 + $0x570] sm:$0xf0]  ;;  %v6516_v57 = vld [vmem:[#allocation2 + $0x74] sm:$0xf0] }
  0x69   :  { %1585 = vmatpush.bf16.msra.mxu0 %v4604_v45  ;;  %v6520_v45 = vld [vmem:[#allocation2 + $0x94] sm:$0xf0]  ;;  %v5273_v55 = vld [vmem:[#allocation2 + $0x670] sm:$0xf0]  ;;  %v4512_v62 = vor.u32 %v6516_v57, %v4511_v56  ;;  %v6669_v63 = vld [vmem:[#allocation2 + $0x544] sm:$0xf] }
  0x6a   :  { %1598 = vmatpush.bf16.msra.mxu1 %v4732_v48  ;;  %v5164_v48 = vor.u32 %v6677_v36, %v5161_v38  ;;  %v4528_v50 = vor.u32 %v6520_v45, %v4527_v44  ;;  %v6548_v59 = vld [vmem:[#allocation2 + $0x174] sm:$0xf0]  ;;  %v5257_v3 = vld [vmem:[#allocation2 + $0x650] sm:$0xf0]  ;;  %v6697_v13 = vld [vmem:[#allocation2 + $0x624] sm:$0xf] }
  0x6b   :  { %1611 = vmatpush.bf16.msra.mxu2 %v4860_v49  ;;  %v5292_v49 = vor.u32 %v6709_v39, %v5289_v43  ;;  %v4640_v2 = vor.u32 %v6548_v59, %v4639_v58  ;;  %v5113_v12 = vld [vmem:[#allocation2 + $0x530] sm:$0xf0]  ;;  %v4479_v16 = vld [vmem:[#allocation2 + $0x28] sm:$0xf]  ;;  %v6661_v25 = vld [vmem:[#allocation2 + $0x504] sm:$0xf] }
  0x6c   :  { %1624 = vmatpush.bf16.msra.mxu3 %v4988_v53  ;;  %v6705_v53 = vld [vmem:[#allocation2 + $0x664] sm:$0xf]  ;;  %v5241_v15 = vld [vmem:[#allocation2 + $0x630] sm:$0xf0]  ;;  %v4463_v31 = vld [vmem:[#allocation2 + $0x8] sm:$0xf] }
  0x6d   :  { %1586 = vmatpush.bf16.msra.mxu0 %v4588_v60  ;;  %v5148_v60 = vor.u32 %v6673_v51, %v5145_v52  ;;  %v5276_v61 = vor.u32 %v6705_v53, %v5273_v55  ;;  %v5097_v26 = vld [vmem:[#allocation2 + $0x510] sm:$0xf0]  ;;  %v6693_v29 = vld [vmem:[#allocation2 + $0x604] sm:$0xf]  ;;  %v4831_v36 = vld [vmem:[#allocation2 + $0x2e8] sm:$0xf] }
  0x6e   :  { %1599 = vmatpush.bf16.msra.mxu1 %v4716_v0  ;;  %v5129_v0 = vld [vmem:[#allocation2 + $0x550] sm:$0xf0]  ;;  %v6596_v38 = vld [vmem:[#allocation2 + $0x2f4] sm:$0xf0]  ;;  %v4959_v39 = vld [vmem:[#allocation2 + $0x3e8] sm:$0xf] }
  0x6f   :  { %1612 = vmatpush.bf16.msra.mxu2 %v4844_v1  ;;  %v6701_v1 = vld [vmem:[#allocation2 + $0x644] sm:$0xf]  ;;  %v5132_v8 = vor.u32 %v6669_v63, %v5129_v0  ;;  %v5225_v30 = vld [vmem:[#allocation2 + $0x610] sm:$0xf0]  ;;  %v6628_v43 = vld [vmem:[#allocation2 + $0x3f4] sm:$0xf0]  ;;  %v4832_v51 = vor.u32 %v6596_v38, %v4831_v36 }
  0x70   :  { %1625 = vmatpush.bf16.msra.mxu3 %v4972_v4  ;;  %1587 = vmatmul.bf16.vlgmr.msra.gmra.mxu0 %v7240_v22  ;;  %v4495_v4 = vld [vmem:[#allocation2 + $0x48] sm:$0xf]  ;;  %v5260_v9 = vor.u32 %v6701_v1, %v5257_v3  ;;  %v6660_v45 = vld [vmem:[#allocation2 + $0x4f4] sm:$0xf0]  ;;  %v5228_v46 = vor.u32 %v6693_v29, %v5225_v30  ;;  %v4960_v52 = vor.u32 %v6628_v43, %v4959_v39 }
  0x71   :  { %1631 = vmatpush.bf16.msrb.mxu0 %v5212_v5  ;;  %1600 = vmatmul.bf16.vlgmr.msra.gmra.mxu1 %v7234_v18  ;;  %v6512_v5 = vld [vmem:[#allocation2 + $0x54] sm:$0xf0]  ;;  %v5087_v44 = vld [vmem:[#allocation2 + $0x4e8] sm:$0xf] }
  0x72   :  { %1644 = vmatpush.bf16.msrb.mxu1 %v5340_v6  ;;  %1613 = vmatmul.bf16.vlgmr.msra.gmra.mxu2 %v7238_v20  ;;  %v4623_v6 = vld [vmem:[#allocation2 + $0x148] sm:$0xf]  ;;  %v4496_v10 = vor.u32 %v6512_v5, %v4495_v4  ;;  %v5088_v53 = vor.u32 %v6660_v45, %v5087_v44  ;;  %v6592_v55 = vld [vmem:[#allocation2 + $0x2d4] sm:$0xf0] }
  0x73   :  { %1657 = vmatpush.bf16.msrb.mxu2 %v4576_v7  ;;  %1626 = vmatmul.bf16.vlgmr.msra.gmra.mxu3 %v7254_v40  ;;  %v6544_v7 = vld [vmem:[#allocation2 + $0x154] sm:$0xf0]  ;;  %v4943_v56 = vld [vmem:[#allocation2 + $0x3c8] sm:$0xf] }
  0x74   :  { %1670 = vmatpush.bf16.msrb.mxu3 %v4704_v11  ;;  %v6665_v11 = vld [vmem:[#allocation2 + $0x524] sm:$0xf]  ;;  %v4624_v14 = vor.u32 %v6544_v7, %v4623_v6  ;;  %v6624_v58 = vld [vmem:[#allocation2 + $0x3d4] sm:$0xf0]  ;;  %v5071_v59 = vld [vmem:[#allocation2 + $0x4c8] sm:$0xf] }
  0x75   :  { %1632 = vmatpush.bf16.msrb.mxu0 %v5196_v17  ;;  %v6508_v17 = vld [vmem:[#allocation2 + $0x34] sm:$0xf0]  ;;  %v5116_v24 = vor.u32 %v6665_v11, %v5113_v12  ;;  %v4944_v0 = vor.u32 %v6624_v58, %v4943_v56  ;;  %v4927_v4 = vld [vmem:[#allocation2 + $0x3a8] sm:$0xf] }
  0x76   :  { %1645 = vmatpush.bf16.msrb.mxu1 %v5324_v21  ;;  %v4607_v21 = vld [vmem:[#allocation2 + $0x128] sm:$0xf]  ;;  %v4480_v28 = vor.u32 %v6508_v17, %v4479_v16  ;;  %v6588_v3 = vld [vmem:[#allocation2 + $0x2b4] sm:$0xf0] }
  0x77   :  { %1658 = vmatpush.bf16.msrb.mxu2 %v4560_v23  ;;  %v6540_v23 = vld [vmem:[#allocation2 + $0x134] sm:$0xf0]  ;;  %v5055_v7 = vld [vmem:[#allocation2 + $0x4a8] sm:$0xf] }
  0x78   :  { %1671 = vmatpush.bf16.msrb.mxu3 %v4688_v27  ;;  %v5244_v27 = vor.u32 %v6697_v13, %v5241_v15  ;;  %v4608_v32 = vor.u32 %v6540_v23, %v4607_v21  ;;  %v6620_v6 = vld [vmem:[#allocation2 + $0x3b4] sm:$0xf0]  ;;  %v4911_v16 = vld [vmem:[#allocation2 + $0x388] sm:$0xf] }
  0x79   :  { %1633 = vmatpush.bf16.msrb.mxu0 %v5180_v33  ;;  %v6504_v33 = vld [vmem:[#allocation2 + $0x14] sm:$0xf0]  ;;  %v4928_v12 = vor.u32 %v6620_v6, %v4927_v4  ;;  %v5039_v23 = vld [vmem:[#allocation2 + $0x488] sm:$0xf] }
  0x7a   :  { %1646 = vmatpush.bf16.msrb.mxu1 %v5308_v34  ;;  %v4591_v34 = vld [vmem:[#allocation2 + $0x108] sm:$0xf]  ;;  %v4464_v47 = vor.u32 %v6504_v33, %v4463_v31  ;;  %v6584_v15 = vld [vmem:[#allocation2 + $0x294] sm:$0xf0] }
  0x7b   :  { %1659 = vmatpush.bf16.msrb.mxu2 %v4544_v35  ;;  %v6536_v35 = vld [vmem:[#allocation2 + $0x114] sm:$0xf0]  ;;  %v4767_v30 = vld [vmem:[#allocation2 + $0x268] sm:$0xf] }
  0x7c   :  { %1672 = vmatpush.bf16.msrb.mxu3 %v4672_v42  ;;  %v5100_v42 = vor.u32 %v6661_v25, %v5097_v26  ;;  %v6616_v21 = vld [vmem:[#allocation2 + $0x394] sm:$0xf0]  ;;  %v5167_v25 = vld [vmem:[#allocation2 + $0x588] sm:$0xf] }
  0x7d   :  { %1634 = vmatpush.bf16.msrb.mxu0 %v5164_v48  ;;  %v5215_v48 = vld [vmem:[#allocation2 + $0x5e8] sm:$0xf]  ;;  %v6680_v26 = vld [vmem:[#allocation2 + $0x594] sm:$0xf0] }
  0x7e   :  { %1647 = vmatpush.bf16.msrb.mxu1 %v5292_v49  ;;  %v6692_v49 = vld [vmem:[#allocation2 + $0x5f4] sm:$0xf0]  ;;  %v5168_v33 = vor.u32 %v6680_v26, %v5167_v25  ;;  %v5151_v38 = vld [vmem:[#allocation2 + $0x568] sm:$0xf] }
  0x7f   :  { %1660 = vmatpush.bf16.msrb.mxu2 %v4528_v50  ;;  %v4592_v50 = vor.u32 %v6536_v35, %v4591_v34  ;;  %v5216_v57 = vor.u32 %v6692_v49, %v5215_v48  ;;  %v6580_v31 = vld [vmem:[#allocation2 + $0x274] sm:$0xf0]  ;;  %v5023_v35 = vld [vmem:[#allocation2 + $0x468] sm:$0xf] }
  0x80   :  { %1673 = vmatpush.bf16.msrb.mxu3 %v4656_v54  ;;  %v4815_v54 = vld [vmem:[#allocation2 + $0x2c8] sm:$0xf]  ;;  %v6612_v34 = vld [vmem:[#allocation2 + $0x374] sm:$0xf0] }
  0x81   :  { %1635 = vmatpush.bf16.msrb.mxu0 %v5148_v60  ;;  %v6656_v60 = vld [vmem:[#allocation2 + $0x4d4] sm:$0xf0]  ;;  %v4816_v63 = vor.u32 %v6592_v55, %v4815_v54  ;;  %v4751_v45 = vld [vmem:[#allocation2 + $0x248] sm:$0xf] }
  0x82   :  { %1648 = vmatpush.bf16.msrb.mxu1 %v5276_v61  ;;  %v5199_v61 = vld [vmem:[#allocation2 + $0x5c8] sm:$0xf]  ;;  %v5072_v1 = vor.u32 %v6656_v60, %v5071_v59  ;;  %v6644_v36 = vld [vmem:[#allocation2 + $0x474] sm:$0xf0] }
  0x83   :  { %1661 = vmatpush.bf16.msrb.mxu2 %v4512_v62  ;;  %v6688_v62 = vld [vmem:[#allocation2 + $0x5d4] sm:$0xf0]  ;;  %v5024_v44 = vor.u32 %v6644_v36, %v5023_v35  ;;  %v4863_v59 = vld [vmem:[#allocation2 + $0x328] sm:$0xf]  ;;  %v6526_v35 = vld [vmem:[#allocation2 + $0xcc] sm:$0xf] }
  0x84   :  { %1674 = vmatpush.bf16.msrb.mxu3 %v4640_v2  ;;  %v4799_v2 = vld [vmem:[#allocation2 + $0x2a8] sm:$0xf]  ;;  %v5200_v5 = vor.u32 %v6688_v62, %v5199_v61  ;;  %v6676_v39 = vld [vmem:[#allocation2 + $0x574] sm:$0xf0] }
  0x85   :  { %1636 = vmatpush.bf16.msrb.mxu0 %v5132_v8  ;;  %v6652_v8 = vld [vmem:[#allocation2 + $0x4b4] sm:$0xf0]  ;;  %v4800_v11 = vor.u32 %v6588_v3, %v4799_v2  ;;  %v5152_v48 = vor.u32 %v6676_v39, %v5151_v38  ;;  %v4991_v62 = vld [vmem:[#allocation2 + $0x428] sm:$0xf]  ;;  %v4561_v38 = vld [vmem:[#allocation2 + $0xd8] sm:$0xf0] }
  0x86   :  { %1649 = vmatpush.bf16.msrb.mxu1 %v5260_v9  ;;  %v5183_v9 = vld [vmem:[#allocation2 + $0x5a8] sm:$0xf]  ;;  %v5056_v13 = vor.u32 %v6652_v8, %v5055_v7  ;;  %v6608_v49 = vld [vmem:[#allocation2 + $0x354] sm:$0xf0]  ;;  %v6558_v39 = vld [vmem:[#allocation2 + $0x1cc] sm:$0xf] }
  0x87   :  { %1662 = vmatpush.bf16.msrb.mxu2 %v4496_v10  ;;  %v6684_v10 = vld [vmem:[#allocation2 + $0x5b4] sm:$0xf0]  ;;  %v4719_v3 = vld [vmem:[#allocation2 + $0x208] sm:$0xf] }
  0x88   :  { %1675 = vmatpush.bf16.msrb.mxu3 %v4624_v14  ;;  %v4783_v14 = vld [vmem:[#allocation2 + $0x288] sm:$0xf]  ;;  %v5184_v17 = vor.u32 %v6684_v10, %v5183_v9  ;;  %v6572_v58 = vld [vmem:[#allocation2 + $0x234] sm:$0xf0] }
  0x89   :  { %1637 = vmatpush.bf16.msrb.mxu0 %v5116_v24  ;;  %v6648_v24 = vld [vmem:[#allocation2 + $0x494] sm:$0xf0]  ;;  %v4847_v7 = vld [vmem:[#allocation2 + $0x308] sm:$0xf] }
  0x8a   :  { %1650 = vmatpush.bf16.msrb.mxu1 %v5244_v27  ;;  %v4784_v27 = vor.u32 %v6584_v15, %v4783_v14  ;;  %v5040_v29 = vor.u32 %v6648_v24, %v5039_v23  ;;  %v6604_v61 = vld [vmem:[#allocation2 + $0x334] sm:$0xf0]  ;;  %v4975_v9 = vld [vmem:[#allocation2 + $0x408] sm:$0xf]  ;;  %v6562_v23 = vld [vmem:[#allocation2 + $0x1ec] sm:$0xf] }
  0x8b   :  { %1663 = vmatpush.bf16.msrb.mxu2 %v4480_v28  ;;  %v4912_v28 = vor.u32 %v6616_v21, %v4911_v16  ;;  %v6568_v4 = vld [vmem:[#allocation2 + $0x214] sm:$0xf0]  ;;  %v5343_v14 = vld [vmem:[#allocation2 + $0x6e8] sm:$0xf]  ;;  %v6530_v16 = vld [vmem:[#allocation2 + $0xec] sm:$0xf] }
  0x8c   :  { %1676 = vmatpush.bf16.msrb.mxu3 %v4608_v32  ;;  %v4895_v32 = vld [vmem:[#allocation2 + $0x368] sm:$0xf]  ;;  %v6600_v8 = vld [vmem:[#allocation2 + $0x314] sm:$0xf0]  ;;  %v4577_v21 = vld [vmem:[#allocation2 + $0xf8] sm:$0xf0] }
  0x8d   :  { %1638 = vmatpush.bf16.msrb.mxu0 %v5100_v42  ;;  %v4768_v42 = vor.u32 %v6580_v31, %v4767_v30  ;;  %v4896_v43 = vor.u32 %v6612_v34, %v4895_v32  ;;  %v6724_v15 = vld [vmem:[#allocation2 + $0x6f4] sm:$0xf0]  ;;  %v4705_v24 = vld [vmem:[#allocation2 + $0x1f8] sm:$0xf0]  ;;  %v4848_v25 = vor.u32 %v6600_v8, %v4847_v7  ;;  %v4580_v31 = vor.u32 %v6530_v16, %v4577_v21  ;;  %v5279_v8 = vld [vmem:[#allocation2 + $0x668] sm:$0xf] }
  0x8e   :  { %1651 = vmatpush.bf16.msrb.mxu1 %v5228_v46  ;;  %v6576_v46 = vld [vmem:[#allocation2 + $0x254] sm:$0xf0]  ;;  %v5344_v30 = vor.u32 %v6724_v15, %v5343_v14  ;;  %v4708_v32 = vor.u32 %v6562_v23, %v4705_v24  ;;  %v4641_v14 = vld [vmem:[#allocation2 + $0x178] sm:$0xf0]  ;;  %v6578_v15 = vld [vmem:[#allocation2 + $0x26c] sm:$0xf] }
  0x8f   :  { %1664 = vmatpush.bf16.msrb.mxu2 %v4464_v47  ;;  %v4879_v47 = vld [vmem:[#allocation2 + $0x348] sm:$0xf]  ;;  %v4752_v54 = vor.u32 %v6576_v46, %v4751_v45  ;;  %v6720_v34 = vld [vmem:[#allocation2 + $0x6d4] sm:$0xf0]  ;;  %v4564_v46 = vor.u32 %v6526_v35, %v4561_v38  ;;  %v4769_v16 = vld [vmem:[#allocation2 + $0x278] sm:$0xf0] }
  0x90   :  { %1677 = vmatpush.bf16.msrb.mxu3 %v4592_v50  ;;  %1639 = vmatmul.bf16.vlgmr.msrb.gmra.mxu0 %v7256_v41  ;;  %v5007_v50 = vld [vmem:[#allocation2 + $0x448] sm:$0xf]  ;;  %v4880_v55 = vor.u32 %v6608_v49, %v4879_v47  ;;  %v6716_v49 = vld [vmem:[#allocation2 + $0x6b4] sm:$0xf0] }
  0x91   :  { %1683 = vmatpush.bf16.msra.mxu0 %v4832_v51  ;;  %1652 = vmatmul.bf16.vlgmr.msrb.gmra.mxu1 %v7252_v37  ;;  %v6640_v51 = vld [vmem:[#allocation2 + $0x454] sm:$0xf0]  ;;  %v5263_v24 = vld [vmem:[#allocation2 + $0x648] sm:$0xf] }
  0x92   :  { %1696 = vmatpush.bf16.msra.mxu1 %v4960_v52  ;;  %1665 = vmatmul.bf16.vlgmr.msrb.gmra.mxu2 %v7236_v19  ;;  %v5135_v52 = vld [vmem:[#allocation2 + $0x548] sm:$0xf]  ;;  %v5008_v56 = vor.u32 %v6640_v51, %v5007_v50  ;;  %v6522_v50 = vld [vmem:[#allocation2 + $0xac] sm:$0xf] }
  0x93   :  { %1709 = vmatpush.bf16.msra.mxu2 %v5088_v53  ;;  %1678 = vmatmul.bf16.vlgmr.msrb.gmra.mxu3 %v7240_v22  ;;  %v6672_v53 = vld [vmem:[#allocation2 + $0x554] sm:$0xf0]  ;;  %v5247_v38 = vld [vmem:[#allocation2 + $0x628] sm:$0xf] }
  0x94   :  { %1722 = vmatpush.bf16.msra.mxu3 %v5216_v57  ;;  %v4735_v57 = vld [vmem:[#allocation2 + $0x228] sm:$0xf]  ;;  %v5136_v60 = vor.u32 %v6672_v53, %v5135_v52  ;;  %v4545_v52 = vld [vmem:[#allocation2 + $0xb8] sm:$0xf0]  ;;  %v6554_v53 = vld [vmem:[#allocation2 + $0x1ac] sm:$0xf] }
  0x95   :  { %1684 = vmatpush.bf16.msra.mxu0 %v4816_v63  ;;  %v6636_v63 = vld [vmem:[#allocation2 + $0x434] sm:$0xf0]  ;;  %v4736_v2 = vor.u32 %v6572_v58, %v4735_v57  ;;  %v4548_v58 = vor.u32 %v6522_v50, %v4545_v52 }
  0x96   :  { %1697 = vmatpush.bf16.msra.mxu1 %v4944_v0  ;;  %v5119_v0 = vld [vmem:[#allocation2 + $0x528] sm:$0xf]  ;;  %v4992_v6 = vor.u32 %v6636_v63, %v4991_v62  ;;  %v6518_v62 = vld [vmem:[#allocation2 + $0x8c] sm:$0xf]  ;;  %v6696_v52 = vld [vmem:[#allocation2 + $0x614] sm:$0xf0] }
  0x97   :  { %1710 = vmatpush.bf16.msra.mxu2 %v5072_v1  ;;  %v6668_v1 = vld [vmem:[#allocation2 + $0x534] sm:$0xf0] }
  0x98   :  { %1723 = vmatpush.bf16.msra.mxu3 %v5200_v5  ;;  %v4864_v5 = vor.u32 %v6604_v61, %v4863_v59  ;;  %v5120_v10 = vor.u32 %v6668_v1, %v5119_v0  ;;  %v6712_v61 = vld [vmem:[#allocation2 + $0x694] sm:$0xf0]  ;;  %v4529_v0 = vld [vmem:[#allocation2 + $0x98] sm:$0xf0]  ;;  %v6550_v1 = vld [vmem:[#allocation2 + $0x18c] sm:$0xf] }
  0x99   :  { %1685 = vmatpush.bf16.msra.mxu0 %v4800_v11  ;;  %v6632_v11 = vld [vmem:[#allocation2 + $0x414] sm:$0xf0] }
  0x9a   :  { %1698 = vmatpush.bf16.msra.mxu1 %v4928_v12  ;;  %v5103_v12 = vld [vmem:[#allocation2 + $0x508] sm:$0xf]  ;;  %v4976_v26 = vor.u32 %v6632_v11, %v4975_v9  ;;  %v6708_v9 = vld [vmem:[#allocation2 + $0x674] sm:$0xf0] }
  0x9b   :  { %1711 = vmatpush.bf16.msra.mxu2 %v5056_v13  ;;  %v6664_v13 = vld [vmem:[#allocation2 + $0x514] sm:$0xf0] }
  0x9c   :  { %1724 = vmatpush.bf16.msra.mxu3 %v5184_v17  ;;  %v4720_v17 = vor.u32 %v6568_v4, %v4719_v3  ;;  %v6582_v3 = vld [vmem:[#allocation2 + $0x28c] sm:$0xf]  ;;  %v4785_v4 = vld [vmem:[#allocation2 + $0x298] sm:$0xf0] }
  0x9d   :  { %1686 = vmatpush.bf16.msra.mxu0 %v4784_v27  ;;  %v6594_v27 = vld [vmem:[#allocation2 + $0x2ec] sm:$0xf]  ;;  %v4788_v11 = vor.u32 %v6582_v3, %v4785_v4  ;;  %v5089_v4 = vld [vmem:[#allocation2 + $0x4f8] sm:$0xf0] }
  0x9e   :  { %1699 = vmatpush.bf16.msra.mxu1 %v4912_v28  ;;  %v4833_v28 = vld [vmem:[#allocation2 + $0x2f8] sm:$0xf0] }
  0x9f   :  { %1712 = vmatpush.bf16.msra.mxu2 %v5040_v29  ;;  %v5104_v29 = vor.u32 %v6664_v13, %v5103_v12  ;;  %v4836_v36 = vor.u32 %v6594_v27, %v4833_v28  ;;  %v4513_v12 = vld [vmem:[#allocation2 + $0x78] sm:$0xf0]  ;;  %v6546_v13 = vld [vmem:[#allocation2 + $0x16c] sm:$0xf]  ;;  %v4772_v27 = vor.u32 %v6578_v15, %v4769_v16 }
  0xa0   :  { %1725 = vmatpush.bf16.msra.mxu3 %v5168_v33  ;;  %v5327_v33 = vld [vmem:[#allocation2 + $0x6c8] sm:$0xf]  ;;  %v4644_v23 = vor.u32 %v6546_v13, %v4641_v14  ;;  %v4497_v28 = vld [vmem:[#allocation2 + $0x58] sm:$0xf0] }
  0xa1   :  { %1687 = vmatpush.bf16.msra.mxu0 %v4768_v42  ;;  %v4689_v42 = vld [vmem:[#allocation2 + $0x1d8] sm:$0xf0]  ;;  %v5328_v45 = vor.u32 %v6720_v34, %v5327_v33 }
  0xa2   :  { %1700 = vmatpush.bf16.msra.mxu1 %v4896_v43  ;;  %v6590_v43 = vld [vmem:[#allocation2 + $0x2cc] sm:$0xf]  ;;  %v4692_v47 = vor.u32 %v6558_v39, %v4689_v42  ;;  %v6700_v39 = vld [vmem:[#allocation2 + $0x634] sm:$0xf0] }
  0xa3   :  { %1713 = vmatpush.bf16.msra.mxu2 %v5024_v44  ;;  %v4817_v44 = vld [vmem:[#allocation2 + $0x2d8] sm:$0xf0]  ;;  %v6506_v42 = vld [vmem:[#allocation2 + $0x2c] sm:$0xf]  ;;  %v5248_v50 = vor.u32 %v6700_v39, %v5247_v38 }
  0xa4   :  { %1726 = vmatpush.bf16.msra.mxu3 %v5152_v48  ;;  %v5311_v48 = vld [vmem:[#allocation2 + $0x6a8] sm:$0xf]  ;;  %v4820_v51 = vor.u32 %v6590_v43, %v4817_v44  ;;  %v4929_v38 = vld [vmem:[#allocation2 + $0x3b8] sm:$0xf0]  ;;  %v6650_v39 = vld [vmem:[#allocation2 + $0x4ac] sm:$0xf] }
  0xa5   :  { %1688 = vmatpush.bf16.msra.mxu0 %v4752_v54  ;;  %v4673_v54 = vld [vmem:[#allocation2 + $0x1b8] sm:$0xf0]  ;;  %v5312_v57 = vor.u32 %v6716_v49, %v5311_v48  ;;  %v6570_v48 = vld [vmem:[#allocation2 + $0x22c] sm:$0xf] }
  0xa6   :  { %1701 = vmatpush.bf16.msra.mxu1 %v4880_v55  ;;  %v6586_v55 = vld [vmem:[#allocation2 + $0x2ac] sm:$0xf]  ;;  %v4676_v59 = vor.u32 %v6554_v53, %v4673_v54  ;;  %v4737_v49 = vld [vmem:[#allocation2 + $0x238] sm:$0xf0] }
  0xa7   :  { %1714 = vmatpush.bf16.msra.mxu2 %v5008_v56  ;;  %v4801_v56 = vld [vmem:[#allocation2 + $0x2b8] sm:$0xf0] }
  0xa8   :  { %1727 = vmatpush.bf16.msra.mxu3 %v5136_v60  ;;  %v5295_v60 = vld [vmem:[#allocation2 + $0x688] sm:$0xf]  ;;  %v4804_v63 = vor.u32 %v6586_v55, %v4801_v56  ;;  %v6502_v55 = vld [vmem:[#allocation2 + $0xc] sm:$0xf]  ;;  %v4465_v56 = vld [vmem:[#allocation2 + $0x18] sm:$0xf0] }
  0xa9   :  { %1689 = vmatpush.bf16.msra.mxu0 %v4736_v2  ;;  %v4657_v2 = vld [vmem:[#allocation2 + $0x198] sm:$0xf0] }
  0xaa   :  { %1702 = vmatpush.bf16.msra.mxu1 %v4864_v5  ;;  %v5296_v5 = vor.u32 %v6712_v61, %v5295_v60  ;;  %v4660_v7 = vor.u32 %v6550_v1, %v4657_v2  ;;  %v4593_v60 = vld [vmem:[#allocation2 + $0x118] sm:$0xf0]  ;;  %v6566_v61 = vld [vmem:[#allocation2 + $0x20c] sm:$0xf] }
  0xab   :  { %1715 = vmatpush.bf16.msra.mxu2 %v4992_v6  ;;  %v4532_v6 = vor.u32 %v6518_v62, %v4529_v0  ;;  %v4721_v62 = vld [vmem:[#allocation2 + $0x218] sm:$0xf0]  ;;  %v6626_v0 = vld [vmem:[#allocation2 + $0x3ec] sm:$0xf] }
  0xac   :  { %1728 = vmatpush.bf16.msra.mxu3 %v5120_v10  ;;  %v6514_v10 = vld [vmem:[#allocation2 + $0x6c] sm:$0xf]  ;;  %v4961_v1 = vld [vmem:[#allocation2 + $0x3f8] sm:$0xf0]  ;;  %v4724_v13 = vor.u32 %v6566_v61, %v4721_v62 }
  0xad   :  { %1690 = vmatpush.bf16.msra.mxu0 %v4720_v17  ;;  %v5280_v17 = vor.u32 %v6708_v9, %v5279_v8  ;;  %v4516_v21 = vor.u32 %v6514_v10, %v4513_v12  ;;  %v6658_v2 = vld [vmem:[#allocation2 + $0x4ec] sm:$0xf]  ;;  %v4468_v8 = vor.u32 %v6502_v55, %v4465_v56  ;;  %v4964_v14 = vor.u32 %v6626_v0, %v4961_v1  ;;  %v5041_v56 = vld [vmem:[#allocation2 + $0x498] sm:$0xf0] }
  0xae   :  { %1703 = vmatpush.bf16.msra.mxu1 %v4848_v25  ;;  %v6704_v25 = vld [vmem:[#allocation2 + $0x654] sm:$0xf0]  ;;  %v6722_v10 = vld [vmem:[#allocation2 + $0x6ec] sm:$0xf]  ;;  %v5092_v15 = vor.u32 %v6658_v2, %v5089_v4  ;;  %v4897_v2 = vld [vmem:[#allocation2 + $0x378] sm:$0xf0] }
  0xaf   :  { %1716 = vmatpush.bf16.msra.mxu2 %v4976_v26  ;;  %v6510_v26 = vld [vmem:[#allocation2 + $0x4c] sm:$0xf]  ;;  %v5264_v33 = vor.u32 %v6704_v25, %v5263_v24  ;;  %v5073_v25 = vld [vmem:[#allocation2 + $0x4d8] sm:$0xf0] }
  0xb0   :  { %1729 = vmatpush.bf16.msra.mxu3 %v5104_v29  ;;  %1691 = vmatmul.bf16.vlgmr.msra.gmra.mxu0 %v7234_v18  ;;  %v6542_v29 = vld [vmem:[#allocation2 + $0x14c] sm:$0xf]  ;;  %v4500_v35 = vor.u32 %v6510_v26, %v4497_v28 }
  0xb1   :  { %1735 = vmatpush.bf16.msrb.mxu0 %v5344_v30  ;;  %1704 = vmatmul.bf16.vlgmr.msra.gmra.mxu1 %v7238_v20  ;;  %v4625_v30 = vld [vmem:[#allocation2 + $0x158] sm:$0xf0]  ;;  %v6686_v26 = vld [vmem:[#allocation2 + $0x5cc] sm:$0xf] }
  0xb2   :  { %1748 = vmatpush.bf16.msrb.mxu1 %v4580_v31  ;;  %1717 = vmatmul.bf16.vlgmr.msra.gmra.mxu2 %v7254_v40  ;;  %v6574_v31 = vld [vmem:[#allocation2 + $0x24c] sm:$0xf] }
  0xb3   :  { %1761 = vmatpush.bf16.msrb.mxu2 %v4708_v32  ;;  %1730 = vmatmul.bf16.vlgmr.msra.gmra.mxu3 %v7256_v41  ;;  %v4753_v32 = vld [vmem:[#allocation2 + $0x258] sm:$0xf0]  ;;  %v6718_v28 = vld [vmem:[#allocation2 + $0x6cc] sm:$0xf] }
  0xb4   :  { %1774 = vmatpush.bf16.msrb.mxu3 %v4836_v36  ;;  %v4628_v36 = vor.u32 %v6542_v29, %v4625_v30  ;;  %v4756_v44 = vor.u32 %v6574_v31, %v4753_v32  ;;  %v5329_v29 = vld [vmem:[#allocation2 + $0x6d8] sm:$0xf0]  ;;  %v6610_v1 = vld [vmem:[#allocation2 + $0x36c] sm:$0xf] }
  0xb5   :  { %1736 = vmatpush.bf16.msrb.mxu0 %v5328_v45  ;;  %v4481_v45 = vld [vmem:[#allocation2 + $0x38] sm:$0xf0] }
  0xb6   :  { %1749 = vmatpush.bf16.msrb.mxu1 %v4564_v46  ;;  %v6538_v46 = vld [vmem:[#allocation2 + $0x12c] sm:$0xf]  ;;  %v4484_v53 = vor.u32 %v6506_v42, %v4481_v45  ;;  %v5332_v42 = vor.u32 %v6718_v28, %v5329_v29  ;;  %v7297_v28 = vld [vmem:[%s7695_s2] sm:$0xf] }
  0xb7   :  { %1762 = vmatpush.bf16.msrb.mxu2 %v4692_v47  ;;  %v4609_v47 = vld [vmem:[#allocation2 + $0x138] sm:$0xf0]  ;;  %v6682_v45 = vld [vmem:[#allocation2 + $0x5ac] sm:$0xf] }
  0xb8   :  { %1775 = vmatpush.bf16.msrb.mxu3 %v4820_v51  ;;  %v5231_v51 = vld [vmem:[#allocation2 + $0x608] sm:$0xf]  ;;  %v4612_v54 = vor.u32 %v6538_v46, %v4609_v47  ;;  %v5185_v46 = vld [vmem:[#allocation2 + $0x5b8] sm:$0xf0]  ;;  %v6714_v47 = vld [vmem:[#allocation2 + $0x6ac] sm:$0xf] }
  0xb9   :  { %1737 = vmatpush.bf16.msrb.mxu0 %v5312_v57  ;;  %v7274_v34 = vpop.f32.mrf.mxu0  ;;  %v6534_v57 = vld [vmem:[#allocation2 + $0x10c] sm:$0xf]  ;;  %v5232_v3 = vor.u32 %v6696_v52, %v5231_v51  ;;  %v5188_v51 = vor.u32 %v6682_v45, %v5185_v46  ;;  %v5121_v45 = vld [vmem:[#allocation2 + $0x538] sm:$0xf0] }
  0xba   :  { %1750 = vmatpush.bf16.msrb.mxu1 %v4548_v58  ;;  %v7276_v43 = vpop.f32.mrf.mxu1  ;;  %v7278_v58 = vpop.f32.mrf.mxu2  ;;  %v4596_v9 = vor.u32 %v6534_v57, %v4593_v60  ;;  %v6614_v52 = vld [vmem:[#allocation2 + $0x38c] sm:$0xf]  ;;  %v5297_v60 = vld [vmem:[#allocation2 + $0x698] sm:$0xf0] }
  0xbb   :  { %1763 = vmatpush.bf16.msrb.mxu2 %v4676_v59  ;;  %v4740_v59 = vor.u32 %v6570_v48, %v4737_v49  ;;  %v5313_v48 = vld [vmem:[#allocation2 + $0x6b8] sm:$0xf0]  ;;  %v6678_v57 = vld [vmem:[#allocation2 + $0x58c] sm:$0xf] }
  0xbc   :  { %1776 = vmatpush.bf16.msrb.mxu3 %v4804_v63  ;;  %v7280_v63 = vpop.f32.mrf.mxu3  ;;  %v5316_v55 = vor.u32 %v6714_v47, %v5313_v48  ;;  %v6698_v46 = vld [vmem:[#allocation2 + $0x62c] sm:$0xf]  ;;  %v5249_v47 = vld [vmem:[#allocation2 + $0x638] sm:$0xf0]  ;;  %v322_v48 = vperm.slane %v7297_v28, 0 }
  0xbd   :  { %1738 = vmatpush.bf16.msrb.mxu0 %v5296_v5  ;;  %v6690_v5 = vld [vmem:[#allocation2 + $0x5ec] sm:$0xf] }
  0xbe   :  { %1751 = vmatpush.bf16.msrb.mxu1 %v4532_v6  ;;  %v5217_v6 = vld [vmem:[#allocation2 + $0x5f8] sm:$0xf0] }
  0xbf   :  { %1764 = vmatpush.bf16.msrb.mxu2 %v4660_v7  ;;  %v5220_v16 = vor.u32 %v6690_v5, %v5217_v6  ;;  %v5025_v5 = vld [vmem:[#allocation2 + $0x478] sm:$0xf0]  ;;  %v6674_v6 = vld [vmem:[#allocation2 + $0x56c] sm:$0xf] }
  0xc0   :  { %1777 = vmatpush.bf16.msrb.mxu3 %v4788_v11  ;;  %v5345_v11 = vld [vmem:[#allocation2 + $0x6f8] sm:$0xf0] }
  0xc1   :  { %1739 = vmatpush.bf16.msrb.mxu0 %v5280_v17  ;;  %v1486_v7 = vpop.f32.mrf.mxu0  ;;  %v6622_v17 = vld [vmem:[#allocation2 + $0x3cc] sm:$0xf]  ;;  %v5348_v24 = vor.u32 %v6722_v10, %v5345_v11  ;;  %v4900_v10 = vor.u32 %v6610_v1, %v4897_v2 }
  0xc2   :  { %1752 = vmatpush.bf16.msrb.mxu1 %v4516_v21  ;;  %v1499_v12 = vpop.f32.mrf.mxu1  ;;  %v4945_v21 = vld [vmem:[#allocation2 + $0x3d8] sm:$0xf0]  ;;  %v1512_v30 = vpop.f32.mrf.mxu2 }
  0xc3   :  { %1765 = vmatpush.bf16.msrb.mxu2 %v4644_v23  ;;  %v6654_v23 = vld [vmem:[#allocation2 + $0x4cc] sm:$0xf]  ;;  %v4948_v31 = vor.u32 %v6622_v17, %v4945_v21  ;;  %v5153_v7 = vld [vmem:[#allocation2 + $0x578] sm:$0xf0] }
  0xc4   :  { %1778 = vmatpush.bf16.msrb.mxu3 %v4772_v27  ;;  %v5201_v27 = vld [vmem:[#allocation2 + $0x5d8] sm:$0xf0]  ;;  %v1525_v32 = vpop.f32.mrf.mxu3  ;;  %v5156_v12 = vor.u32 %v6674_v6, %v5153_v7 }
  0xc5   :  { %1740 = vmatpush.bf16.msrb.mxu0 %v5264_v33  ;;  %v5076_v33 = vor.u32 %v6654_v23, %v5073_v25  ;;  %v5009_v21 = vld [vmem:[#allocation2 + $0x458] sm:$0xf0]  ;;  %v6670_v23 = vld [vmem:[#allocation2 + $0x54c] sm:$0xf] }
  0xc6   :  { %1753 = vmatpush.bf16.msrb.mxu1 %v4500_v35  ;;  %v5204_v35 = vor.u32 %v6686_v26, %v5201_v27  ;;  %v6702_v25 = vld [vmem:[#allocation2 + $0x64c] sm:$0xf]  ;;  %v5265_v26 = vld [vmem:[#allocation2 + $0x658] sm:$0xf0] }
  0xc7   :  { %1766 = vmatpush.bf16.msrb.mxu2 %v4628_v36  ;;  %v6618_v36 = vld [vmem:[#allocation2 + $0x3ac] sm:$0xf] }
  0xc8   :  { %1779 = vmatpush.bf16.msrb.mxu3 %v4756_v44  ;;  %v5057_v44 = vld [vmem:[#allocation2 + $0x4b8] sm:$0xf0]  ;;  %v4932_v49 = vor.u32 %v6618_v36, %v4929_v38  ;;  %v6634_v38 = vld [vmem:[#allocation2 + $0x42c] sm:$0xf] }
  0xc9   :  { %1741 = vmatpush.bf16.msrb.mxu0 %v5248_v50  ;;  %v5060_v50 = vor.u32 %v6650_v39, %v5057_v44  ;;  %v4865_v36 = vld [vmem:[#allocation2 + $0x338] sm:$0xf0]  ;;  %v5268_v39 = vor.u32 %v6702_v25, %v5265_v26  ;;  %v6666_v44 = vld [vmem:[#allocation2 + $0x52c] sm:$0xf]  ;;  %v6779_v25 = vld [vmem:[#allocation5 + $0x1ac] sm:$0xf0] }
  0xca   :  { %1754 = vmatpush.bf16.msrb.mxu1 %v4484_v53  ;;  %v4913_v53 = vld [vmem:[#allocation2 + $0x398] sm:$0xf0] }
  0xcb   :  { %1767 = vmatpush.bf16.msrb.mxu2 %v4612_v54  ;;  %v6646_v54 = vld [vmem:[#allocation2 + $0x48c] sm:$0xf] }
  0xcc   :  { %1780 = vmatpush.bf16.msrb.mxu3 %v4740_v59  ;;  %v6710_v59 = vld [vmem:[#allocation2 + $0x68c] sm:$0xf] }
  0xcd   :  { %1742 = vmatpush.bf16.msrb.mxu0 %v5232_v3  ;;  %v7286_v61 = vpop.f32.mrf.mxu0  ;;  %v6642_v3 = vld [vmem:[#allocation2 + $0x46c] sm:$0xf]  ;;  %v5300_v4 = vor.u32 %v6710_v59, %v5297_v60  ;;  %v5105_v59 = vld [vmem:[#allocation2 + $0x518] sm:$0xf0] }
  0xce   :  { %1755 = vmatpush.bf16.msrb.mxu1 %v4468_v8  ;;  %v7288_v62 = vpop.f32.mrf.mxu1  ;;  %v6706_v8 = vld [vmem:[#allocation2 + $0x66c] sm:$0xf]  ;;  %v5028_v11 = vor.u32 %v6642_v3, %v5025_v5  ;;  %v5591_v3 = vld [vmem:[#allocation5 + $0x1e0] sm:$0xf] }
  0xcf   :  { %1768 = vmatpush.bf16.msrb.mxu2 %v4596_v9  ;;  %v5281_v9 = vld [vmem:[#allocation2 + $0x678] sm:$0xf0]  ;;  %v6694_v60 = vld [vmem:[#allocation2 + $0x60c] sm:$0xf] }
  0xd0   :  { %1781 = vmatpush.bf16.msrb.mxu3 %v4724_v13  ;;  %1743 = vmatmul.bf16.vlgmr.msrb.gmra.mxu0 %v7252_v37  ;;  %v6606_v13 = vld [vmem:[#allocation2 + $0x34c] sm:$0xf]  ;;  %v5284_v17 = vor.u32 %v6706_v8, %v5281_v9  ;;  %v1485_v9 = vadd.f32 %v7274_v34, %v322_v48  ;;  %v5559_v34 = vld [vmem:[#allocation5 + $0x1a0] sm:$0xf] }
  0xd1   :  { %1787 = vmatpush.bf16.msra.mxu0 %v4964_v14  ;;  %1756 = vmatmul.bf16.vlgmr.msrb.gmra.mxu1 %v7236_v19  ;;  %v5044_v19 = vor.u32 %v6646_v54, %v5041_v56  ;;  %v4881_v14 = vld [vmem:[#allocation2 + $0x358] sm:$0xf0]  ;;  %v6630_v54 = vld [vmem:[#allocation2 + $0x40c] sm:$0xf] }
  0xd2   :  { %1800 = vmatpush.bf16.msra.mxu1 %v5092_v15  ;;  %1769 = vmatmul.bf16.vlgmr.msrb.gmra.mxu2 %v7240_v22  ;;  %v5169_v22 = vld [vmem:[#allocation2 + $0x598] sm:$0xf0]  ;;  %v6638_v15 = vld [vmem:[#allocation2 + $0x44c] sm:$0xf]  ;;  %v4884_v29 = vor.u32 %v6606_v13, %v4881_v14  ;;  %v5575_v13 = vld [vmem:[#allocation5 + $0x1c0] sm:$0xf] }
  0xd3   :  { %1813 = vmatpush.bf16.msra.mxu2 %v5220_v16  ;;  %1782 = vmatmul.bf16.vlgmr.msrb.gmra.mxu3 %v7234_v18  ;;  %v4916_v18 = vor.u32 %v6614_v52, %v4913_v53  ;;  %v5172_v0 = vor.u32 %v6678_v57, %v5169_v22  ;;  %v5012_v32 = vor.u32 %v6638_v15, %v5009_v21  ;;  %v4849_v53 = vld [vmem:[#allocation2 + $0x318] sm:$0xf0]  ;;  %v6662_v22 = vld [vmem:[#allocation2 + $0x50c] sm:$0xf]  ;;  %v6783_v14 = vld [vmem:[#allocation5 + $0x1cc] sm:$0xf0] }
  0xd4   :  { %1826 = vmatpush.bf16.msra.mxu3 %v5348_v24  ;;  %v5137_v24 = vld [vmem:[#allocation2 + $0x558] sm:$0xf0]  ;;  %v5124_v52 = vor.u32 %v6666_v44, %v5121_v45  ;;  %v5252_v57 = vor.u32 %v6698_v46, %v5249_v47  ;;  %v5108_v6 = vor.u32 %v6662_v22, %v5105_v59  ;;  %v5576_v21 = vor.u32 %v6783_v14, %v5575_v13  ;;  %v5383_v44 = vld [vmem:[#allocation5 + $0x40] sm:$0xf]  ;;  %v6735_v47 = vld [vmem:[#allocation5 + $0x4c] sm:$0xf0] }
  0xd5   :  { %1788 = vmatpush.bf16.msra.mxu0 %v4948_v31  ;;  %v7290_v16 = vpop.f32.mrf.mxu2  ;;  %v1538_v30 = vpop.f32.mrf.mxu0  ;;  %v6731_v59 = vld [vmem:[#allocation5 + $0x2c] sm:$0xf0]  ;;  %v6753_v13 = vld [vmem:[#allocation5 + $0xe4] sm:$0xf]  ;;  %v5465_v14 = vld [vmem:[#allocation5 + $0xf0] sm:$0xf0] }
  0xd6   :  { %1801 = vmatpush.bf16.msra.mxu1 %v5076_v33  ;;  %v7292_v27 = vpop.f32.mrf.mxu3  ;;  %v1551_v31 = vpop.f32.mrf.mxu1  ;;  %v5140_v33 = vor.u32 %v6670_v23, %v5137_v24  ;;  %v5431_v23 = vld [vmem:[#allocation5 + $0xa0] sm:$0xf]  ;;  %v6747_v24 = vld [vmem:[#allocation5 + $0xac] sm:$0xf0] }
  0xd7   :  { %1814 = vmatpush.bf16.msra.mxu2 %v5204_v35  ;;  %v6602_v35 = vld [vmem:[#allocation2 + $0x32c] sm:$0xf]  ;;  %v5432_v26 = vor.u32 %v6747_v24, %v5431_v23  ;;  %v5415_v30 = vld [vmem:[#allocation5 + $0x80] sm:$0xf]  ;;  %v6743_v31 = vld [vmem:[#allocation5 + $0x8c] sm:$0xf0] }
  0xd8   :  { %1827 = vmatpush.bf16.msra.mxu3 %v5332_v42  ;;  %v4993_v42 = vld [vmem:[#allocation2 + $0x438] sm:$0xf0] }
  0xd9   :  { %1789 = vmatpush.bf16.msra.mxu0 %v4932_v49  ;;  %v4868_v49 = vor.u32 %v6602_v35, %v4865_v36  ;;  %v5399_v36 = vld [vmem:[#allocation5 + $0x60] sm:$0xf] }
  0xda   :  { %1802 = vmatpush.bf16.msra.mxu1 %v5060_v50  ;;  %v6598_v50 = vld [vmem:[#allocation2 + $0x30c] sm:$0xf] }
  0xdb   :  { %1815 = vmatpush.bf16.msra.mxu2 %v5188_v51  ;;  %v4996_v51 = vor.u32 %v6634_v38, %v4993_v42  ;;  %v4852_v2 = vor.u32 %v6598_v50, %v4849_v53  ;;  %v6739_v38 = vld [vmem:[#allocation5 + $0x6c] sm:$0xf0]  ;;  %v5511_v50 = vld [vmem:[#allocation5 + $0x140] sm:$0xf] }
  0xdc   :  { %1828 = vmatpush.bf16.msra.mxu3 %v5316_v55  ;;  %v4977_v55 = vld [vmem:[#allocation2 + $0x418] sm:$0xf0]  ;;  %v6771_v42 = vld [vmem:[#allocation5 + $0x16c] sm:$0xf0] }
  0xdd   :  { %1790 = vmatpush.bf16.msra.mxu0 %v4916_v18  ;;  %v1564_v56 = vpop.f32.mrf.mxu2  ;;  %v5233_v18 = vld [vmem:[#allocation2 + $0x618] sm:$0xf0]  ;;  %v4980_v5 = vor.u32 %v6630_v54, %v4977_v55  ;;  %v323_v54 = vperm.slane %v7297_v28, 1  ;;  %v5384_v55 = vor.u32 %v6735_v47, %v5383_v44 }
  0xde   :  { %1803 = vmatpush.bf16.msra.mxu1 %v5044_v19  ;;  %v5463_v19 = vld [vmem:[#allocation5 + $0xe0] sm:$0xf]  ;;  %v1577_v1 = vpop.f32.mrf.mxu3  ;;  %v5236_v7 = vor.u32 %v6694_v60, %v5233_v18 }
  0xdf   :  { %1816 = vmatpush.bf16.msra.mxu2 %v5172_v0  ;;  %v6755_v0 = vld [vmem:[#allocation5 + $0xec] sm:$0xf0]  ;;  %v5367_v56 = vld [vmem:[#allocation5 + $0x20] sm:$0xf] }
  0xe0   :  { %1829 = vmatpush.bf16.msra.mxu3 %v5300_v4  ;;  %v6787_v4 = vld [vmem:[#allocation5 + $0x1ec] sm:$0xf0]  ;;  %v5464_v8 = vor.u32 %v6755_v0, %v5463_v19  ;;  %v5703_v18 = vld [vmem:[#allocation5 + $0x2c0] sm:$0xf] }
  0xe1   :  { %1791 = vmatpush.bf16.msra.mxu0 %v4900_v10  ;;  %v5592_v10 = vor.u32 %v6787_v4, %v5591_v3  ;;  %v6815_v19 = vld [vmem:[#allocation5 + $0x2cc] sm:$0xf0]  ;;  %v5495_v0 = vld [vmem:[#allocation5 + $0x120] sm:$0xf]  ;;  %v1576_v3 = vadd.f32 %v7292_v27, %v323_v54  ;;  %v5368_v4 = vor.u32 %v6731_v59, %v5367_v56  ;;  %v5593_v27 = vld [vmem:[#allocation5 + $0x1f0] sm:$0xf0] }
  0xe2   :  { %1804 = vmatpush.bf16.msra.mxu1 %v5028_v11  ;;  %v5447_v11 = vld [vmem:[#allocation5 + $0xc0] sm:$0xf]  ;;  %v6763_v1 = vld [vmem:[#allocation5 + $0x12c] sm:$0xf0]  ;;  %v5545_v56 = vld [vmem:[#allocation5 + $0x190] sm:$0xf0] }
  0xe3   :  { %1817 = vmatpush.bf16.msra.mxu2 %v5156_v12  ;;  %v6751_v12 = vld [vmem:[#allocation5 + $0xcc] sm:$0xf0]  ;;  %v5623_v59 = vld [vmem:[#allocation5 + $0x220] sm:$0xf] }
  0xe4   :  { %1830 = vmatpush.bf16.msra.mxu3 %v5284_v17  ;;  %v5448_v15 = vor.u32 %v6751_v12, %v5447_v11  ;;  %v1498_v17 = vadd.f32 %v7276_v43, %v1485_v9  ;;  %v5560_v43 = vor.u32 %v6779_v25, %v5559_v34  ;;  %v6811_v11 = vld [vmem:[#allocation5 + $0x2ac] sm:$0xf0]  ;;  %v5468_v25 = vor.u32 %v6753_v13, %v5465_v14  ;;  %v5721_v13 = vld [vmem:[#allocation5 + $0x2f0] sm:$0xf0]  ;;  %v6765_v14 = vld [vmem:[#allocation5 + $0x144] sm:$0xf] }
  0xe5   :  { %1792 = vmatpush.bf16.msra.mxu0 %v4884_v29  ;;  %v6759_v12 = vld [vmem:[#allocation5 + $0x10c] sm:$0xf0] }
  0xe6   :  { %1805 = vmatpush.bf16.msra.mxu1 %v5012_v32  ;;  %v1511_v29 = vadd.f32 %v7278_v58, %v1498_v17  ;;  %v6775_v32 = vld [vmem:[#allocation5 + $0x18c] sm:$0xf0]  ;;  %v5400_v58 = vor.u32 %v6739_v38, %v5399_v36  ;;  %v5655_v36 = vld [vmem:[#allocation5 + $0x260] sm:$0xf] }
  0xe7   :  { %1818 = vmatpush.bf16.msra.mxu2 %v5140_v33  ;;  %v5416_v33 = vor.u32 %v6743_v31, %v5415_v30  ;;  %v6749_v30 = vld [vmem:[#allocation5 + $0xc4] sm:$0xf]  ;;  %v5449_v31 = vld [vmem:[#allocation5 + $0xd0] sm:$0xf0]  ;;  %v6803_v38 = vld [vmem:[#allocation5 + $0x26c] sm:$0xf0] }
  0xe8   :  { %1831 = vmatpush.bf16.msra.mxu3 %v5268_v39  ;;  %v5527_v39 = vld [vmem:[#allocation5 + $0x160] sm:$0xf]  ;;  %v5656_v44 = vor.u32 %v6803_v38, %v5655_v36  ;;  %v6757_v36 = vld [vmem:[#allocation5 + $0x104] sm:$0xf]  ;;  %v5481_v38 = vld [vmem:[#allocation5 + $0x110] sm:$0xf0] }
  0xe9   :  { %1793 = vmatpush.bf16.msra.mxu0 %v4868_v49  ;;  %v5528_v46 = vor.u32 %v6771_v42, %v5527_v39  ;;  %v5719_v49 = vld [vmem:[#allocation5 + $0x2e0] sm:$0xf]  ;;  %v6745_v42 = vld [vmem:[#allocation5 + $0xa4] sm:$0xf] }
  0xea   :  { %1806 = vmatpush.bf16.msra.mxu1 %v4996_v51  ;;  %v6767_v51 = vld [vmem:[#allocation5 + $0x14c] sm:$0xf0] }
  0xeb   :  { %1819 = vmatpush.bf16.msra.mxu2 %v5124_v52  ;;  %v5512_v22 = vor.u32 %v6767_v51, %v5511_v50  ;;  %v6741_v51 = vld [vmem:[#allocation5 + $0x84] sm:$0xf] }
  0xec   :  { %1832 = vmatpush.bf16.msra.mxu3 %v5252_v57 }
  0xed   :  { %1794 = vmatpush.bf16.msra.mxu0 %v4852_v2  ;;  %v1588_v35 = vpop.f32.mrf.mxu0  ;;  %v5704_v2 = vor.u32 %v6815_v19, %v5703_v18 }
  0xee   :  { %1807 = vmatpush.bf16.msra.mxu1 %v4980_v5  ;;  %v5351_v5 = vld [vmem:[#allocation5] sm:$0xf]  ;;  %v1589_v23 = vadd.f32 %v1588_v35, %v1576_v3  ;;  %v6769_v3 = vld [vmem:[#allocation5 + $0x164] sm:$0xf] }
  0xef   :  { %1820 = vmatpush.bf16.msra.mxu2 %v5108_v6  ;;  %v6727_v6 = vld [vmem:[#allocation5 + $0xc] sm:$0xf0] }
  0xf0   :  { %1833 = vmatpush.bf16.msra.mxu3 %v5236_v7  ;;  %1795 = vmatmul.bf16.vlgmr.msra.gmra.mxu0 %v7238_v20  ;;  %v5543_v20 = vld [vmem:[#allocation5 + $0x180] sm:$0xf]  ;;  %v5352_v24 = vor.u32 %v6727_v6, %v5351_v5  ;;  %v6733_v6 = vld [vmem:[#allocation5 + $0x44] sm:$0xf] }
  0xf1   :  { %2625 = vmatpush.bf16.msrb.mxu0 %v5464_v8  ;;  %1808 = vmatmul.bf16.vlgmr.msra.gmra.mxu1 %v7254_v40  ;;  %v1524_v40 = vadd.f32 %v7280_v63, %v1511_v29  ;;  %v6819_v63 = vld [vmem:[#allocation5 + $0x2ec] sm:$0xf0]  ;;  %v5479_v8 = vld [vmem:[#allocation5 + $0x100] sm:$0xf] }
  0xf2   :  { %2638 = vmatpush.bf16.msrb.mxu1 %v5592_v10  ;;  %1821 = vmatmul.bf16.vlgmr.msra.gmra.mxu2 %v7256_v41  ;;  %v5544_v41 = vor.u32 %v6775_v32, %v5543_v20  ;;  %v5720_v53 = vor.u32 %v6819_v63, %v5719_v49  ;;  %v5687_v10 = vld [vmem:[#allocation5 + $0x2a0] sm:$0xf]  ;;  %v6807_v29 = vld [vmem:[#allocation5 + $0x28c] sm:$0xf0]  ;;  %v6781_v32 = vld [vmem:[#allocation5 + $0x1c4] sm:$0xf] }
  0xf3   :  { %1834 = vmatmul.bf16.vlgmr.msra.gmra.mxu3 %v7252_v37  ;;  %v7308_v37 = vpop.f32.mrf.mxu1  ;;  %v1537_v45 = vadd.f32 %v7286_v61, %v1524_v40  ;;  %v5688_v17 = vor.u32 %v6811_v11, %v5687_v10  ;;  %v5639_v49 = vld [vmem:[#allocation5 + $0x240] sm:$0xf]  ;;  %v6799_v63 = vld [vmem:[#allocation5 + $0x24c] sm:$0xf0] }
  0xf4   :  { %2651 = vmatpush.bf16.msrb.mxu2 %v5720_v53  ;;  %v1602_v40 = vadd.f32 %v7308_v37, %v1589_v23  ;;  %v5417_v53 = vld [vmem:[#allocation5 + $0x90] sm:$0xf0]  ;;  %v5640_v54 = vor.u32 %v6799_v63, %v5639_v49  ;;  %v5599_v49 = vld [vmem:[#allocation5 + $0x1e8] sm:$0xf]  ;;  %v6788_v63 = vld [vmem:[#allocation5 + $0x1f4] sm:$0xf0] }
  0xf5   :  { %2626 = vmatpush.bf16.msrb.mxu0 %v5448_v15  ;;  %v7311_v48 = vpop.f32.mrf.mxu2  ;;  %v1590_v57 = vpop.f32.mrf.mxu0  ;;  %v1550_v61 = vadd.f32 %v7288_v62, %v1537_v45  ;;  %v5496_v62 = vor.u32 %v6763_v1, %v5495_v0  ;;  %v6777_v45 = vld [vmem:[#allocation5 + $0x1a4] sm:$0xf]  ;;  %v5401_v1 = vld [vmem:[#allocation5 + $0x70] sm:$0xf0] }
  0xf6   :  { %2639 = vmatpush.bf16.msrb.mxu1 %v5576_v21  ;;  %v7313_v52 = vpop.f32.mrf.mxu3  ;;  %v6785_v21 = vld [vmem:[#allocation5 + $0x1e4] sm:$0xf]  ;;  %v1615_v37 = vadd.f32 %v7311_v48, %v1602_v40  ;;  %v6795_v48 = vld [vmem:[#allocation5 + $0x22c] sm:$0xf0] }
  0xf7   :  { %v1563_v7 = vadd.f32 %v7290_v16, %v1550_v61  ;;  %v5480_v16 = vor.u32 %v6759_v12, %v5479_v8  ;;  %v6737_v0 = vld [vmem:[#allocation5 + $0x64] sm:$0xf]  ;;  %v6791_v8 = vld [vmem:[#allocation5 + $0x20c] sm:$0xf0] }
  0xf8   :  { %2652 = vmatpush.bf16.msrb.mxu2 %v5704_v2  ;;  %v1628_v57 = vadd.f32 %v7313_v52, %v1615_v37  ;;  %v5624_v2 = vor.u32 %v6795_v48, %v5623_v59  ;;  %v5404_v52 = vor.u32 %v6737_v0, %v5401_v1  ;;  %v6817_v12 = vld [vmem:[#allocation5 + $0x2e4] sm:$0xf]  ;;  %v5600_v59 = vor.u32 %v6788_v63, %v5599_v49  ;;  %v6752_v48 = vld [vmem:[#allocation5 + $0xd4] sm:$0xf0]  ;;  %v5583_v0 = vld [vmem:[#allocation5 + $0x1c8] sm:$0xf] }
  0xf9   :  { %2627 = vmatpush.bf16.msrb.mxu0 %v5432_v26  ;;  %v1839_v34 = vmax.f32 %v1563_v7, 0.0  ;;  %v5671_v26 = vld [vmem:[#allocation5 + $0x280] sm:$0xf]  ;;  %v5385_v7 = vld [vmem:[#allocation5 + $0x50] sm:$0xf0] }
  0xfa   :  { %2640 = vmatpush.bf16.msrb.mxu1 %v5560_v43  ;;  %v5596_v43 = vor.u32 %v6785_v21, %v5593_v27  ;;  %v5672_v20 = vor.u32 %v6807_v29, %v5671_v26  ;;  %v5388_v23 = vor.u32 %v6733_v6, %v5385_v7  ;;  %v5369_v26 = vld [vmem:[#allocation5 + $0x30] sm:$0xf0]  ;;  %v6784_v1 = vld [vmem:[#allocation5 + $0x1d4] sm:$0xf0]  ;;  %v6843_v6 = vld [vmem:[#allocation5 + $0x3ac] sm:$0xf0] }
  0xfb   :  { %v1603_v60 = vpop.f32.mrf.mxu1  ;;  %v7320_v35 = vpack.c.bf16 %v1839_v34, %v1839_v34  ;;  %v6748_v7 = vld [vmem:[#allocation5 + $0xb4] sm:$0xf0]  ;;  %v5767_v49 = vld [vmem:[#allocation5 + $0x340] sm:$0xf]  ;;  %v6831_v63 = vld [vmem:[#allocation5 + $0x34c] sm:$0xf0] }
  0xfc   :  { %2653 = vmatpush.bf16.msrb.mxu2 %v5688_v17  ;;  %v5724_v17 = vor.u32 %v6817_v12, %v5721_v13 }
  0xfd   :  { %2628 = vmatpush.bf16.msrb.mxu0 %v5416_v33  ;;  %v1616_v9 = vpop.f32.mrf.mxu2  ;;  %v5577_v33 = vld [vmem:[#allocation5 + $0x1d0] sm:$0xf0] }
  0xfe   :  { %2641 = vmatpush.bf16.msrb.mxu1 %v5544_v41  ;;  %v1629_v15 = vpop.f32.mrf.mxu3  ;;  %v5452_v41 = vor.u32 %v6749_v30, %v5449_v31  ;;  %v5580_v39 = vor.u32 %v6781_v32, %v5577_v33  ;;  %v5705_v30 = vld [vmem:[#allocation5 + $0x2d0] sm:$0xf0]  ;;  %v6761_v31 = vld [vmem:[#allocation5 + $0x124] sm:$0xf] }
  0xff   :  { %v5513_v15 = vld [vmem:[#allocation5 + $0x150] sm:$0xf0]  ;;  %v6725_v33 = vld [vmem:[#allocation5 + $0x4] sm:$0xf] }
 0x100   :  { %2654 = vmatpush.bf16.msrb.mxu2 %v5672_v20  ;;  %v5497_v20 = vld [vmem:[#allocation5 + $0x130] sm:$0xf0] }
 0x101   :  { %2629 = vmatpush.bf16.msrb.mxu0 %v5400_v58  ;;  %v5433_v58 = vld [vmem:[#allocation5 + $0xb0] sm:$0xf0] }
 0x102   :  { %2642 = vmatpush.bf16.msrb.mxu1 %v5528_v46  ;;  %v5561_v46 = vld [vmem:[#allocation5 + $0x1b0] sm:$0xf0]  ;;  %v5436_v47 = vor.u32 %v6745_v42, %v5433_v58  ;;  %v5847_v42 = vld [vmem:[#allocation5 + $0x3e0] sm:$0xf]  ;;  %v6851_v58 = vld [vmem:[#allocation5 + $0x3ec] sm:$0xf0] }
 0x103   :  { %v5564_v50 = vor.u32 %v6777_v45, %v5561_v46  ;;  %v5471_v45 = vld [vmem:[#allocation5 + $0xe8] sm:$0xf]  ;;  %v6756_v46 = vld [vmem:[#allocation5 + $0xf4] sm:$0xf0]  ;;  %v5848_v37 = vor.u32 %v6851_v58, %v5847_v42 }
 0x104   :  { %2655 = vmatpush.bf16.msrb.mxu2 %v5656_v44  ;;  %v6809_v44 = vld [vmem:[#allocation5 + $0x2a4] sm:$0xf]  ;;  %v5535_v42 = vld [vmem:[#allocation5 + $0x168] sm:$0xf]  ;;  %v6772_v58 = vld [vmem:[#allocation5 + $0x174] sm:$0xf0] }
 0x105   :  { %2630 = vmatpush.bf16.msrb.mxu0 %v5384_v55  ;;  %v6773_v55 = vld [vmem:[#allocation5 + $0x184] sm:$0xf]  ;;  %2664 = vmatpush.bf16.msrb.mxu3 %v5848_v37 }
 0x106   :  { %2643 = vmatpush.bf16.msrb.mxu1 %v5512_v22  ;;  %v5420_v22 = vor.u32 %v6741_v51, %v5417_v53  ;;  %v5548_v18 = vor.u32 %v6773_v55, %v5545_v56  ;;  %v5484_v55 = vor.u32 %v6757_v36, %v5481_v38  ;;  %v5472_v56 = vor.u32 %v6756_v46, %v5471_v45  ;;  %v6793_v38 = vld [vmem:[#allocation5 + $0x224] sm:$0xf] }
 0x108   :  { %2656 = vmatpush.bf16.msrb.mxu2 %v5640_v54 }
 0x109   :  { %2631 = vmatpush.bf16.msrb.mxu0 %v5368_v4  ;;  %v5529_v4 = vld [vmem:[#allocation5 + $0x170] sm:$0xf0] }
 0x10a   :  { %2644 = vmatpush.bf16.msrb.mxu1 %v5496_v62  ;;  %v5607_v62 = vld [vmem:[#allocation5 + $0x200] sm:$0xf]  ;;  %v5532_v10 = vor.u32 %v6769_v3, %v5529_v4  ;;  %v5439_v4 = vld [vmem:[#allocation5 + $0xa8] sm:$0xf] }
 0x10b   :  { %v5608_v11 = vor.u32 %v6791_v8, %v5607_v62  ;;  %v6801_v8 = vld [vmem:[#allocation5 + $0x264] sm:$0xf]  ;;  %v5440_v13 = vor.u32 %v6748_v7, %v5439_v4  ;;  %v6764_v4 = vld [vmem:[#allocation5 + $0x134] sm:$0xf0] }
 0x10c   :  { %2657 = vmatpush.bf16.msrb.mxu2 %v5624_v2 }
 0x10d   :  { %2632 = vmatpush.bf16.msrb.mxu0 %v5352_v24  ;;  %v1640_v61 = vpop.f32.mrf.mxu0  ;;  %v6729_v24 = vld [vmem:[#allocation5 + $0x24] sm:$0xf] }
 0x10e   :  { %2645 = vmatpush.bf16.msrb.mxu1 %v5480_v16  ;;  %v1641_v60 = vadd.f32 %v1640_v61, %v1628_v57  ;;  %v1653_v19 = vpop.f32.mrf.mxu1  ;;  %v5372_v40 = vor.u32 %v6729_v24, %v5369_v26  ;;  %v5455_v57 = vld [vmem:[#allocation5 + $0xc8] sm:$0xf]  ;;  %v5831_v61 = vld [vmem:[#allocation5 + $0x3c0] sm:$0xf]  ;;  %v5641_v26 = vld [vmem:[#allocation5 + $0x250] sm:$0xf0] }
 0x10f   :  { %v5456_v3 = vor.u32 %v6752_v48, %v5455_v57  ;;  %v5423_v24 = vld [vmem:[#allocation5 + $0x88] sm:$0xf] }
 0x110   :  { %2633 = vmatmul.bf16.vlgmr.msrb.gmra.mxu0 %v7320_v35  ;;  %v1654_v5 = vadd.f32 %v1653_v19, %v1641_v60  ;;  %2658 = vmatpush.bf16.msrb.mxu2 %v5608_v11  ;;  %v5673_v19 = vld [vmem:[#allocation5 + $0x290] sm:$0xf0]  ;;  %v6780_v11 = vld [vmem:[#allocation5 + $0x1b4] sm:$0xf0]  ;;  %v5519_v57 = vld [vmem:[#allocation5 + $0x148] sm:$0xf] }
 0x111   :  { %2677 = vmatpush.bf16.msra.mxu0 %v5468_v25  ;;  %v5516_v25 = vor.u32 %v6765_v14, %v5513_v15  ;;  %v5799_v14 = vld [vmem:[#allocation5 + $0x380] sm:$0xf]  ;;  %v6839_v15 = vld [vmem:[#allocation5 + $0x38c] sm:$0xf0] }
 0x112   :  { %2690 = vmatpush.bf16.msra.mxu1 %v5596_v43  ;;  %v1840_v9 = vmax.f32 %v1654_v5, 0.0  ;;  %v6813_v43 = vld [vmem:[#allocation5 + $0x2c4] sm:$0xf]  ;;  %v5815_v5 = vld [vmem:[#allocation5 + $0x3a0] sm:$0xf] }
 0x113   :  { %v5708_v32 = vor.u32 %v6813_v43, %v5705_v30  ;;  %v5816_v62 = vor.u32 %v6843_v6, %v5815_v5  ;;  %v6776_v43 = vld [vmem:[#allocation5 + $0x194] sm:$0xf0] }
 0x114   :  { %v7325_v21 = vpack.c.bf16 %v1840_v9, %v1840_v9  ;;  %2703 = vmatpush.bf16.msra.mxu2 %v5724_v17  ;;  %v5657_v9 = vld [vmem:[#allocation5 + $0x270] sm:$0xf0]  ;;  %v6797_v17 = vld [vmem:[#allocation5 + $0x244] sm:$0xf] }
 0x115   :  { %2678 = vmatpush.bf16.msra.mxu0 %v5452_v41  ;;  %v7327_v27 = vpop.f32.mrf.mxu2  ;;  %v1642_v16 = vpop.f32.mrf.mxu0  ;;  %v5353_v41 = vld [vmem:[#allocation5 + $0x10] sm:$0xf0]  ;;  %v5660_v12 = vor.u32 %v6801_v8, %v5657_v9  ;;  %v5644_v30 = vor.u32 %v6797_v17, %v5641_v26  ;;  %v6728_v8 = vld [vmem:[#allocation5 + $0x14] sm:$0xf0]  ;;  %v5735_v9 = vld [vmem:[#allocation5 + $0x300] sm:$0xf] }
 0x116   :  { %2691 = vmatpush.bf16.msra.mxu1 %v5580_v39  ;;  %v7329_v34 = vpop.f32.mrf.mxu3  ;;  %v1655_v29 = vpop.f32.mrf.mxu1  ;;  %v5500_v39 = vor.u32 %v6761_v31, %v5497_v20  ;;  %v5356_v53 = vor.u32 %v6725_v33, %v5353_v41  ;;  %v6744_v16 = vld [vmem:[#allocation5 + $0x94] sm:$0xf0]  ;;  %v5407_v20 = vld [vmem:[#allocation5 + $0x68] sm:$0xf]  ;;  %v6835_v33 = vld [vmem:[#allocation5 + $0x36c] sm:$0xf0] }
 0x117   :  { %2646 = vmatmul.bf16.vlgmr.msrb.gmra.mxu1 %v7325_v21  ;;  %v5551_v29 = vld [vmem:[#allocation5 + $0x188] sm:$0xf]  ;;  %v5424_v31 = vor.u32 %v6744_v16, %v5423_v24  ;;  %v6740_v41 = vld [vmem:[#allocation5 + $0x74] sm:$0xf0]  ;;  %v5473_v24 = vld [vmem:[#allocation5 + $0xf8] sm:$0xf0] }
 0x118   :  { %2704 = vmatpush.bf16.msra.mxu2 %v5708_v32  ;;  %v5783_v32 = vld [vmem:[#allocation5 + $0x360] sm:$0xf]  ;;  %v5408_v37 = vor.u32 %v6740_v41, %v5407_v20  ;;  %v6760_v17 = vld [vmem:[#allocation5 + $0x114] sm:$0xf0]  ;;  %v5601_v26 = vld [vmem:[#allocation5 + $0x1f8] sm:$0xf0] }
 0x119   :  { %2679 = vmatpush.bf16.msra.mxu0 %v5436_v47  ;;  %v5689_v47 = vld [vmem:[#allocation5 + $0x2b0] sm:$0xf0]  ;;  %v5784_v36 = vor.u32 %v6835_v33, %v5783_v32  ;;  %v6845_v32 = vld [vmem:[#allocation5 + $0x3c4] sm:$0xf]  ;;  %v6750_v41 = vld [vmem:[#allocation5 + $0xcc] sm:$0xf] }
 0x11a   :  { %2692 = vmatpush.bf16.msra.mxu1 %v5564_v50  ;;  %v5692_v51 = vor.u32 %v6809_v44, %v5689_v47  ;;  %v5391_v47 = vld [vmem:[#allocation5 + $0x48] sm:$0xf]  ;;  %v5833_v33 = vld [vmem:[#allocation5 + $0x3d0] sm:$0xf0] }
 0x11c   :  { %2705 = vmatpush.bf16.msra.mxu2 %v5692_v51  ;;  %v6736_v51 = vld [vmem:[#allocation5 + $0x54] sm:$0xf0] }
 0x11d   :  { %2680 = vmatpush.bf16.msra.mxu0 %v5420_v22  ;;  %v1668_v50 = vpop.f32.mrf.mxu2  ;;  %v6847_v22 = vld [vmem:[#allocation5 + $0x3cc] sm:$0xf0]  ;;  %v5392_v48 = vor.u32 %v6736_v51, %v5391_v47  ;;  %v6778_v51 = vld [vmem:[#allocation5 + $0x1ac] sm:$0xf] }
 0x11e   :  { %2693 = vmatpush.bf16.msra.mxu1 %v5548_v18  ;;  %v1681_v54 = vpop.f32.mrf.mxu3  ;;  %v5832_v60 = vor.u32 %v6847_v22, %v5831_v61  ;;  %v6805_v18 = vld [vmem:[#allocation5 + $0x284] sm:$0xf]  ;;  %v5536_v50 = vor.u32 %v6772_v58, %v5535_v42  ;;  %v6768_v61 = vld [vmem:[#allocation5 + $0x154] sm:$0xf0]  ;;  %v5585_v42 = vld [vmem:[#allocation5 + $0x1d8] sm:$0xf0] }
 0x11f   :  { %v5676_v2 = vor.u32 %v6805_v18, %v5673_v19  ;;  %v6789_v54 = vld [vmem:[#allocation5 + $0x204] sm:$0xf]  ;;  %v5751_v18 = vld [vmem:[#allocation5 + $0x320] sm:$0xf]  ;;  %v5520_v19 = vor.u32 %v6768_v61, %v5519_v57  ;;  %v6742_v61 = vld [vmem:[#allocation5 + $0x8c] sm:$0xf] }
 0x120   :  { %2665 = vmatpush.bf16.msrb.mxu3 %v5832_v60 }
 0x121   :  { %2681 = vmatpush.bf16.msra.mxu0 %v5404_v52  ;;  %v5584_v52 = vor.u32 %v6784_v1, %v5583_v0  ;;  %2706 = vmatpush.bf16.msra.mxu2 %v5676_v2  ;;  %v5375_v0 = vld [vmem:[#allocation5 + $0x28] sm:$0xf]  ;;  %v6732_v1 = vld [vmem:[#allocation5 + $0x34] sm:$0xf0]  ;;  %v6827_v2 = vld [vmem:[#allocation5 + $0x32c] sm:$0xf0] }
 0x122   :  { %2694 = vmatpush.bf16.msra.mxu1 %v5532_v10  ;;  %v5567_v10 = vld [vmem:[#allocation5 + $0x1a8] sm:$0xf]  ;;  %v5752_v6 = vor.u32 %v6827_v2, %v5751_v18  ;;  %v6774_v18 = vld [vmem:[#allocation5 + $0x18c] sm:$0xf]  ;;  %v5785_v2 = vld [vmem:[#allocation5 + $0x370] sm:$0xf0] }
 0x124   :  { %2666 = vmatpush.bf16.msrb.mxu3 %v5816_v62  ;;  %v5376_v62 = vor.u32 %v6732_v1, %v5375_v0  ;;  %v6833_v1 = vld [vmem:[#allocation5 + $0x364] sm:$0xf] }
 0x125   :  { %2682 = vmatpush.bf16.msra.mxu0 %v5388_v23  ;;  %v5568_v23 = vor.u32 %v6780_v11, %v5567_v10  ;;  %2707 = vmatpush.bf16.msra.mxu2 %v5660_v12  ;;  %v6823_v10 = vld [vmem:[#allocation5 + $0x30c] sm:$0xf0]  ;;  %v5487_v12 = vld [vmem:[#allocation5 + $0x108] sm:$0xf] }
 0x126   :  { %2695 = vmatpush.bf16.msra.mxu1 %v5516_v25  ;;  %v5800_v25 = vor.u32 %v6839_v15, %v5799_v14  ;;  %v6849_v14 = vld [vmem:[#allocation5 + $0x3e4] sm:$0xf]  ;;  %v5849_v15 = vld [vmem:[#allocation5 + $0x3f0] sm:$0xf0] }
 0x127   :  { %v5852_v16 = vor.u32 %v6849_v14, %v5849_v15  ;;  %v6734_v15 = vld [vmem:[#allocation5 + $0x4c] sm:$0xf] }
 0x128   :  { %2667 = vmatpush.bf16.msrb.mxu3 %v5800_v25  ;;  %v6786_v25 = vld [vmem:[#allocation5 + $0x1ec] sm:$0xf] }
 0x129   :  { %2683 = vmatpush.bf16.msra.mxu0 %v5372_v40  ;;  %v5552_v40 = vor.u32 %v6776_v43, %v5551_v29  ;;  %2708 = vmatpush.bf16.msra.mxu2 %v5644_v30 }
 0x12a   :  { %2696 = vmatpush.bf16.msra.mxu1 %v5500_v39  ;;  %v5625_v39 = vld [vmem:[#allocation5 + $0x230] sm:$0xf0] }
 0x12b   :  { %v5628_v45 = vor.u32 %v6793_v38, %v5625_v39  ;;  %v5836_v38 = vor.u32 %v6845_v32, %v5833_v33  ;;  %v6782_v39 = vld [vmem:[#allocation5 + $0x1cc] sm:$0xf] }
 0x12c   :  { %2668 = vmatpush.bf16.msrb.mxu3 %v5784_v36  ;;  %v5457_v36 = vld [vmem:[#allocation5 + $0xd8] sm:$0xf0] }
 0x12d   :  { %2684 = vmatpush.bf16.msra.mxu0 %v5356_v53  ;;  %v7334_v44 = vpop.f32.mrf.mxu0  ;;  %2709 = vmatpush.bf16.msra.mxu2 %v5628_v45  ;;  %v5768_v53 = vor.u32 %v6831_v63, %v5767_v49  ;;  %v5460_v58 = vor.u32 %v6750_v41, %v5457_v36  ;;  %v6841_v45 = vld [vmem:[#allocation5 + $0x3a4] sm:$0xf]  ;;  %v5588_v49 = vor.u32 %v6782_v39, %v5585_v42  ;;  %v6746_v63 = vld [vmem:[#allocation5 + $0xac] sm:$0xf] }
 0x12e   :  { %2697 = vmatpush.bf16.msra.mxu1 %v5484_v55  ;;  %v7336_v46 = vpop.f32.mrf.mxu1  ;;  %v5609_v55 = vld [vmem:[#allocation5 + $0x210] sm:$0xf0]  ;;  %v6762_v36 = vld [vmem:[#allocation5 + $0x12c] sm:$0xf] }
 0x12f   :  { %v5612_v22 = vor.u32 %v6789_v54, %v5609_v55  ;;  %v6837_v54 = vld [vmem:[#allocation5 + $0x384] sm:$0xf]  ;;  %v5801_v55 = vld [vmem:[#allocation5 + $0x390] sm:$0xf0] }
 0x130   :  { %2685 = vmatmul.bf16.vlgmr.msra.gmra.mxu0 %v7320_v35  ;;  %2669 = vmatpush.bf16.msrb.mxu3 %v5768_v53  ;;  %v5569_v53 = vld [vmem:[#allocation5 + $0x1b8] sm:$0xf0] }
 0x131   :  { %2729 = vmatpush.bf16.msrb.mxu0 %v5472_v56  ;;  %2698 = vmatmul.bf16.vlgmr.msra.gmra.mxu1 %v7325_v21  ;;  %v324_v56 = vperm.slane %v7297_v28, 2  ;;  %v5503_v28 = vld [vmem:[#allocation5 + $0x128] sm:$0xf] }
 0x132   :  { %2742 = vmatpush.bf16.msrb.mxu1 %v5600_v59  ;;  %2710 = vmatpush.bf16.msra.mxu2 %v5612_v22  ;;  %v5504_v11 = vor.u32 %v6764_v4, %v5503_v28  ;;  %v5425_v22 = vld [vmem:[#allocation5 + $0x98] sm:$0xf0]  ;;  %v6738_v4 = vld [vmem:[#allocation5 + $0x6c] sm:$0xf] }
 0x133   :  { %v5428_v0 = vor.u32 %v6742_v61, %v5425_v22 }
 0x134   :  { %2670 = vmatpush.bf16.msrb.mxu3 %v5752_v6 }
 0x135   :  { %2730 = vmatpush.bf16.msrb.mxu0 %v5456_v3  ;;  %v7339_v59 = vpop.f32.mrf.mxu2  ;;  %v1667_v3 = vadd.f32 %v7327_v27, %v324_v56  ;;  %v1694_v5 = vpop.f32.mrf.mxu0 }
 0x136   :  { %2743 = vmatpush.bf16.msrb.mxu1 %v5584_v52  ;;  %v7341_v60 = vpop.f32.mrf.mxu3  ;;  %v5359_v52 = vld [vmem:[#allocation5 + $0x8] sm:$0xf]  ;;  %v1707_v7 = vpop.f32.mrf.mxu1  ;;  %v5409_v5 = vld [vmem:[#allocation5 + $0x78] sm:$0xf0] }
 0x137   :  { %v1680_v27 = vadd.f32 %v7329_v34, %v1667_v3  ;;  %v5360_v43 = vor.u32 %v6728_v8, %v5359_v52  ;;  %v5604_v34 = vor.u32 %v6786_v25, %v5601_v26  ;;  %v6770_v52 = vld [vmem:[#allocation5 + $0x16c] sm:$0xf]  ;;  %v5537_v7 = vld [vmem:[#allocation5 + $0x178] sm:$0xf0]  ;;  %v5727_v8 = vld [vmem:[#allocation5 + $0x2e8] sm:$0xf] }
 0x138   :  { %v5711_v26 = vld [vmem:[#allocation5 + $0x2c8] sm:$0xf] }
 0x139   :  { %2731 = vmatpush.bf16.msrb.mxu0 %v5440_v13  ;;  %v5736_v13 = vor.u32 %v6823_v10, %v5735_v9  ;;  %v6820_v9 = vld [vmem:[#allocation5 + $0x2f4] sm:$0xf0]  ;;  %v5412_v10 = vor.u32 %v6738_v4, %v5409_v5  ;;  %v5647_v5 = vld [vmem:[#allocation5 + $0x248] sm:$0xf] }
 0x13a   :  { %2744 = vmatpush.bf16.msrb.mxu1 %v5568_v23  ;;  %v6754_v23 = vld [vmem:[#allocation5 + $0xec] sm:$0xf] }
 0x13b   :  { %2671 = vmatpush.bf16.msrb.mxu3 %v5736_v13  ;;  %v5476_v20 = vor.u32 %v6754_v23, %v5473_v24  ;;  %v5769_v13 = vld [vmem:[#allocation5 + $0x350] sm:$0xf0]  ;;  %v6766_v23 = vld [vmem:[#allocation5 + $0x14c] sm:$0xf]  ;;  %v5521_v24 = vld [vmem:[#allocation5 + $0x158] sm:$0xf0] }
 0x13d   :  { %2732 = vmatpush.bf16.msrb.mxu0 %v5424_v31  ;;  %v1720_v29 = vpop.f32.mrf.mxu2  ;;  %v5488_v31 = vor.u32 %v6760_v17, %v5487_v12  ;;  %v6829_v12 = vld [vmem:[#allocation5 + $0x344] sm:$0xf]  ;;  %v5728_v17 = vor.u32 %v6820_v9, %v5727_v8 }
 0x13e   :  { %2745 = vmatpush.bf16.msrb.mxu1 %v5552_v40  ;;  %v1733_v30 = vpop.f32.mrf.mxu3  ;;  %v1693_v40 = vadd.f32 %v7334_v44, %v1680_v27  ;;  %v5393_v27 = vld [vmem:[#allocation5 + $0x58] sm:$0xf0]  ;;  %v6816_v29 = vld [vmem:[#allocation5 + $0x2d4] sm:$0xf0] }
 0x13f   :  { %2716 = vmatpush.bf16.msra.mxu3 %v5852_v16  ;;  %v5772_v16 = vor.u32 %v6829_v12, %v5769_v13  ;;  %v6825_v30 = vld [vmem:[#allocation5 + $0x324] sm:$0xf]  ;;  %v5712_v41 = vor.u32 %v6816_v29, %v5711_v26  ;;  %v5615_v12 = vld [vmem:[#allocation5 + $0x208] sm:$0xf]  ;;  %v6792_v13 = vld [vmem:[#allocation5 + $0x214] sm:$0xf0] }
 0x140   :  { %v1706_v47 = vadd.f32 %v7336_v46, %v1693_v40  ;;  %v5572_v46 = vor.u32 %v6778_v51, %v5569_v53  ;;  %v6730_v40 = vld [vmem:[#allocation5 + $0x2c] sm:$0xf] }
 0x141   :  { %2733 = vmatpush.bf16.msrb.mxu0 %v5408_v37  ;;  %v5817_v37 = vld [vmem:[#allocation5 + $0x3b0] sm:$0xf0]  ;;  %v6726_v51 = vld [vmem:[#allocation5 + $0xc] sm:$0xf] }
 0x142   :  { %2746 = vmatpush.bf16.msrb.mxu1 %v5536_v50  ;;  %v5441_v50 = vld [vmem:[#allocation5 + $0xb8] sm:$0xf0]  ;;  %v5820_v44 = vor.u32 %v6841_v45, %v5817_v37  ;;  %v1719_v57 = vadd.f32 %v7339_v59, %v1706_v47  ;;  %v5788_v59 = vor.u32 %v6833_v1, %v5785_v2  ;;  %v6812_v45 = vld [vmem:[#allocation5 + $0x2b4] sm:$0xf0]  ;;  %v5663_v2 = vld [vmem:[#allocation5 + $0x268] sm:$0xf] }
 0x143   :  { %2717 = vmatpush.bf16.msra.mxu3 %v5836_v38  ;;  %v5444_v56 = vor.u32 %v6746_v63, %v5441_v50  ;;  %v5505_v38 = vld [vmem:[#allocation5 + $0x138] sm:$0xf0]  ;;  %v5737_v63 = vld [vmem:[#allocation5 + $0x310] sm:$0xf0] }
 0x144   :  { %v1732_v3 = vadd.f32 %v7341_v60, %v1719_v57  ;;  %v5540_v60 = vor.u32 %v6770_v52, %v5537_v7  ;;  %v5508_v50 = vor.u32 %v6762_v36, %v5505_v38  ;;  %v5679_v57 = vld [vmem:[#allocation5 + $0x288] sm:$0xf]  ;;  %v6806_v38 = vld [vmem:[#allocation5 + $0x28c] sm:$0xf] }
 0x145   :  { %2734 = vmatpush.bf16.msrb.mxu0 %v5392_v48  ;;  %v5804_v48 = vor.u32 %v6837_v54, %v5801_v55  ;;  %v6758_v54 = vld [vmem:[#allocation5 + $0x10c] sm:$0xf]  ;;  %v5489_v55 = vld [vmem:[#allocation5 + $0x118] sm:$0xf0]  ;;  %v5631_v7 = vld [vmem:[#allocation5 + $0x228] sm:$0xf] }
 0x146   :  { %2747 = vmatpush.bf16.msrb.mxu1 %v5520_v19  ;;  %v5553_v19 = vld [vmem:[#allocation5 + $0x198] sm:$0xf0]  ;;  %v5492_v22 = vor.u32 %v6758_v54, %v5489_v55 }
 0x147   :  { %2718 = vmatpush.bf16.msra.mxu3 %v5820_v44  ;;  %v5556_v28 = vor.u32 %v6774_v18, %v5553_v19  ;;  %v5361_v44 = vld [vmem:[#allocation5 + $0x18] sm:$0xf0] }
 0x148   :  { %v5364_v61 = vor.u32 %v6726_v51, %v5361_v44  ;;  %v5665_v51 = vld [vmem:[#allocation5 + $0x278] sm:$0xf0]  ;;  %v5823_v44 = vld [vmem:[#allocation5 + $0x3a8] sm:$0xf] }
 0x149   :  { %2735 = vmatpush.bf16.msrb.mxu0 %v5376_v62 }
 0x14a   :  { %2748 = vmatpush.bf16.msrb.mxu1 %v5504_v11 }
 0x14b   :  { %2719 = vmatpush.bf16.msra.mxu3 %v5804_v48 }
 0x14d   :  { %2736 = vmatpush.bf16.msrb.mxu0 %v5360_v43  ;;  %v1744_v6 = vpop.f32.mrf.mxu0  ;;  %v5396_v43 = vor.u32 %v6734_v15, %v5393_v27  ;;  %v5616_v15 = vor.u32 %v6792_v13, %v5615_v12  ;;  %v6814_v27 = vld [vmem:[#allocation5 + $0x2cc] sm:$0xf]  ;;  %v5743_v13 = vld [vmem:[#allocation5 + $0x308] sm:$0xf] }
 0x14e   :  { %2749 = vmatpush.bf16.msrb.mxu1 %v5488_v31  ;;  %v1745_v62 = vadd.f32 %v1744_v6, %v1732_v3  ;;  %v7351_v11 = vpop.f32.mrf.mxu1  ;;  %v5753_v31 = vld [vmem:[#allocation5 + $0x330] sm:$0xf0]  ;;  %v6804_v3 = vld [vmem:[#allocation5 + $0x274] sm:$0xf0] }
 0x14f   :  { %2720 = vmatpush.bf16.msra.mxu3 %v5788_v59  ;;  %v5756_v42 = vor.u32 %v6825_v30, %v5753_v31  ;;  %v6800_v59 = vld [vmem:[#allocation5 + $0x254] sm:$0xf0]  ;;  %v6810_v31 = vld [vmem:[#allocation5 + $0x2ac] sm:$0xf] }
 0x150   :  { %2737 = vmatmul.bf16.vlgmr.msrb.gmra.mxu0 %v7320_v35  ;;  %v1841_v14 = vmax.f32 %v1745_v62, 0.0  ;;  %v5648_v6 = vor.u32 %v6800_v59, %v5647_v5  ;;  %v6796_v62 = vld [vmem:[#allocation5 + $0x234] sm:$0xf0]  ;;  %v5775_v59 = vld [vmem:[#allocation5 + $0x348] sm:$0xf] }
 0x151   :  { %2781 = vmatpush.bf16.msra.mxu0 %v5476_v20  ;;  %2750 = vmatmul.bf16.vlgmr.msrb.gmra.mxu1 %v7325_v21  ;;  %v5524_v20 = vor.u32 %v6766_v23, %v5521_v24  ;;  %v5632_v8 = vor.u32 %v6796_v62, %v5631_v7  ;;  %v5759_v62 = vld [vmem:[#allocation5 + $0x328] sm:$0xf] }
 0x152   :  { %2794 = vmatpush.bf16.msra.mxu1 %v5604_v34  ;;  %v7353_v25 = vpack.c.bf16 %v1841_v14, %v1841_v14  ;;  %v5377_v34 = vld [vmem:[#allocation5 + $0x38] sm:$0xf0]  ;;  %v6818_v14 = vld [vmem:[#allocation5 + $0x2ec] sm:$0xf] }
 0x153   :  { %2721 = vmatpush.bf16.msra.mxu3 %v5772_v16  ;;  %v5380_v37 = vor.u32 %v6730_v40, %v5377_v34  ;;  %v6852_v40 = vld [vmem:[#allocation5 + $0x3f4] sm:$0xf0] }
 0x154   :  { %2659 = vmatmul.bf16.vlgmr.msrb.gmra.mxu2 %v7353_v25 }
 0x155   :  { %2782 = vmatpush.bf16.msra.mxu0 %v5460_v58  ;;  %v1770_v32 = vpop.f32.mrf.mxu2  ;;  %2755 = vmatpush.bf16.msrb.mxu2 %v5728_v17  ;;  %v1746_v39 = vpop.f32.mrf.mxu0  ;;  %v5695_v58 = vld [vmem:[#allocation5 + $0x2a8] sm:$0xf]  ;;  %v5713_v17 = vld [vmem:[#allocation5 + $0x2d8] sm:$0xf0] }
 0x156   :  { %2795 = vmatpush.bf16.msra.mxu1 %v5588_v49  ;;  %v1783_v33 = vpop.f32.mrf.mxu3  ;;  %v1759_v47 = vpop.f32.mrf.mxu1  ;;  %v6821_v49 = vld [vmem:[#allocation5 + $0x304] sm:$0xf]  ;;  %v5696_v53 = vor.u32 %v6812_v45, %v5695_v58  ;;  %v5681_v39 = vld [vmem:[#allocation5 + $0x298] sm:$0xf0]  ;;  %v5839_v58 = vld [vmem:[#allocation5 + $0x3c8] sm:$0xf] }
 0x157   :  { %2722 = vmatpush.bf16.msra.mxu3 %v5756_v42  ;;  %v6848_v45 = vld [vmem:[#allocation5 + $0x3d4] sm:$0xf0] }
 0x159   :  { %2783 = vmatpush.bf16.msra.mxu0 %v5444_v56  ;;  %2756 = vmatpush.bf16.msrb.mxu2 %v5712_v41  ;;  %v5740_v56 = vor.u32 %v6821_v49, %v5737_v63  ;;  %v5684_v49 = vor.u32 %v6806_v38, %v5681_v39  ;;  %v5840_v63 = vor.u32 %v6848_v45, %v5839_v58  ;;  %v6830_v38 = vld [vmem:[#allocation5 + $0x34c] sm:$0xf]  ;;  %v5777_v39 = vld [vmem:[#allocation5 + $0x358] sm:$0xf0] }
 0x15a   :  { %2796 = vmatpush.bf16.msra.mxu1 %v5572_v46  ;;  %v6808_v46 = vld [vmem:[#allocation5 + $0x294] sm:$0xf0]  ;;  %v5780_v45 = vor.u32 %v6830_v38, %v5777_v39  ;;  %v6907_v39 = vld [vmem:[#allocation7 + $0x1ac] sm:$0xf0] }
 0x15b   :  { %v5680_v19 = vor.u32 %v6808_v46, %v5679_v57  ;;  %2723 = vmatpush.bf16.msra.mxu3 %v5740_v56  ;;  %v6798_v56 = vld [vmem:[#allocation5 + $0x24c] sm:$0xf]  ;;  %v5649_v57 = vld [vmem:[#allocation5 + $0x258] sm:$0xf0]  ;;  %v5807_v46 = vld [vmem:[#allocation5 + $0x388] sm:$0xf] }
 0x15d   :  { %2784 = vmatpush.bf16.msra.mxu0 %v5428_v0  ;;  %v1772_v48 = vpop.f32.mrf.mxu2  ;;  %2757 = vmatpush.bf16.msrb.mxu2 %v5696_v53  ;;  %v7039_v0 = vld [vmem:[%s7695_s2] sm:$0xf]  ;;  %v6844_v53 = vld [vmem:[#allocation5 + $0x3b4] sm:$0xf0] }
 0x15e   :  { %2797 = vmatpush.bf16.msra.mxu1 %v5556_v28  ;;  %v1785_v18 = vpop.f32.mrf.mxu3  ;;  %v325_v1 = vperm.slane %v7039_v0, 3  ;;  %v5664_v28 = vor.u32 %v6804_v3, %v5663_v2  ;;  %v5824_v55 = vor.u32 %v6844_v53, %v5823_v44  ;;  %v5791_v0 = vld [vmem:[#allocation5 + $0x368] sm:$0xf]  ;;  %v6822_v44 = vld [vmem:[#allocation5 + $0x30c] sm:$0xf] }
 0x15f   :  { %v6794_v18 = vld [vmem:[#allocation5 + $0x22c] sm:$0xf]  ;;  %v5745_v53 = vld [vmem:[#allocation5 + $0x318] sm:$0xf0] }
 0x160   :  { %v1758_v4 = vadd.f32 %v7351_v11, %v325_v1  ;;  %v6836_v1 = vld [vmem:[#allocation5 + $0x374] sm:$0xf0] }
 0x161   :  { %2785 = vmatpush.bf16.msra.mxu0 %v5412_v10  ;;  %2758 = vmatpush.bf16.msrb.mxu2 %v5680_v19  ;;  %v5633_v19 = vld [vmem:[#allocation5 + $0x238] sm:$0xf0]  ;;  %v5792_v3 = vor.u32 %v6836_v1, %v5791_v0 }
 0x162   :  { %2798 = vmatpush.bf16.msra.mxu1 %v5540_v60  ;;  %v1771_v52 = vadd.f32 %v1770_v32, %v1758_v4  ;;  %v5636_v2 = vor.u32 %v6794_v18, %v5633_v19  ;;  %v5617_v4 = vld [vmem:[#allocation5 + $0x218] sm:$0xf0] }
 0x164   :  { %2711 = vmatmul.bf16.vlgmr.msra.gmra.mxu2 %v7353_v25  ;;  %v1784_v9 = vadd.f32 %v1783_v33, %v1771_v52  ;;  %v5855_v33 = vld [vmem:[#allocation5 + $0x3e8] sm:$0xf] }
 0x165   :  { %2786 = vmatpush.bf16.msra.mxu0 %v5396_v43  ;;  %2759 = vmatpush.bf16.msrb.mxu2 %v5664_v28  ;;  %v5716_v43 = vor.u32 %v6814_v27, %v5713_v17  ;;  %v5856_v36 = vor.u32 %v6852_v40, %v5855_v33  ;;  %v6790_v28 = vld [vmem:[#allocation5 + $0x20c] sm:$0xf]  ;;  %v5841_v17 = vld [vmem:[#allocation5 + $0x3d8] sm:$0xf0] }
 0x166   :  { %2799 = vmatpush.bf16.msra.mxu1 %v5524_v20  ;;  %v5697_v20 = vld [vmem:[#allocation5 + $0x2b8] sm:$0xf0]  ;;  %v5620_v52 = vor.u32 %v6790_v28, %v5617_v4  ;;  %v6846_v27 = vld [vmem:[#allocation5 + $0x3cc] sm:$0xf] }
 0x167   :  { %v5700_v41 = vor.u32 %v6810_v31, %v5697_v20  ;;  %v5809_v31 = vld [vmem:[#allocation5 + $0x398] sm:$0xf0]  ;;  %v6834_v33 = vld [vmem:[#allocation5 + $0x36c] sm:$0xf] }
 0x168   :  { %v5793_v40 = vld [vmem:[#allocation5 + $0x378] sm:$0xf0] }
 0x169   :  { %2787 = vmatpush.bf16.msra.mxu0 %v5380_v37  ;;  %2760 = vmatpush.bf16.msrb.mxu2 %v5648_v6  ;;  %v6832_v6 = vld [vmem:[#allocation5 + $0x354] sm:$0xf0] }
 0x16a   :  { %2800 = vmatpush.bf16.msra.mxu1 %v5508_v50  ;;  %v6802_v50 = vld [vmem:[#allocation5 + $0x26c] sm:$0xf]  ;;  %v5776_v7 = vor.u32 %v6832_v6, %v5775_v59  ;;  %v5959_v6 = vld [vmem:[#allocation7 + $0xc0] sm:$0xf] }
 0x16b   :  { %v5668_v54 = vor.u32 %v6802_v50, %v5665_v51 }
 0x16d   :  { %2788 = vmatpush.bf16.msra.mxu0 %v5364_v61  ;;  %v1796_v10 = vpop.f32.mrf.mxu0  ;;  %2761 = vmatpush.bf16.msrb.mxu2 %v5632_v8  ;;  %v6840_v61 = vld [vmem:[#allocation5 + $0x394] sm:$0xf0] }
 0x16e   :  { %2801 = vmatpush.bf16.msra.mxu1 %v5492_v22  ;;  %v1809_v11 = vpop.f32.mrf.mxu1  ;;  %v1797_v60 = vadd.f32 %v1796_v10, %v1784_v9  ;;  %v5652_v22 = vor.u32 %v6798_v56, %v5649_v57  ;;  %v5808_v48 = vor.u32 %v6840_v61, %v5807_v46  ;;  %v6828_v8 = vld [vmem:[#allocation5 + $0x334] sm:$0xf0]  ;;  %v7371_v10 = vld [vmem:[%s7697_s4] sm:$0xf] }
 0x16f   :  { %v5760_v9 = vor.u32 %v6828_v8, %v5759_v62  ;;  %v1979_v56 = vperm.slane %v7371_v10, 2  ;;  %v1980_v0 = vperm.slane %v7371_v10, 3 }
 0x170   :  { %2789 = vmatmul.bf16.vlgmr.msra.gmra.mxu0 %v7320_v35  ;;  %v5729_v35 = vld [vmem:[#allocation5 + $0x2f8] sm:$0xf0]  ;;  %v1810_v23 = vadd.f32 %v1809_v11, %v1797_v60  ;;  %v6824_v11 = vld [vmem:[#allocation5 + $0x314] sm:$0xf0]  ;;  %v1977_v60 = vperm.slane %v7371_v10, 0 }
 0x171   :  { %2802 = vmatmul.bf16.vlgmr.msra.gmra.mxu1 %v7325_v21  ;;  %v5732_v21 = vor.u32 %v6818_v14, %v5729_v35  ;;  %2762 = vmatpush.bf16.msrb.mxu2 %v5616_v15  ;;  %v6850_v14 = vld [vmem:[#allocation5 + $0x3ec] sm:$0xf]  ;;  %v5857_v35 = vld [vmem:[#allocation5 + $0x3f8] sm:$0xf0]  ;;  %v5744_v15 = vor.u32 %v6824_v11, %v5743_v13  ;;  %v5927_v11 = vld [vmem:[#allocation7 + $0x80] sm:$0xf] }
 0x174   :  { %2763 = vmatmul.bf16.vlgmr.msrb.gmra.mxu2 %v7353_v25 }
 0x175   :  { %v1822_v24 = vpop.f32.mrf.mxu2  ;;  %2807 = vmatpush.bf16.msra.mxu2 %v5732_v21  ;;  %v1798_v29 = vpop.f32.mrf.mxu0  ;;  %v5860_v21 = vor.u32 %v6850_v14, %v5857_v35  ;;  %v6871_v14 = vld [vmem:[#allocation7 + $0x8c] sm:$0xf0] }
 0x176   :  { %v1823_v16 = vadd.f32 %v1822_v24, %v1810_v23  ;;  %v1835_v26 = vpop.f32.mrf.mxu3  ;;  %v1811_v30 = vpop.f32.mrf.mxu1  ;;  %v6842_v29 = vld [vmem:[#allocation5 + $0x3ac] sm:$0xf] }
 0x177   :  { %v6838_v30 = vld [vmem:[#allocation5 + $0x38c] sm:$0xf] }
 0x178   :  { %v1836_v32 = vadd.f32 %v1835_v26, %v1823_v16  ;;  %v5844_v16 = vor.u32 %v6846_v27, %v5841_v17  ;;  %v6867_v27 = vld [vmem:[#allocation7 + $0x6c] sm:$0xf0]  ;;  %v6103_v17 = vld [vmem:[#allocation7 + $0x1e0] sm:$0xf] }
 0x179   :  { %2808 = vmatpush.bf16.msra.mxu2 %v5716_v43  ;;  %v5825_v43 = vld [vmem:[#allocation5 + $0x3b8] sm:$0xf0] }
 0x17a   :  { %v1842_v34 = vmax.f32 %v1836_v32, 0.0  ;;  %v5812_v32 = vor.u32 %v6838_v30, %v5809_v31  ;;  %v6087_v30 = vld [vmem:[#allocation7 + $0x1c0] sm:$0xf] }
 0x17c   :  { %v7364_v42 = vpack.c.bf16 %v1842_v34, %v1842_v34  ;;  %v1978_v34 = vperm.slane %v7371_v10, 1  ;;  %v6875_v10 = vld [vmem:[#allocation7 + $0xac] sm:$0xf0] }
 0x17d   :  { %v1824_v37 = vpop.f32.mrf.mxu2  ;;  %2809 = vmatpush.bf16.msra.mxu2 %v5700_v41  ;;  %v5796_v41 = vor.u32 %v6834_v33, %v5793_v40 }
 0x17e   :  { %v1837_v47 = vpop.f32.mrf.mxu3  ;;  %2672 = vmatmul.bf16.vlgmr.msrb.gmra.mxu3 %v7364_v42 }
 0x17f   :  { %2768 = vmatpush.bf16.msrb.mxu3 %v5856_v36  ;;  %v6826_v47 = vld [vmem:[#allocation5 + $0x32c] sm:$0xf] }
 0x181   :  { %2810 = vmatpush.bf16.msra.mxu2 %v5684_v49  ;;  %v5761_v49 = vld [vmem:[#allocation5 + $0x338] sm:$0xf0] }
 0x182   :  { %v5764_v50 = vor.u32 %v6826_v47, %v5761_v49 }
 0x183   :  { %2769 = vmatpush.bf16.msrb.mxu3 %v5840_v63 }
 0x185   :  { %2811 = vmatpush.bf16.msra.mxu2 %v5668_v54  ;;  %v5748_v54 = vor.u32 %v6822_v44, %v5745_v53  ;;  %v6055_v44 = vld [vmem:[#allocation7 + $0x180] sm:$0xf] }
 0x187   :  { %2770 = vmatpush.bf16.msrb.mxu3 %v5824_v55 }
 0x189   :  { %2812 = vmatpush.bf16.msra.mxu2 %v5652_v22 }
 0x18b   :  { %2771 = vmatpush.bf16.msrb.mxu3 %v5808_v48 }
 0x18d   :  { %v2634_v5 = vpop.f32.mrf.mxu0  ;;  %2813 = vmatpush.bf16.msra.mxu2 %v5636_v2 }
 0x18e   :  { %2724 = vmatmul.bf16.vlgmr.msra.gmra.mxu3 %v7364_v42  ;;  %v2635_v23 = vadd.f32 %v2634_v5, %v1977_v60  ;;  %v5975_v5 = vld [vmem:[#allocation7 + $0xe0] sm:$0xf]  ;;  %v5928_v60 = vor.u32 %v6871_v14, %v5927_v11  ;;  %v6943_v11 = vld [vmem:[#allocation7 + $0x2cc] sm:$0xf0]  ;;  %v6873_v14 = vld [vmem:[#allocation7 + $0xa4] sm:$0xf] }
 0x18f   :  { %2772 = vmatpush.bf16.msrb.mxu3 %v5792_v3 }
 0x191   :  { %2814 = vmatpush.bf16.msra.mxu2 %v5620_v52  ;;  %v6879_v52 = vld [vmem:[#allocation7 + $0xcc] sm:$0xf0] }
 0x192   :  { %v5960_v8 = vor.u32 %v6879_v52, %v5959_v6 }
 0x193   :  { %2773 = vmatpush.bf16.msrb.mxu3 %v5776_v7 }
 0x194   :  { %2815 = vmatmul.bf16.vlgmr.msra.gmra.mxu2 %v7353_v25  ;;  %v2647_v24 = vpop.f32.mrf.mxu1  ;;  %v5828_v25 = vor.u32 %v6842_v29, %v5825_v43  ;;  %v5895_v43 = vld [vmem:[#allocation7 + $0x40] sm:$0xf] }
 0x195   :  { %v2636_v12 = vpop.f32.mrf.mxu0  ;;  %v7375_v26 = vadd.f32 %v2647_v24, %v2635_v23  ;;  %v6915_v24 = vld [vmem:[#allocation7 + $0x1ec] sm:$0xf0] }
 0x196   :  { %v5943_v12 = vld [vmem:[#allocation7 + $0xa0] sm:$0xf] }
 0x197   :  { %2774 = vmatpush.bf16.msrb.mxu3 %v5760_v9  ;;  %v5944_v13 = vor.u32 %v6875_v10, %v5943_v12  ;;  %v6895_v12 = vld [vmem:[#allocation7 + $0x14c] sm:$0xf0]  ;;  %v6215_v10 = vld [vmem:[#allocation7 + $0x2c0] sm:$0xf] }
 0x19b   :  { %2775 = vmatpush.bf16.msrb.mxu3 %v5744_v15  ;;  %v7147_v15 = vmov 8.0  }
 0x19c   :  { %v2649_v20 = vpop.f32.mrf.mxu1  ;;  %7021 = vrcp.f32 %v7147_v15  ;;  %v6216_v15 = vor.u32 %v6943_v11, %v6215_v10 }
 0x19e   :  { %2776 = vmatmul.bf16.vlgmr.msrb.gmra.mxu3 %v7364_v42 }
 0x19f   :  { %2820 = vmatpush.bf16.msra.mxu3 %v5860_v21  ;;  %v5911_v21 = vld [vmem:[#allocation7 + $0x60] sm:$0xf] }
 0x1a0   :  { %v5912_v23 = vor.u32 %v6867_v27, %v5911_v21 }
 0x1a2   :  { %v7390_v29 = vpop.eup %7021 }
 0x1a3   :  { %2821 = vmatpush.bf16.msra.mxu3 %v5844_v16  ;;  %v6104_v16 = vor.u32 %v6915_v24, %v6103_v17  ;;  %v2860_v40 = vmul.f32 8.0, %v7390_v29  ;;  %vm2864_vm0 = vweird.f32 %v7390_v29  ;;  %v6891_v24 = vld [vmem:[#allocation7 + $0x12c] sm:$0xf0] }
 0x1a5   :  { %3779 = vmatpush.bf16.msrb.mxu1 %v6104_v16  ;;  %v2861_v47 = vsub.f32 1.0, %v2860_v40  ;;  %v6199_v16 = vld [vmem:[#allocation7 + $0x2a0] sm:$0xf] }
 0x1a7   :  { %2822 = vmatpush.bf16.msra.mxu3 %v5828_v25  ;;  %v6863_v25 = vld [vmem:[#allocation7 + $0x4c] sm:$0xf0] }
 0x1a8   :  { %v5896_v20 = vor.u32 %v6863_v25, %v5895_v43  ;;  %v6939_v25 = vld [vmem:[#allocation7 + $0x2ac] sm:$0xf0] }
 0x1a9   :  { %v6200_v40 = vor.u32 %v6939_v25, %v6199_v16  ;;  %v5865_v16 = vld [vmem:[#allocation7 + $0x10] sm:$0xf0] }
 0x1ab   :  { %2823 = vmatpush.bf16.msra.mxu3 %v5812_v32  ;;  %v6911_v32 = vld [vmem:[#allocation7 + $0x1cc] sm:$0xf0] }
 0x1ac   :  { %v6088_v33 = vor.u32 %v6911_v32, %v6087_v30  ;;  %v6869_v30 = vld [vmem:[#allocation7 + $0x84] sm:$0xf] }
 0x1ad   :  { %v2686_v36 = vpop.f32.mrf.mxu0 }
 0x1ae   :  { %v2687_v58 = vadd.f32 %v2686_v36, %v1978_v34  ;;  %v2699_v37 = vpop.f32.mrf.mxu1  ;;  %3780 = vmatpush.bf16.msrb.mxu1 %v6088_v33  ;;  %v5879_v34 = vld [vmem:[#allocation7 + $0x20] sm:$0xf] }
 0x1af   :  { %2824 = vmatpush.bf16.msra.mxu3 %v5796_v41  ;;  %v6859_v41 = vld [vmem:[#allocation7 + $0x2c] sm:$0xf0]  ;;  %v6071_v36 = vld [vmem:[#allocation7 + $0x1a0] sm:$0xf] }
 0x1b0   :  { %v7379_v63 = vadd.f32 %v2699_v37, %v2687_v58  ;;  %v5880_v38 = vor.u32 %v6859_v41, %v5879_v34 }
 0x1b3   :  { %2825 = vmatpush.bf16.msra.mxu3 %v5780_v45  ;;  %v6072_v45 = vor.u32 %v6907_v39, %v6071_v36  ;;  %v6887_v39 = vld [vmem:[#allocation7 + $0x10c] sm:$0xf0] }
 0x1b5   :  { %v2688_v51 = vpop.f32.mrf.mxu0  ;;  %3781 = vmatpush.bf16.msrb.mxu1 %v6072_v45 }
 0x1b6   :  { %v2701_v55 = vpop.f32.mrf.mxu1  ;;  %v6855_v51 = vld [vmem:[#allocation7 + $0xc] sm:$0xf0] }
 0x1b7   :  { %2826 = vmatpush.bf16.msra.mxu3 %v5764_v50  ;;  %v5863_v50 = vld [vmem:[#allocation7] sm:$0xf]  ;;  %v6903_v55 = vld [vmem:[#allocation7 + $0x18c] sm:$0xf0] }
 0x1bb   :  { %2827 = vmatpush.bf16.msra.mxu3 %v5748_v54  ;;  %v5864_v54 = vor.u32 %v6855_v51, %v5863_v50  ;;  %v5913_v50 = vld [vmem:[#allocation7 + $0x70] sm:$0xf0] }
 0x1be   :  { %2828 = vmatmul.bf16.vlgmr.msra.gmra.mxu3 %v7364_v42  ;;  %v6883_v42 = vld [vmem:[#allocation7 + $0xec] sm:$0xf0] }
 0x1bf   :  { %v5976_v59 = vor.u32 %v6883_v42, %v5975_v5  ;;  %v5961_v5 = vld [vmem:[#allocation7 + $0xd0] sm:$0xf0] }
 0x1c1   :  { %3766 = vmatpush.bf16.msrb.mxu0 %v5976_v59 }
 0x1c5   :  { %3767 = vmatpush.bf16.msrb.mxu0 %v5960_v8 }
 0x1c9   :  { %3768 = vmatpush.bf16.msrb.mxu0 %v5944_v13 }
 0x1cd   :  { %v2738_v57 = vpop.f32.mrf.mxu0  ;;  %3769 = vmatpush.bf16.msrb.mxu0 %v5928_v60 }
 0x1ce   :  { %v2739_v46 = vadd.f32 %v2738_v57, %v1979_v56  ;;  %v2751_v61 = vpop.f32.mrf.mxu1  ;;  %v6881_v56 = vld [vmem:[#allocation7 + $0xe4] sm:$0xf]  ;;  %v5977_v57 = vld [vmem:[#allocation7 + $0xf0] sm:$0xf0] }
 0x1d0   :  { %v7383_v22 = vadd.f32 %v2751_v61, %v2739_v46  ;;  %v6056_v61 = vor.u32 %v6903_v55, %v6055_v44  ;;  %v6913_v44 = vld [vmem:[#allocation7 + $0x1e4] sm:$0xf] }
 0x1d1   :  { %3770 = vmatpush.bf16.msrb.mxu0 %v5912_v23  ;;  %v6007_v23 = vld [vmem:[#allocation7 + $0x120] sm:$0xf] }
 0x1d2   :  { %3782 = vmatpush.bf16.msrb.mxu1 %v6056_v61  ;;  %v6008_v43 = vor.u32 %v6891_v24, %v6007_v23  ;;  %v6853_v24 = vld [vmem:[#allocation7 + $0x4] sm:$0xf] }
 0x1d5   :  { %v2740_v48 = vpop.f32.mrf.mxu0  ;;  %3771 = vmatpush.bf16.msrb.mxu0 %v5896_v20  ;;  %v5929_v20 = vld [vmem:[#allocation7 + $0x90] sm:$0xf0] }
 0x1d6   :  { %v2753_v18 = vpop.f32.mrf.mxu1  ;;  %v5980_v48 = vor.u32 %v6881_v56, %v5977_v57  ;;  %v5932_v34 = vor.u32 %v6869_v30, %v5929_v20  ;;  %v6167_v57 = vld [vmem:[#allocation7 + $0x260] sm:$0xf] }
 0x1d7   :  { %v2660_v19 = vpop.f32.mrf.mxu2  ;;  %v2862_v18 = vmul.f32 %v7390_v29, %v2861_v47  ;;  %v6865_v47 = vld [vmem:[#allocation7 + $0x64] sm:$0xf] }
 0x1d8   :  { %v2661_v58 = vadd.f32 %v2660_v19, %v7375_v26  ;;  %v6039_v19 = vld [vmem:[#allocation7 + $0x160] sm:$0xf] }
 0x1d9   :  { %3772 = vmatpush.bf16.msrb.mxu0 %v5880_v38  ;;  %v2863_v52 = vadd.f32 %v7390_v29, %v2862_v18  ;;  %v5991_v38 = vld [vmem:[#allocation7 + $0x100] sm:$0xf]  ;;  %v5897_v18 = vld [vmem:[#allocation7 + $0x50] sm:$0xf0] }
 0x1da   :  { %v5992_v45 = vor.u32 %v6887_v39, %v5991_v38 }
 0x1db   :  { %v7400_v27 = vsel %vm2864_vm0, %v7390_v29, %v2863_v52  ;;  %v6927_v52 = vld [vmem:[#allocation7 + $0x24c] sm:$0xf0] }
 0x1dd   :  { %3773 = vmatpush.bf16.msrb.mxu0 %v5864_v54 }
 0x1df   :  { %v2662_v2 = vpop.f32.mrf.mxu2 }
 0x1e1   :  { %3818 = vmatpush.bf16.msra.mxu0 %v5980_v48  ;;  %v6861_v48 = vld [vmem:[#allocation7 + $0x44] sm:$0xf] }
 0x1e7   :  { %v7388_v62 = vpop.f32.mrf.mxu2 }
 0x1e8   :  { %v2713_v32 = vadd.f32 %v7388_v62, %v7379_v63 }
 0x1ed   :  { %v2790_v1 = vpop.f32.mrf.mxu0 }
 0x1ee   :  { %v2791_v3 = vadd.f32 %v2790_v1, %v1980_v0  ;;  %v2803_v28 = vpop.f32.mrf.mxu1  ;;  %v6899_v0 = vld [vmem:[#allocation7 + $0x16c] sm:$0xf0]  ;;  %v6231_v1 = vld [vmem:[#allocation7 + $0x2e0] sm:$0xf] }
 0x1ef   :  { %v2714_v35 = vpop.f32.mrf.mxu2  ;;  %v6040_v2 = vor.u32 %v6899_v0, %v6039_v19 }
 0x1f0   :  { %v7386_v4 = vadd.f32 %v2803_v28, %v2791_v3  ;;  %v6947_v3 = vld [vmem:[#allocation7 + $0x2ec] sm:$0xf0]  ;;  %v6877_v28 = vld [vmem:[#allocation7 + $0xc4] sm:$0xf]  ;;  %v5945_v35 = vld [vmem:[#allocation7 + $0xb0] sm:$0xf0] }
 0x1f1   :  { %v6232_v59 = vor.u32 %v6947_v3, %v6231_v1  ;;  %v5964_v6 = vor.u32 %v6877_v28, %v5961_v5  ;;  %3783 = vmatpush.bf16.msrb.mxu1 %v6040_v2  ;;  %v5948_v21 = vor.u32 %v6873_v14, %v5945_v35  ;;  %v5900_v2 = vor.u32 %v6861_v48, %v5897_v18  ;;  %v6089_v3 = vld [vmem:[#allocation7 + $0x1d0] sm:$0xf0]  ;;  %v6893_v18 = vld [vmem:[#allocation7 + $0x144] sm:$0xf] }
 0x1f2   :  { %v6073_v14 = vld [vmem:[#allocation7 + $0x1b0] sm:$0xf0] }
 0x1f3   :  { %3792 = vmatpush.bf16.msrb.mxu2 %v6232_v59  ;;  %3819 = vmatpush.bf16.msra.mxu0 %v5964_v6  ;;  %v6151_v6 = vld [vmem:[#allocation7 + $0x240] sm:$0xf] }
 0x1f5   :  { %v2792_v7 = vpop.f32.mrf.mxu0 }
 0x1f6   :  { %v2805_v9 = vpop.f32.mrf.mxu1 }
 0x1f7   :  { %v7392_v31 = vpop.f32.mrf.mxu2  ;;  %v6023_v9 = vld [vmem:[#allocation7 + $0x140] sm:$0xf]  ;;  %3793 = vmatpush.bf16.msrb.mxu2 %v6216_v15  ;;  %3820 = vmatpush.bf16.msra.mxu0 %v5948_v21 }
 0x1f8   :  { %v6024_v13 = vor.u32 %v6895_v12, %v6023_v9  ;;  %v5881_v9 = vld [vmem:[#allocation7 + $0x30] sm:$0xf0]  ;;  %v6905_v12 = vld [vmem:[#allocation7 + $0x1a4] sm:$0xf]  ;;  %v6135_v21 = vld [vmem:[#allocation7 + $0x220] sm:$0xf]  ;;  %v2765_v25 = vadd.f32 %v7392_v31, %v7383_v22 }
 0x1f9   :  { %v6076_v35 = vor.u32 %v6905_v12, %v6073_v14  ;;  %v6979_v31 = vld [vmem:[#allocation7 + $0x3ec] sm:$0xf0]  ;;  %v6009_v12 = vld [vmem:[#allocation7 + $0x130] sm:$0xf0] }
 0x1fa   :  { %3784 = vmatpush.bf16.msrb.mxu1 %v6024_v13 }
 0x1fb   :  { %3794 = vmatpush.bf16.msrb.mxu2 %v6200_v40  ;;  %3821 = vmatpush.bf16.msra.mxu0 %v5932_v34  ;;  %v6057_v40 = vld [vmem:[#allocation7 + $0x190] sm:$0xf0] }
 0x1fe   :  { %3785 = vmatpush.bf16.msrb.mxu1 %v6008_v43  ;;  %v6901_v43 = vld [vmem:[#allocation7 + $0x184] sm:$0xf] }
 0x1ff   :  { %v2766_v53 = vpop.f32.mrf.mxu2 }
 0x200   :  { %v6105_v53 = vld [vmem:[#allocation7 + $0x1f0] sm:$0xf0] }
 0x201   :  { %v2673_v37 = vpop.f32.mrf.mxu3  ;;  %v6108_v54 = vor.u32 %v6913_v44, %v6105_v53  ;;  %v6945_v44 = vld [vmem:[#allocation7 + $0x2e4] sm:$0xf] }
 0x202   :  { %v2674_v49 = vadd.f32 %v2673_v37, %v2661_v58  ;;  %v6183_v58 = vld [vmem:[#allocation7 + $0x280] sm:$0xf]  ;;  %v6935_v37 = vld [vmem:[#allocation7 + $0x28c] sm:$0xf0]  ;;  %3786 = vmatpush.bf16.msrb.mxu1 %v5992_v45 }
 0x203   :  { %v6184_v51 = vor.u32 %v6935_v37, %v6183_v58  ;;  %v6119_v45 = vld [vmem:[#allocation7 + $0x200] sm:$0xf]  ;;  %v6919_v37 = vld [vmem:[#allocation7 + $0x20c] sm:$0xf0] }
 0x204   :  { %v2835_v46 = vrot.slane %v2674_v49, 4  ;;  %v6120_v22 = vor.u32 %v6919_v37, %v6119_v45  ;;  %v7436_v37 = vld [vmem:[%s7698_s5] sm:$0xf] }
 0x205   :  { %3795 = vmatpush.bf16.msrb.mxu2 %v6184_v51 }
 0x206   :  { %v2836_v26 = vadd.f32 %v2835_v46, %v2674_v49  ;;  %v6931_v46 = vld [vmem:[#allocation7 + $0x26c] sm:$0xf0]  ;;  %3831 = vmatpush.bf16.msra.mxu1 %v6108_v54  ;;  %v6233_v54 = vld [vmem:[#allocation7 + $0x2f0] sm:$0xf0] }
 0x207   :  { %v6168_v61 = vor.u32 %v6931_v46, %v6167_v57  ;;  %v6343_v57 = vld [vmem:[#allocation7 + $0x3c0] sm:$0xf]  ;;  %v6975_v46 = vld [vmem:[#allocation7 + $0x3cc] sm:$0xf0] }
 0x208   :  { %v2837_v42 = vrot.slane %v2836_v26, 2  ;;  %v6344_v48 = vor.u32 %v6975_v46, %v6343_v57  ;;  %v6279_v46 = vld [vmem:[#allocation7 + $0x340] sm:$0xf] }
 0x209   :  { %v2675_v7 = vpop.f32.mrf.mxu3  ;;  %3796 = vmatpush.bf16.msrb.mxu2 %v6168_v61  ;;  %v6236_v61 = vor.u32 %v6945_v44, %v6233_v54 }
 0x20a   :  { %v2838_v8 = vadd.f32 %v2837_v42, %v2836_v26  ;;  %v6909_v26 = vld [vmem:[#allocation7 + $0x1c4] sm:$0xf]  ;;  %v6152_v7 = vor.u32 %v6927_v52, %v6151_v6  ;;  %v6327_v52 = vld [vmem:[#allocation7 + $0x3a0] sm:$0xf] }
 0x20b   :  { %v6092_v5 = vor.u32 %v6909_v26, %v6089_v3  ;;  %v6025_v26 = vld [vmem:[#allocation7 + $0x150] sm:$0xf0] }
 0x20c   :  { %v2839_v60 = vrot.slane %v2838_v8, 1  ;;  %v6028_v3 = vor.u32 %v6893_v18, %v6025_v26  ;;  %v6925_v26 = vld [vmem:[#allocation7 + $0x244] sm:$0xf] }
 0x20d   :  { %3832 = vmatpush.bf16.msra.mxu1 %v6092_v5  ;;  %3797 = vmatpush.bf16.msrb.mxu2 %v6152_v7  ;;  %v6971_v7 = vld [vmem:[#allocation7 + $0x3ac] sm:$0xf0] }
 0x20e   :  { %v2840_v17 = vadd.f32 %v2839_v60, %v2838_v8  ;;  %v6857_v8 = vld [vmem:[#allocation7 + $0x24] sm:$0xf] }
 0x20f   :  { %v5884_v11 = vor.u32 %v6857_v8, %v5881_v9  ;;  %v6328_v8 = vor.u32 %v6971_v7, %v6327_v52  ;;  %v6889_v9 = vld [vmem:[#allocation7 + $0x124] sm:$0xf]  ;;  %v6137_v7 = vld [vmem:[#allocation7 + $0x230] sm:$0xf0] }
 0x210   :  { %v2866_v33 = vmul.f32 %v7400_v27, %v2840_v17  ;;  %v6923_v17 = vld [vmem:[#allocation7 + $0x22c] sm:$0xf0]  ;;  %v6921_v52 = vld [vmem:[#allocation7 + $0x224] sm:$0xf] }
 0x211   :  { %v2725_v29 = vpop.f32.mrf.mxu3  ;;  %3833 = vmatpush.bf16.msra.mxu1 %v6076_v35  ;;  %v6136_v23 = vor.u32 %v6923_v17, %v6135_v21  ;;  %v6012_v35 = vor.u32 %v6889_v9, %v6009_v12 }
 0x212   :  { %v7405_v41 = vsub.f32 %v2674_v49, %v2866_v33  ;;  %v7407_v36 = vadd.f32 %v2725_v29, %v2713_v32  ;;  %v5916_v49 = vor.u32 %v6865_v47, %v5913_v50  ;;  %v5868_v33 = vor.u32 %v6853_v24, %v5865_v16  ;;  %v6359_v47 = vld [vmem:[#allocation7 + $0x3e0] sm:$0xf]  ;;  %v6897_v50 = vld [vmem:[#allocation7 + $0x164] sm:$0xf]  ;;  %v6967_v16 = vld [vmem:[#allocation7 + $0x38c] sm:$0xf0] }
 0x213   :  { %v6060_v29 = vor.u32 %v6901_v43, %v6057_v40  ;;  %3798 = vmatpush.bf16.msrb.mxu2 %v6136_v23  ;;  %v6311_v24 = vld [vmem:[#allocation7 + $0x380] sm:$0xf] }
 0x214   :  { %v2874_v63 = vmul.f32 %v7405_v41, %v7405_v41  ;;  %v2841_v62 = vrot.slane %v7407_v36, 4  ;;  %3822 = vmatpush.bf16.msra.mxu0 %v5916_v49  ;;  %v6360_v49 = vor.u32 %v6979_v31, %v6359_v47  ;;  %v6295_v31 = vld [vmem:[#allocation7 + $0x360] sm:$0xf] }
 0x215   :  { %3834 = vmatpush.bf16.msra.mxu1 %v6060_v29  ;;  %v6185_v29 = vld [vmem:[#allocation7 + $0x290] sm:$0xf0] }
 0x216   :  { %v2878_v55 = vrot.slane %v2874_v63, 4  ;;  %v2842_v56 = vadd.f32 %v2841_v62, %v7407_v36  ;;  %3805 = vmatpush.bf16.msrb.mxu3 %v6360_v49  ;;  %v6169_v49 = vld [vmem:[#allocation7 + $0x270] sm:$0xf0] }
 0x217   :  { %v7413_v1 = vpop.f32.mrf.mxu2  ;;  %3799 = vmatpush.bf16.msrb.mxu2 %v6120_v22 }
 0x218   :  { %v2879_v19 = vadd.f32 %v2878_v55, %v2874_v63  ;;  %v2843_v0 = vrot.slane %v2842_v56, 2  ;;  %3823 = vmatpush.bf16.msra.mxu0 %v5900_v2  ;;  %v6041_v63 = vld [vmem:[#allocation7 + $0x170] sm:$0xf0] }
 0x219   :  { %v2727_v28 = vpop.f32.mrf.mxu3  ;;  %v6044_v53 = vor.u32 %v6897_v50, %v6041_v63  ;;  %v6963_v50 = vld [vmem:[#allocation7 + $0x36c] sm:$0xf0] }
 0x21a   :  { %v2880_v42 = vrot.slane %v2879_v19, 2  ;;  %v2844_v59 = vadd.f32 %v2843_v0, %v2842_v56  ;;  %v6217_v28 = vld [vmem:[#allocation7 + $0x2d0] sm:$0xf0]  ;;  %3806 = vmatpush.bf16.msrb.mxu3 %v6344_v48 }
 0x21b   :  { %3835 = vmatpush.bf16.msra.mxu1 %v6044_v53  ;;  %3844 = vmatpush.bf16.msra.mxu2 %v6236_v61  ;;  %v6959_v61 = vld [vmem:[#allocation7 + $0x34c] sm:$0xf0] }
 0x21c   :  { %v2881_v10 = vadd.f32 %v2880_v42, %v2879_v19  ;;  %v2845_v13 = vrot.slane %v2844_v59, 1  ;;  %3824 = vmatpush.bf16.msra.mxu0 %v5884_v11  ;;  %v6941_v19 = vld [vmem:[#allocation7 + $0x2c4] sm:$0xf]  ;;  %v6280_v18 = vor.u32 %v6959_v61, %v6279_v46  ;;  %v2956_v46 = vperm.slane %v7436_v37, 1 }
 0x21d   :  { %v6220_v42 = vor.u32 %v6941_v19, %v6217_v28 }
 0x21e   :  { %v2882_v60 = vrot.slane %v2881_v10, 1  ;;  %v2846_v15 = vadd.f32 %v2845_v13, %v2844_v59  ;;  %3807 = vmatpush.bf16.msrb.mxu3 %v6328_v8 }
 0x21f   :  { %v2818_v32 = vpop.f32.mrf.mxu2  ;;  %3836 = vmatpush.bf16.msra.mxu1 %v6028_v3  ;;  %3845 = vmatpush.bf16.msra.mxu2 %v6220_v42  ;;  %v6263_v42 = vld [vmem:[#allocation7 + $0x320] sm:$0xf] }
 0x220   :  { %v2883_v30 = vadd.f32 %v2882_v60, %v2881_v10  ;;  %v2867_v20 = vmul.f32 %v7400_v27, %v2846_v15  ;;  %3825 = vmatpush.bf16.msra.mxu0 %v5868_v33  ;;  %v6937_v10 = vld [vmem:[#allocation7 + $0x2a4] sm:$0xf]  ;;  %v6201_v60 = vld [vmem:[#allocation7 + $0x2b0] sm:$0xf0] }
 0x221   :  { %v2777_v34 = vpop.f32.mrf.mxu3  ;;  %v6204_v21 = vor.u32 %v6937_v10, %v6201_v60  ;;  %v6933_v32 = vld [vmem:[#allocation7 + $0x284] sm:$0xf]  ;;  %v5983_v10 = vld [vmem:[#allocation7 + $0xe8] sm:$0xf] }
 0x222   :  { %v2902_v38 = vmul.f32 %v2883_v30, %v7400_v27  ;;  %v7420_v39 = vsub.f32 %v7407_v36, %v2867_v20  ;;  %v7422_v58 = vadd.f32 %v2777_v34, %v2765_v25  ;;  %v6312_v25 = vor.u32 %v6967_v16, %v6311_v24  ;;  %v6885_v30 = vld [vmem:[#allocation7 + $0x104] sm:$0xf]  ;;  %v5993_v20 = vld [vmem:[#allocation7 + $0x110] sm:$0xf0] }
 0x223   :  { %3837 = vmatpush.bf16.msra.mxu1 %v6012_v35  ;;  %v5996_v34 = vor.u32 %v6885_v30, %v5993_v20  ;;  %3846 = vmatpush.bf16.msra.mxu2 %v6204_v21  ;;  %v6188_v45 = vor.u32 %v6933_v32, %v6185_v29  ;;  %v6247_v21 = vld [vmem:[#allocation7 + $0x300] sm:$0xf]  ;;  %v6121_v30 = vld [vmem:[#allocation7 + $0x210] sm:$0xf0]  ;;  %v6977_v20 = vld [vmem:[#allocation7 + $0x3e4] sm:$0xf] }
 0x224   :  { %v7424_v62 = vadd.f32 1e-05, %v2902_v38  ;;  %v2875_v51 = vmul.f32 %v7420_v39, %v7420_v39  ;;  %v2847_v36 = vrot.slane %v7422_v58, 4  ;;  %3808 = vmatpush.bf16.msrb.mxu3 %v6312_v25  ;;  %v6917_v25 = vld [vmem:[#allocation7 + $0x204] sm:$0xf] }
 0x226   :  { %7023 = vrsqrt.f32 %v7424_v62  ;;  %v2884_v55 = vrot.slane %v2875_v51, 4  ;;  %v2848_v56 = vadd.f32 %v2847_v36, %v7422_v58  ;;  %v6929_v36 = vld [vmem:[#allocation7 + $0x264] sm:$0xf]  ;;  %vm2916_vm2 = vweird.f32 %v7424_v62 }
 0x227   :  { %3838 = vmatpush.bf16.msra.mxu1 %v5996_v34  ;;  %3847 = vmatpush.bf16.msra.mxu2 %v6188_v45 }
 0x228   :  { %v2885_v0 = vadd.f32 %v2884_v55, %v2875_v51  ;;  %v2849_v2 = vrot.slane %v2848_v56, 2  ;;  %v6296_v51 = vor.u32 %v6963_v50, %v6295_v31  ;;  %v6172_v55 = vor.u32 %v6929_v36, %v6169_v49  ;;  %v6876_v36 = vld [vmem:[#allocation7 + $0xb4] sm:$0xf0] }
 0x229   :  { %v2779_v5 = vpop.f32.mrf.mxu3 }
 0x22a   :  { %v2886_v59 = vrot.slane %v2885_v0, 2  ;;  %v2850_v6 = vadd.f32 %v2849_v2, %v2848_v56  ;;  %v2955_v56 = vperm.slane %v7436_v37, 0  ;;  %3809 = vmatpush.bf16.msrb.mxu3 %v6296_v51  ;;  %v5951_v51 = vld [vmem:[#allocation7 + $0xa8] sm:$0xf] }
 0x22b   :  { %3848 = vmatpush.bf16.msra.mxu2 %v6172_v55 }
 0x22c   :  { %v7024_v13 = vpop.eup %7023  ;;  %v2887_v11 = vadd.f32 %v2886_v59, %v2885_v0  ;;  %v2851_v14 = vrot.slane %v2850_v6, 1  ;;  %v6955_v59 = vld [vmem:[#allocation7 + $0x32c] sm:$0xf0] }
 0x22d   :  { %v2911_v15 = vmul.f32 %v7024_v13, %v7424_v62  ;;  %vm2917_vm1 = vweird.f32 %v7024_v13  ;;  %v6153_v62 = vld [vmem:[#allocation7 + $0x250] sm:$0xf0] }
 0x22e   :  { %v2888_v17 = vrot.slane %v2887_v11, 1  ;;  %v2852_v23 = vadd.f32 %v2851_v14, %v2850_v6  ;;  %vm2918_vm3 = vmor %vm2916_vm2, %vm2917_vm1  ;;  %v6156_v3 = vor.u32 %v6925_v26, %v6153_v62  ;;  %3810 = vmatpush.bf16.msrb.mxu3 %v6280_v18  ;;  %v6264_v6 = vor.u32 %v6955_v59, %v6263_v42  ;;  %v5935_v62 = vld [vmem:[#allocation7 + $0x88] sm:$0xf] }
 0x22f   :  { %v2912_v43 = vmul.f32 %v7024_v13, %v2911_v15  ;;  %v6140_v14 = vor.u32 %v6921_v52, %v6137_v7  ;;  %v5952_v26 = vor.u32 %v6876_v36, %v5951_v51  ;;  %v5919_v52 = vld [vmem:[#allocation7 + $0x68] sm:$0xf]  ;;  %v6868_v7 = vld [vmem:[#allocation7 + $0x74] sm:$0xf0]  ;;  %v6281_v51 = vld [vmem:[#allocation7 + $0x350] sm:$0xf0] }
 0x230   :  { %v2889_v33 = vadd.f32 %v2888_v17, %v2887_v11  ;;  %v2868_v40 = vmul.f32 %v7400_v27, %v2852_v23  ;;  %v2817_v11 = vadd.f32 %v7413_v1, %v7386_v4  ;;  %3849 = vmatpush.bf16.msra.mxu2 %v6156_v3  ;;  %v6951_v17 = vld [vmem:[#allocation7 + $0x30c] sm:$0xf0]  ;;  %v5967_v4 = vld [vmem:[#allocation7 + $0xc8] sm:$0xf]  ;;  %v6880_v1 = vld [vmem:[#allocation7 + $0xd4] sm:$0xf0] }
 0x231   :  { %v2913_v38 = vmul.f32 0.5, %v2912_v43  ;;  %v6248_v43 = vor.u32 %v6951_v17, %v6247_v21  ;;  %v6329_v3 = vld [vmem:[#allocation7 + $0x3b0] sm:$0xf0] }
 0x232   :  { %v2903_v47 = vmul.f32 %v2889_v33, %v7400_v27  ;;  %v7440_v22 = vsub.f32 %v7422_v58, %v2868_v40  ;;  %v7450_v58 = vld [vmem:[%s7699_s6] sm:$0xf]  ;;  %3811 = vmatpush.bf16.msrb.mxu3 %v6264_v6  ;;  %v6361_v40 = vld [vmem:[#allocation7 + $0x3f0] sm:$0xf0] }
 0x233   :  { %v2914_v63 = vsub.f32 1.5, %v2913_v38  ;;  %v2968_v2 = vperm.slane %v7450_v58, 0  ;;  %v6124_v38 = vor.u32 %v6917_v25, %v6121_v30  ;;  %v6364_v45 = vor.u32 %v6977_v20, %v6361_v40  ;;  %v6912_v30 = vld [vmem:[#allocation7 + $0x1d4] sm:$0xf0]  ;;  %v6961_v20 = vld [vmem:[#allocation7 + $0x364] sm:$0xf] }
 0x234   :  { %v7442_v44 = vadd.f32 1e-05, %v2903_v47  ;;  %v2876_v53 = vmul.f32 %v7440_v22, %v7440_v22  ;;  %3850 = vmatpush.bf16.msra.mxu2 %v6140_v14 }
 0x235   :  { %v2915_v54 = vmul.f32 %v7024_v13, %v2914_v63  ;;  %v5968_v63 = vor.u32 %v6880_v1, %v5967_v4 }
 0x236   :  { %7025 = vrsqrt.f32 %v7442_v44  ;;  %v2890_v57 = vrot.slane %v2876_v53, 4  ;;  %3812 = vmatpush.bf16.msrb.mxu3 %v6248_v43  ;;  %vm2926_vm5 = vweird.f32 %v7442_v44  ;;  %v6095_v43 = vld [vmem:[#allocation7 + $0x1c8] sm:$0xf] }
 0x237   :  { %v2919_v48 = vsel %vm2918_vm3, %v7024_v13, %v2915_v54  ;;  %v6884_v13 = vld [vmem:[#allocation7 + $0xf4] sm:$0xf0]  ;;  %v6345_v54 = vld [vmem:[#allocation7 + $0x3d0] sm:$0xf0] }
 0x238   :  { %v2950_v19 = vmul.f32 %v2919_v48, %v7405_v41  ;;  %v2891_v0 = vadd.f32 %v2890_v57, %v2876_v53  ;;  %v5984_v16 = vor.u32 %v6884_v13, %v5983_v10  ;;  %v6973_v53 = vld [vmem:[#allocation7 + $0x3c4] sm:$0xf]  ;;  %3851 = vmatpush.bf16.msra.mxu2 %v6124_v38  ;;  %v6916_v10 = vld [vmem:[#allocation7 + $0x1f4] sm:$0xf0] }
 0x239   :  { %v6348_v57 = vor.u32 %v6973_v53, %v6345_v54  ;;  %v6965_v13 = vld [vmem:[#allocation7 + $0x384] sm:$0xf] }
 0x23a   :  { %v2963_v28 = vmul.f32 %v2955_v56, %v2950_v19  ;;  %v2892_v5 = vrot.slane %v2891_v0, 2  ;;  %3857 = vmatpush.bf16.msra.mxu3 %v6364_v45  ;;  %v2969_v19 = vperm.slane %v7450_v58, 1  ;;  %v6096_v45 = vor.u32 %v6912_v30, %v6095_v43 }
 0x23c   :  { %v7456_v8 = vpop.eup %7025  ;;  %v2893_v9 = vadd.f32 %v2892_v5, %v2891_v0  ;;  %v2976_v12 = vadd.f32 %v2968_v2, %v2963_v28  ;;  %v6872_v0 = vld [vmem:[#allocation7 + $0x94] sm:$0xf0]  ;;  %v6969_v2 = vld [vmem:[#allocation7 + $0x3a4] sm:$0xf] }
 0x23d   :  { %v2921_v41 = vmul.f32 %v7456_v8, %v7442_v44  ;;  %vm2927_vm4 = vweird.f32 %v7456_v8  ;;  %v6332_v5 = vor.u32 %v6969_v2, %v6329_v3  ;;  %v5936_v6 = vor.u32 %v6872_v0, %v5935_v62  ;;  %v6265_v0 = vld [vmem:[#allocation7 + $0x330] sm:$0xf0]  ;;  %v6882_v3 = vld [vmem:[#allocation7 + $0xec] sm:$0xf] }
 0x23e   :  { %v2894_v35 = vrot.slane %v2893_v9, 1  ;;  %v2980_v15 = vmax.f32 %v2976_v12, 0.0  ;;  %vm2928_vm6 = vmor %vm2926_vm5, %vm2927_vm4  ;;  %3858 = vmatpush.bf16.msra.mxu3 %v6348_v57  ;;  %v5871_v57 = vld [vmem:[#allocation7 + $0x8] sm:$0xf]  ;;  %v2970_v62 = vperm.slane %v7450_v58, 2 }
 0x23f   :  { %v2922_v23 = vmul.f32 %v7456_v8, %v2921_v41  ;;  %v6313_v41 = vld [vmem:[#allocation7 + $0x390] sm:$0xf0] }
 0x240   :  { %v2895_v32 = vadd.f32 %v2894_v35, %v2893_v9  ;;  %v7465_v33 = vpack.c.bf16 %v2980_v15, %v2980_v15  ;;  %v6316_v14 = vor.u32 %v6965_v13, %v6313_v41  ;;  %v6249_v13 = vld [vmem:[#allocation7 + $0x310] sm:$0xf0] }
 0x241   :  { %v2829_v60 = vpop.f32.mrf.mxu3  ;;  %v2923_v34 = vmul.f32 0.5, %v2922_v23  ;;  %v5903_v23 = vld [vmem:[#allocation7 + $0x48] sm:$0xf] }
 0x242   :  { %v7463_v24 = vadd.f32 %v2829_v60, %v2817_v11  ;;  %v2904_v47 = vmul.f32 %v2895_v32, %v7400_v27  ;;  %3774 = vmatmul.bf16.vlgmr.msrb.gmra.mxu0 %v7465_v33  ;;  %3859 = vmatpush.bf16.msra.mxu3 %v6332_v5  ;;  %v5920_v60 = vor.u32 %v6868_v7, %v5919_v52  ;;  %v6297_v32 = vld [vmem:[#allocation7 + $0x370] sm:$0xf0]  ;;  %v6047_v7 = vld [vmem:[#allocation7 + $0x168] sm:$0xf] }
 0x243   :  { %v2924_v31 = vsub.f32 1.5, %v2923_v34  ;;  %3870 = vmatpush.bf16.msrb.mxu0 %v5984_v16  ;;  %v6864_v16 = vld [vmem:[#allocation7 + $0x54] sm:$0xf0]  ;;  %v6300_v40 = vor.u32 %v6961_v20, %v6297_v32  ;;  %v5887_v34 = vld [vmem:[#allocation7 + $0x28] sm:$0xf] }
 0x244   :  { %v2853_v29 = vrot.slane %v7463_v24, 4  ;;  %v7472_v49 = vadd.f32 1e-05, %v2904_v47  ;;  %v6860_v47 = vld [vmem:[#allocation7 + $0x34] sm:$0xf0] }
 0x245   :  { %v2925_v55 = vmul.f32 %v7456_v8, %v2924_v31  ;;  %v6079_v31 = vld [vmem:[#allocation7 + $0x1a8] sm:$0xf]  ;;  %v6896_v20 = vld [vmem:[#allocation7 + $0x154] sm:$0xf0] }
 0x246   :  { %v2854_v50 = vadd.f32 %v2853_v29, %v7463_v24  ;;  %7027 = vrsqrt.f32 %v7472_v49  ;;  %3860 = vmatpush.bf16.msra.mxu3 %v6316_v14  ;;  %vm2936_vm8 = vweird.f32 %v7472_v49  ;;  %v5969_v14 = vld [vmem:[#allocation7 + $0xd8] sm:$0xf0]  ;;  %v6223_v32 = vld [vmem:[#allocation7 + $0x2c8] sm:$0xf] }
 0x247   :  { %v2929_v48 = vsel %vm2928_vm6, %v7456_v8, %v2925_v55  ;;  %3871 = vmatpush.bf16.msrb.mxu0 %v5968_v63  ;;  %v6111_v8 = vld [vmem:[#allocation7 + $0x1e8] sm:$0xf]  ;;  %v6957_v63 = vld [vmem:[#allocation7 + $0x344] sm:$0xf]  ;;  %v2957_v55 = vperm.slane %v7436_v37, 2 }
 0x248   :  { %v2855_v56 = vrot.slane %v2854_v50, 2  ;;  %v2951_v44 = vmul.f32 %v2929_v48, %v7420_v39  ;;  %v6112_v17 = vor.u32 %v6916_v10, %v6111_v8  ;;  %v6284_v54 = vor.u32 %v6957_v63, %v6281_v51  ;;  %v6900_v8 = vld [vmem:[#allocation7 + $0x174] sm:$0xf0]  ;;  %v6239_v10 = vld [vmem:[#allocation7 + $0x2e8] sm:$0xf] }
 0x249   :  { %v2831_v61 = vpop.f32.mrf.mxu3  ;;  %v6870_v63 = vld [vmem:[#allocation7 + $0x8c] sm:$0xf]  ;;  %v5937_v51 = vld [vmem:[#allocation7 + $0x98] sm:$0xf0] }
 0x24a   :  { %v2856_v18 = vadd.f32 %v2855_v56, %v2854_v50  ;;  %v2964_v42 = vmul.f32 %v2956_v46, %v2951_v44  ;;  %v6908_v50 = vld [vmem:[#allocation7 + $0x1b4] sm:$0xf0]  ;;  %3861 = vmatpush.bf16.msra.mxu3 %v6300_v40  ;;  %v5888_v56 = vor.u32 %v6860_v47, %v5887_v34  ;;  %v6953_v44 = vld [vmem:[#allocation7 + $0x324] sm:$0xf]  ;;  %v6874_v40 = vld [vmem:[#allocation7 + $0xac] sm:$0xf] }
 0x24b   :  { %3872 = vmatpush.bf16.msrb.mxu0 %v5952_v26  ;;  %v6080_v48 = vor.u32 %v6908_v50, %v6079_v31  ;;  %v6063_v26 = vld [vmem:[#allocation7 + $0x188] sm:$0xf]  ;;  %v6268_v5 = vor.u32 %v6953_v44, %v6265_v0  ;;  %v6892_v47 = vld [vmem:[#allocation7 + $0x134] sm:$0xf0] }
 0x24c   :  { %v2857_v28 = vrot.slane %v2856_v18, 1  ;;  %v7028_v9 = vpop.eup %7027  ;;  %v2977_v12 = vadd.f32 %v2969_v19, %v2964_v42  ;;  %v6207_v31 = vld [vmem:[#allocation7 + $0x2a8] sm:$0xf]  ;;  %v6940_v50 = vld [vmem:[#allocation7 + $0x2b4] sm:$0xf0] }
 0x24d   :  { %v2931_v39 = vmul.f32 %v7028_v9, %v7472_v49  ;;  %vm2937_vm7 = vweird.f32 %v7028_v9  ;;  %v6904_v49 = vld [vmem:[#allocation7 + $0x194] sm:$0xf0] }
 0x24e   :  { %v2858_v59 = vadd.f32 %v2857_v28, %v2856_v18  ;;  %v2981_v35 = vmax.f32 %v2977_v12, 0.0  ;;  %vm2938_vm9 = vmor %vm2936_vm8, %vm2937_vm7  ;;  %v6856_v18 = vld [vmem:[#allocation7 + $0x14] sm:$0xf0]  ;;  %3862 = vmatpush.bf16.msra.mxu3 %v6284_v54  ;;  %v5985_v28 = vld [vmem:[#allocation7 + $0xf8] sm:$0xf0]  ;;  %v6064_v52 = vor.u32 %v6904_v49, %v6063_v26  ;;  %v5940_v54 = vor.u32 %v6870_v63, %v5937_v51 }
 0x24f   :  { %v2932_v15 = vmul.f32 %v7028_v9, %v2931_v39  ;;  %3873 = vmatpush.bf16.msrb.mxu0 %v5936_v6  ;;  %v5872_v6 = vor.u32 %v6856_v18, %v5871_v57  ;;  %v6948_v39 = vld [vmem:[#allocation7 + $0x2f4] sm:$0xf0]  ;;  %v6191_v57 = vld [vmem:[#allocation7 + $0x288] sm:$0xf]  ;;  %v5921_v18 = vld [vmem:[#allocation7 + $0x78] sm:$0xf0] }
 0x250   :  { %v2869_v11 = vmul.f32 %v7400_v27, %v2858_v59  ;;  %v7488_v25 = vpack.c.bf16 %v2981_v35, %v2981_v35  ;;  %v6240_v43 = vor.u32 %v6948_v39, %v6239_v10  ;;  %v6159_v10 = vld [vmem:[#allocation7 + $0x248] sm:$0xf]  ;;  %v5889_v39 = vld [vmem:[#allocation7 + $0x38] sm:$0xf0]  ;;  %v6980_v63 = vld [vmem:[#allocation7 + $0x3f4] sm:$0xf0] }
 0x251   :  { %v2933_v4 = vmul.f32 0.5, %v2932_v15  ;;  %v6049_v51 = vld [vmem:[#allocation7 + $0x178] sm:$0xf0] }
 0x252   :  { %v7486_v21 = vsub.f32 %v7463_v24, %v2869_v11  ;;  %3787 = vmatmul.bf16.vlgmr.msrb.gmra.mxu1 %v7488_v25  ;;  %3826 = vmatmul.bf16.vlgmr.msra.gmra.mxu0 %v7465_v33  ;;  %v5904_v24 = vor.u32 %v6864_v16, %v5903_v23  ;;  %v6878_v11 = vld [vmem:[#allocation7 + $0xcc] sm:$0xf]  ;;  %v6031_v23 = vld [vmem:[#allocation7 + $0x148] sm:$0xf] }
 0x253   :  { %v2934_v29 = vsub.f32 1.5, %v2933_v4  ;;  %3874 = vmatpush.bf16.msrb.mxu0 %v5920_v60  ;;  %3883 = vmatpush.bf16.msrb.mxu1 %v6112_v17  ;;  %v6048_v17 = vor.u32 %v6900_v8, %v6047_v7  ;;  %v5972_v30 = vor.u32 %v6878_v11, %v5969_v14  ;;  %v6944_v4 = vld [vmem:[#allocation7 + $0x2d4] sm:$0xf0]  ;;  %v6032_v34 = vor.u32 %v6896_v20, %v6031_v23  ;;  %v6097_v7 = vld [vmem:[#allocation7 + $0x1d8] sm:$0xf0] }
 0x254   :  { %v2877_v1 = vmul.f32 %v7486_v21, %v7486_v21  ;;  %3863 = vmatpush.bf16.msra.mxu3 %v6268_v5  ;;  %v6932_v5 = vld [vmem:[#allocation7 + $0x274] sm:$0xf0]  ;;  %v6906_v14 = vld [vmem:[#allocation7 + $0x1ac] sm:$0xf] }
 0x255   :  { %v2935_v36 = vmul.f32 %v7028_v9, %v2934_v29  ;;  %v6224_v29 = vor.u32 %v6944_v4, %v6223_v32  ;;  %v6924_v4 = vld [vmem:[#allocation7 + $0x234] sm:$0xf0] }
 0x256   :  { %v2896_v38 = vrot.slane %v2877_v1, 4 }
 0x257   :  { %v2939_v46 = vsel %vm2938_vm9, %v7028_v9, %v2935_v36  ;;  %3875 = vmatpush.bf16.msrb.mxu0 %v5904_v24  ;;  %3884 = vmatpush.bf16.msrb.mxu1 %v6096_v45  ;;  %v5988_v9 = vor.u32 %v6882_v3, %v5985_v28  ;;  %v5953_v24 = vld [vmem:[#allocation7 + $0xb8] sm:$0xf0]  ;;  %v6015_v45 = vld [vmem:[#allocation7 + $0x128] sm:$0xf] }
 0x258   :  { %v2897_v53 = vadd.f32 %v2896_v38, %v2877_v1  ;;  %v2952_v19 = vmul.f32 %v2939_v46, %v7440_v22  ;;  %v6949_v22 = vld [vmem:[#allocation7 + $0x304] sm:$0xf]  ;;  %v5956_v38 = vor.u32 %v6874_v40, %v5953_v24  ;;  %v6016_v36 = vor.u32 %v6892_v47, %v6015_v45  ;;  %v6175_v3 = vld [vmem:[#allocation7 + $0x268] sm:$0xf]  ;;  %v5873_v40 = vld [vmem:[#allocation7 + $0x18] sm:$0xf0] }
 0x259   :  { %v6252_v35 = vor.u32 %v6949_v22, %v6249_v13  ;;  %v6928_v13 = vld [vmem:[#allocation7 + $0x254] sm:$0xf0]  ;;  %v6902_v24 = vld [vmem:[#allocation7 + $0x18c] sm:$0xf]  ;;  %v6127_v45 = vld [vmem:[#allocation7 + $0x208] sm:$0xf] }
 0x25a   :  { %v2898_v61 = vrot.slane %v2897_v53, 2  ;;  %v2965_v42 = vmul.f32 %v2957_v55, %v2952_v19  ;;  %v5999_v55 = vld [vmem:[#allocation7 + $0x108] sm:$0xf]  ;;  %v6113_v19 = vld [vmem:[#allocation7 + $0x1f8] sm:$0xf0] }
 0x25b   :  { %3876 = vmatpush.bf16.msrb.mxu0 %v5888_v56  ;;  %3885 = vmatpush.bf16.msrb.mxu1 %v6080_v48  ;;  %v6888_v56 = vld [vmem:[#allocation7 + $0x114] sm:$0xf0]  ;;  %v6866_v48 = vld [vmem:[#allocation7 + $0x6c] sm:$0xf] }
 0x25c   :  { %v2899_v2 = vadd.f32 %v2898_v61, %v2897_v53  ;;  %v2978_v12 = vadd.f32 %v2970_v62, %v2965_v42  ;;  %3864 = vmatpush.bf16.msra.mxu3 %v6252_v35  ;;  %v6208_v53 = vor.u32 %v6940_v50, %v6207_v31  ;;  %v6936_v61 = vld [vmem:[#allocation7 + $0x294] sm:$0xf0]  ;;  %v6914_v62 = vld [vmem:[#allocation7 + $0x1ec] sm:$0xf]  ;;  %v6000_v49 = vor.u32 %v6888_v56, %v5999_v55  ;;  %v6081_v35 = vld [vmem:[#allocation7 + $0x1b8] sm:$0xf0] }
 0x25d   :  { %v6192_v0 = vor.u32 %v6936_v61, %v6191_v57  ;;  %v6116_v28 = vor.u32 %v6914_v62, %v6113_v19  ;;  %v6862_v42 = vld [vmem:[#allocation7 + $0x4c] sm:$0xf]  ;;  %v6084_v32 = vor.u32 %v6906_v14, %v6081_v35  ;;  %v6920_v47 = vld [vmem:[#allocation7 + $0x214] sm:$0xf0]  ;;  %v6033_v62 = vld [vmem:[#allocation7 + $0x158] sm:$0xf0] }
 0x25e   :  { %v2900_v59 = vrot.slane %v2899_v2, 1  ;;  %v2982_v60 = vmax.f32 %v2978_v12, 0.0  ;;  %v6128_v55 = vor.u32 %v6920_v47, %v6127_v45  ;;  %v6942_v19 = vld [vmem:[#allocation7 + $0x2cc] sm:$0xf]  ;;  %v6303_v14 = vld [vmem:[#allocation7 + $0x368] sm:$0xf] }
 0x25f   :  { %3877 = vmatpush.bf16.msrb.mxu0 %v5872_v6  ;;  %3886 = vmatpush.bf16.msrb.mxu1 %v6064_v52  ;;  %v6910_v52 = vld [vmem:[#allocation7 + $0x1cc] sm:$0xf]  ;;  %v6964_v35 = vld [vmem:[#allocation7 + $0x374] sm:$0xf0]  ;;  %v6255_v45 = vld [vmem:[#allocation7 + $0x308] sm:$0xf] }
 0x260   :  { %v2901_v41 = vadd.f32 %v2900_v59, %v2899_v2  ;;  %v7500_v16 = vpack.c.bf16 %v2982_v60, %v2982_v60  ;;  %v5924_v2 = vor.u32 %v6866_v48, %v5921_v18  ;;  %v5905_v59 = vld [vmem:[#allocation7 + $0x58] sm:$0xf0]  ;;  %v6100_v22 = vor.u32 %v6910_v52, %v6097_v7  ;;  %v6351_v48 = vld [vmem:[#allocation7 + $0x3c8] sm:$0xf]  ;;  %v6976_v18 = vld [vmem:[#allocation7 + $0x3d4] sm:$0xf0] }
 0x261   :  { %v5908_v12 = vor.u32 %v6862_v42, %v5905_v59  ;;  %v2958_v60 = vperm.slane %v7436_v37, 3  ;;  %v6017_v42 = vld [vmem:[#allocation7 + $0x138] sm:$0xf0]  ;;  %v6938_v59 = vld [vmem:[#allocation7 + $0x2ac] sm:$0xf] }
 0x262   :  { %v2905_v15 = vmul.f32 %v2901_v41, %v7400_v27  ;;  %3800 = vmatmul.bf16.vlgmr.msrb.gmra.mxu2 %v7500_v16  ;;  %3839 = vmatmul.bf16.vlgmr.msra.gmra.mxu1 %v7488_v25  ;;  %v6858_v41 = vld [vmem:[#allocation7 + $0x2c] sm:$0xf]  ;;  %v6952_v47 = vld [vmem:[#allocation7 + $0x314] sm:$0xf0] }
 0x263   :  { %3922 = vmatpush.bf16.msra.mxu0 %v5988_v9  ;;  %3887 = vmatpush.bf16.msrb.mxu1 %v6048_v17  ;;  %v6176_v9 = vor.u32 %v6932_v5, %v6175_v3  ;;  %v6160_v17 = vor.u32 %v6928_v13, %v6159_v10  ;;  %v5892_v23 = vor.u32 %v6858_v41, %v5889_v39  ;;  %v6335_v3 = vld [vmem:[#allocation7 + $0x3a8] sm:$0xf]  ;;  %v6890_v5 = vld [vmem:[#allocation7 + $0x12c] sm:$0xf]  ;;  %v6001_v10 = vld [vmem:[#allocation7 + $0x118] sm:$0xf0] }
 0x264   :  { %v7502_v1 = vadd.f32 1e-05, %v2905_v15  ;;  %3878 = vmatmul.bf16.vlgmr.msrb.gmra.mxu0 %v7465_v33  ;;  %3896 = vmatpush.bf16.msrb.mxu2 %v6240_v43  ;;  %v6143_v43 = vld [vmem:[#allocation7 + $0x228] sm:$0xf]  ;;  %v6193_v13 = vld [vmem:[#allocation7 + $0x298] sm:$0xf0] }
 0x265   :  { %v6144_v37 = vor.u32 %v6924_v4, %v6143_v43  ;;  %v6287_v43 = vld [vmem:[#allocation7 + $0x348] sm:$0xf] }
 0x266   :  { %7029 = vrsqrt.f32 %v7502_v1  ;;  %vm2946_vm11 = vweird.f32 %v7502_v1 }
 0x267   :  { %3923 = vmatpush.bf16.msra.mxu0 %v5972_v30  ;;  %3888 = vmatpush.bf16.msrb.mxu1 %v6032_v34  ;;  %v2971_v30 = vperm.slane %v7450_v58, 3  ;;  %v6065_v34 = vld [vmem:[#allocation7 + $0x198] sm:$0xf0]  ;;  %v6367_v58 = vld [vmem:[#allocation7 + $0x3e8] sm:$0xf] }
 0x268   :  { %3897 = vmatpush.bf16.msrb.mxu2 %v6224_v29  ;;  %v6068_v31 = vor.u32 %v6902_v24, %v6065_v34  ;;  %v6368_v56 = vor.u32 %v6980_v63, %v6367_v58  ;;  %v6956_v24 = vld [vmem:[#allocation7 + $0x334] sm:$0xf0]  ;;  %v6922_v34 = vld [vmem:[#allocation7 + $0x22c] sm:$0xf]  ;;  %v6369_v63 = vld [vmem:[#allocation7 + $0x3f8] sm:$0xf0] }
 0x269   :  { %v6978_v58 = vld [vmem:[#allocation7 + $0x3ec] sm:$0xf] }
 0x26b   :  { %3924 = vmatpush.bf16.msra.mxu0 %v5956_v38  ;;  %3889 = vmatpush.bf16.msrb.mxu1 %v6016_v36  ;;  %v6946_v36 = vld [vmem:[#allocation7 + $0x2ec] sm:$0xf] }
 0x26c   :  { %v7030_v46 = vpop.eup %7029  ;;  %3898 = vmatpush.bf16.msrb.mxu2 %v6208_v53  ;;  %v6241_v53 = vld [vmem:[#allocation7 + $0x2f8] sm:$0xf0] }
 0x26d   :  { %v2941_v26 = vmul.f32 %v7030_v46, %v7502_v1  ;;  %vm2947_vm10 = vweird.f32 %v7030_v46  ;;  %v6854_v1 = vld [vmem:[#allocation7 + $0xc] sm:$0xf]  ;;  %v6244_v61 = vor.u32 %v6946_v36, %v6241_v53  ;;  %v6353_v53 = vld [vmem:[#allocation7 + $0x3d8] sm:$0xf0] }
 0x26e   :  { %vm2948_vm12 = vmor %vm2946_vm11, %vm2947_vm10  ;;  %v5876_v38 = vor.u32 %v6854_v1, %v5873_v40  ;;  %v6271_v40 = vld [vmem:[#allocation7 + $0x328] sm:$0xf]  ;;  %v6974_v36 = vld [vmem:[#allocation7 + $0x3cc] sm:$0xf] }
 0x26f   :  { %v2942_v44 = vmul.f32 %v7030_v46, %v2941_v26  ;;  %3925 = vmatpush.bf16.msra.mxu0 %v5940_v54  ;;  %3890 = vmatpush.bf16.msrb.mxu1 %v6000_v49  ;;  %v6894_v26 = vld [vmem:[#allocation7 + $0x14c] sm:$0xf]  ;;  %v6225_v49 = vld [vmem:[#allocation7 + $0x2d8] sm:$0xf0] }
 0x270   :  { %3899 = vmatpush.bf16.msrb.mxu2 %v6192_v0  ;;  %v6036_v0 = vor.u32 %v6894_v26, %v6033_v62  ;;  %v6962_v26 = vld [vmem:[#allocation7 + $0x36c] sm:$0xf]  ;;  %v6305_v62 = vld [vmem:[#allocation7 + $0x378] sm:$0xf0] }
 0x271   :  { %v2943_v6 = vmul.f32 0.5, %v2942_v44  ;;  %v6352_v44 = vor.u32 %v6976_v18, %v6351_v48  ;;  %v6321_v48 = vld [vmem:[#allocation7 + $0x398] sm:$0xf0] }
 0x272   :  { %3852 = vmatmul.bf16.vlgmr.msra.gmra.mxu2 %v7500_v16  ;;  %3891 = vmatmul.bf16.vlgmr.msrb.gmra.mxu1 %v7488_v25 }
 0x273   :  { %v2944_v8 = vsub.f32 1.5, %v2943_v6  ;;  %3926 = vmatpush.bf16.msra.mxu0 %v5924_v2  ;;  %3935 = vmatpush.bf16.msra.mxu1 %v6116_v28  ;;  %v6228_v2 = vor.u32 %v6942_v19, %v6225_v49  ;;  %v6972_v28 = vld [vmem:[#allocation7 + $0x3b4] sm:$0xf0]  ;;  %v6209_v6 = vld [vmem:[#allocation7 + $0x2b8] sm:$0xf0]  ;;  %v6308_v19 = vor.u32 %v6962_v26, %v6305_v62 }
 0x274   :  { %3900 = vmatpush.bf16.msrb.mxu2 %v6176_v9  ;;  %v6336_v52 = vor.u32 %v6972_v28, %v6335_v3  ;;  %v6212_v7 = vor.u32 %v6938_v59, %v6209_v6  ;;  %v6968_v9 = vld [vmem:[#allocation7 + $0x394] sm:$0xf0]  ;;  %v6958_v49 = vld [vmem:[#allocation7 + $0x34c] sm:$0xf]  ;;  %v6273_v3 = vld [vmem:[#allocation7 + $0x338] sm:$0xf0] }
 0x275   :  { %v2945_v11 = vmul.f32 %v7030_v46, %v2944_v8  ;;  %v6319_v8 = vld [vmem:[#allocation7 + $0x388] sm:$0xf] }
 0x276   :  { %v6320_v41 = vor.u32 %v6968_v9, %v6319_v8 }
 0x277   :  { %v2949_v15 = vsel %vm2948_vm12, %v7030_v46, %v2945_v11  ;;  %3927 = vmatpush.bf16.msra.mxu0 %v5908_v12  ;;  %3936 = vmatpush.bf16.msra.mxu1 %v6100_v22  ;;  %v6886_v12 = vld [vmem:[#allocation7 + $0x10c] sm:$0xf] }
 0x278   :  { %v2953_v20 = vmul.f32 %v2949_v15, %v7486_v21  ;;  %3901 = vmatpush.bf16.msrb.mxu2 %v6160_v17  ;;  %v6898_v21 = vld [vmem:[#allocation7 + $0x16c] sm:$0xf]  ;;  %v6004_v39 = vor.u32 %v6886_v12, %v6001_v10  ;;  %v6177_v15 = vld [vmem:[#allocation7 + $0x278] sm:$0xf0]  ;;  %v6304_v17 = vor.u32 %v6964_v35, %v6303_v14 }
 0x279   :  { %v6052_v46 = vor.u32 %v6898_v21, %v6049_v51  ;;  %v6934_v22 = vld [vmem:[#allocation7 + $0x28c] sm:$0xf]  ;;  %v6256_v21 = vor.u32 %v6952_v47, %v6255_v45  ;;  %v6372_v51 = vor.u32 %v6978_v58, %v6369_v63 }
 0x27a   :  { %v2966_v29 = vmul.f32 %v2958_v60, %v2953_v20  ;;  %v6196_v11 = vor.u32 %v6934_v22, %v6193_v13  ;;  %v6930_v60 = vld [vmem:[#allocation7 + $0x26c] sm:$0xf] }
 0x27b   :  { %3928 = vmatpush.bf16.msra.mxu0 %v5892_v23  ;;  %3937 = vmatpush.bf16.msra.mxu1 %v6084_v32  ;;  %v6180_v23 = vor.u32 %v6930_v60, %v6177_v15  ;;  %v6926_v20 = vld [vmem:[#allocation7 + $0x24c] sm:$0xf]  ;;  %v6161_v32 = vld [vmem:[#allocation7 + $0x258] sm:$0xf0] }
 0x27c   :  { %v2979_v50 = vadd.f32 %v2971_v30, %v2966_v29  ;;  %3902 = vmatpush.bf16.msrb.mxu2 %v6144_v37  ;;  %v6960_v30 = vld [vmem:[#allocation7 + $0x354] sm:$0xf0]  ;;  %v6164_v1 = vor.u32 %v6926_v20, %v6161_v32  ;;  %v6145_v29 = vld [vmem:[#allocation7 + $0x238] sm:$0xf0]  ;;  %v6272_v37 = vor.u32 %v6956_v24, %v6271_v40  ;;  %v6986_v47 = vld [vmem:[%s7704_s11 + $0x28] sm:$0xff] }
 0x27d   :  { %v6288_v4 = vor.u32 %v6960_v30, %v6287_v43  ;;  %v6988_v32 = vld [vmem:[%s7704_s11 + $0x38] sm:$0xff] }
 0x27e   :  { %v2983_v54 = vmax.f32 %v2979_v50, 0.0  ;;  %v6129_v50 = vld [vmem:[#allocation7 + $0x218] sm:$0xf0] }
 0x27f   :  { %3929 = vmatpush.bf16.msra.mxu0 %v5876_v38  ;;  %3938 = vmatpush.bf16.msra.mxu1 %v6068_v31  ;;  %v6148_v38 = vor.u32 %v6922_v34, %v6145_v29  ;;  %v6918_v31 = vld [vmem:[#allocation7 + $0x20c] sm:$0xf]  ;;  %v6987_v34 = vld [vmem:[%s7704_s11 + $0x30] sm:$0xff] }
 0x280   :  { %v7516_v57 = vpack.c.bf16 %v2983_v54, %v2983_v54  ;;  %3903 = vmatpush.bf16.msrb.mxu2 %v6128_v55  ;;  %v6356_v54 = vor.u32 %v6974_v36, %v6353_v53  ;;  %v6970_v55 = vld [vmem:[#allocation7 + $0x3ac] sm:$0xf] }
 0x282   :  { %3813 = vmatmul.bf16.vlgmr.msrb.gmra.mxu3 %v7516_v57  ;;  %3930 = vmatmul.bf16.vlgmr.msra.gmra.mxu0 %v7465_v33  ;;  %v6020_v33 = vor.u32 %v6890_v5, %v6017_v42  ;;  %v6950_v5 = vld [vmem:[#allocation7 + $0x30c] sm:$0xf] }
 0x283   :  { %3909 = vmatpush.bf16.msrb.mxu3 %v6368_v56  ;;  %3939 = vmatpush.bf16.msra.mxu1 %v6052_v46  ;;  %v6337_v56 = vld [vmem:[#allocation7 + $0x3b8] sm:$0xf0] }
 0x284   :  { %3948 = vmatpush.bf16.msra.mxu2 %v6244_v61  ;;  %v6340_v46 = vor.u32 %v6970_v55, %v6337_v56  ;;  %v6966_v61 = vld [vmem:[#allocation7 + $0x38c] sm:$0xf]  ;;  %4382 = vmatpush.bf16.msrb.mxu0 %v6988_v32 }
 0x285   :  { %3904 = vmatmul.bf16.vlgmr.msrb.gmra.mxu2 %v7500_v16  ;;  %v6324_v18 = vor.u32 %v6966_v61, %v6321_v48  ;;  %v6996_v61 = vld [vmem:[%s7704_s11 + $0x78] sm:$0xff] }
 0x287   :  { %3910 = vmatpush.bf16.msrb.mxu3 %v6352_v44  ;;  %3940 = vmatpush.bf16.msra.mxu1 %v6036_v0  ;;  %v6289_v44 = vld [vmem:[#allocation7 + $0x358] sm:$0xf0] }
 0x288   :  { %3949 = vmatpush.bf16.msra.mxu2 %v6228_v2  ;;  %v6292_v0 = vor.u32 %v6958_v49, %v6289_v44  ;;  %v6954_v2 = vld [vmem:[#allocation7 + $0x32c] sm:$0xf]  ;;  %4383 = vmatpush.bf16.msrb.mxu0 %v6987_v34  ;;  %v6983_v49 = vld [vmem:[%s7704_s11 + $0x10] sm:$0xff] }
 0x289   :  { %v6276_v28 = vor.u32 %v6954_v2, %v6273_v3  ;;  %v6995_v44 = vld [vmem:[%s7704_s11 + $0x70] sm:$0xff] }
 0x28b   :  { %3911 = vmatpush.bf16.msrb.mxu3 %v6336_v52  ;;  %3941 = vmatpush.bf16.msra.mxu1 %v6020_v33 }
 0x28c   :  { %3950 = vmatpush.bf16.msra.mxu2 %v6212_v7  ;;  %4384 = vmatpush.bf16.msrb.mxu0 %v6986_v47  ;;  %v6990_v47 = vld [vmem:[%s7704_s11 + $0x48] sm:$0xff] }
 0x28f   :  { %3912 = vmatpush.bf16.msrb.mxu3 %v6320_v41  ;;  %3942 = vmatpush.bf16.msra.mxu1 %v6004_v39 }
 0x290   :  { %3951 = vmatpush.bf16.msra.mxu2 %v6196_v11 }
 0x292   :  { %3865 = vmatmul.bf16.vlgmr.msra.gmra.mxu3 %v7516_v57  ;;  %3943 = vmatmul.bf16.vlgmr.msra.gmra.mxu1 %v7488_v25  ;;  %v6132_v25 = vor.u32 %v6918_v31, %v6129_v50 }
 0x293   :  { %3913 = vmatpush.bf16.msrb.mxu3 %v6304_v17  ;;  %4395 = vmatpush.bf16.msrb.mxu1 %v6996_v61 }
 0x294   :  { %3952 = vmatpush.bf16.msra.mxu2 %v6180_v23 }
 0x297   :  { %3914 = vmatpush.bf16.msrb.mxu3 %v6288_v4  ;;  %4396 = vmatpush.bf16.msrb.mxu1 %v6995_v44 }
 0x298   :  { %3953 = vmatpush.bf16.msra.mxu2 %v6164_v1 }
 0x29b   :  { %3915 = vmatpush.bf16.msrb.mxu3 %v6272_v37 }
 0x29c   :  { %3954 = vmatpush.bf16.msra.mxu2 %v6148_v38 }
 0x29f   :  { %3916 = vmatpush.bf16.msrb.mxu3 %v6256_v21 }
 0x2a0   :  { %3955 = vmatpush.bf16.msra.mxu2 %v6132_v25 }
 0x2a2   :  { %3917 = vmatmul.bf16.vlgmr.msrb.gmra.mxu3 %v7516_v57 }
 0x2a3   :  { %3961 = vmatpush.bf16.msra.mxu3 %v6372_v51  ;;  %3956 = vmatmul.bf16.vlgmr.msra.gmra.mxu2 %v7500_v16  ;;  %v6257_v16 = vld [vmem:[#allocation7 + $0x318] sm:$0xf0]  ;;  %v6985_v51 = vld [vmem:[%s7704_s11 + $0x20] sm:$0xff] }
 0x2a4   :  { %v6260_v42 = vor.u32 %v6950_v5, %v6257_v16  ;;  %4385 = vmatpush.bf16.msrb.mxu0 %v6985_v51 }
 0x2a7   :  { %3962 = vmatpush.bf16.msra.mxu3 %v6356_v54 }
 0x2ab   :  { %3963 = vmatpush.bf16.msra.mxu3 %v6340_v46  ;;  %v6984_v46 = vld [vmem:[%s7704_s11 + $0x18] sm:$0xff] }
 0x2ac   :  { %4386 = vmatpush.bf16.msrb.mxu0 %v6984_v46 }
 0x2af   :  { %3964 = vmatpush.bf16.msra.mxu3 %v6324_v18 }
 0x2b0   :  { %4387 = vmatpush.bf16.msrb.mxu0 %v6983_v49 }
 0x2b3   :  { %3965 = vmatpush.bf16.msra.mxu3 %v6308_v19 }
 0x2b7   :  { %3966 = vmatpush.bf16.msra.mxu3 %v6292_v0 }
 0x2bb   :  { %3967 = vmatpush.bf16.msra.mxu3 %v6276_v28 }
 0x2bf   :  { %3968 = vmatpush.bf16.msra.mxu3 %v6260_v42  ;;  %v3775_v59 = vpop.f32.mrf.mxu0  ;;  %v6982_v42 = vld [vmem:[%s7704_s11 + $0x8] sm:$0xff] }
 0x2c0   :  { %4388 = vmatpush.bf16.msrb.mxu0 %v6982_v42  ;;  %v6999_v42 = vld [vmem:[%s7704_s11 + $0x90] sm:$0xff] }
 0x2c2   :  { %3969 = vmatmul.bf16.vlgmr.msra.gmra.mxu3 %v7516_v57  ;;  %v7533_v57 = vld [vmem:[%s7701_s8] sm:$0xf] }
 0x2c3   :  { %v3118_v35 = vperm.slane %v7533_v57, 0  ;;  %v3119_v29 = vperm.slane %v7533_v57, 1  ;;  %v3120_v0 = vperm.slane %v7533_v57, 2 }
 0x2c5   :  { %v3776_v15 = vadd.f32 %v3775_v59, %v3118_v35  ;;  %v6994_v59 = vld [vmem:[%s7704_s11 + $0x68] sm:$0xff] }
 0x2c6   :  { %4397 = vmatpush.bf16.msrb.mxu1 %v6994_v59 }
 0x2c7   :  { %v3777_v6 = vpop.f32.mrf.mxu0 }
 0x2cf   :  { %v3788_v52 = vpop.f32.mrf.mxu1  ;;  %v3827_v33 = vpop.f32.mrf.mxu0 }
 0x2d0   :  { %v3789_v23 = vadd.f32 %v3788_v52, %v3776_v15  ;;  %v3828_v31 = vadd.f32 %v3827_v33, %v3119_v29 }
 0x2d7   :  { %v3790_v7 = vpop.f32.mrf.mxu1  ;;  %v3829_v8 = vpop.f32.mrf.mxu0 }
 0x2df   :  { %v3840_v9 = vpop.f32.mrf.mxu1 }
 0x2e0   :  { %v3841_v21 = vadd.f32 %v3840_v9, %v3828_v31  ;;  %v7002_v31 = vld [vmem:[%s7704_s11 + $0xa8] sm:$0xff] }
 0x2e1   :  { %v7526_v12 = vpop.f32.mrf.mxu0 }
 0x2e2   :  { %v3880_v6 = vadd.f32 %v7526_v12, %v3120_v0 }
 0x2e5   :  { %v3801_v10 = vpop.f32.mrf.mxu2 }
 0x2e6   :  { %v3802_v43 = vadd.f32 %v3801_v10, %v3789_v23  ;;  %v6981_v10 = vld [vmem:[%s7704_s11] sm:$0xff]  ;;  %v7004_v23 = vld [vmem:[%s7704_s11 + $0xb8] sm:$0xff] }
 0x2e7   :  { %v3842_v22 = vpop.f32.mrf.mxu1  ;;  %4389 = vmatpush.bf16.msrb.mxu0 %v6981_v10  ;;  %4408 = vmatpush.bf16.msrb.mxu2 %v7004_v23 }
 0x2e8   :  { %v6993_v22 = vld [vmem:[%s7704_s11 + $0x60] sm:$0xff] }
 0x2e9   :  { %v3881_v13 = vpop.f32.mrf.mxu0  ;;  %4398 = vmatpush.bf16.msrb.mxu1 %v6993_v22 }
 0x2ed   :  { %v3803_v41 = vpop.f32.mrf.mxu2 }
 0x2ef   :  { %v7528_v39 = vpop.f32.mrf.mxu1 }
 0x2f0   :  { %v3893_v7 = vadd.f32 %v7528_v39, %v3880_v6 }
 0x2f5   :  { %v3853_v11 = vpop.f32.mrf.mxu2 }
 0x2f6   :  { %v3854_v36 = vadd.f32 %v3853_v11, %v3841_v21 }
 0x2f7   :  { %v3894_v14 = vpop.f32.mrf.mxu1 }
 0x2fd   :  { %v3855_v17 = vpop.f32.mrf.mxu2 }
 0x2fe   :  { %v6992_v17 = vld [vmem:[%s7704_s11 + $0x58] sm:$0xff] }
 0x2ff   :  { %v7536_v60 = vpop.f32.mrf.mxu0  ;;  %4399 = vmatpush.bf16.msrb.mxu1 %v6992_v17  ;;  %v7012_v17 = vld [vmem:[%s7704_s11 + $0xf8] sm:$0xff] }
 0x300   :  { %4421 = vmatpush.bf16.msrb.mxu3 %v7012_v17 }
 0x305   :  { %v3814_v30 = vpop.f32.mrf.mxu3 }
 0x306   :  { %v3815_v20 = vadd.f32 %v3814_v30, %v3802_v43 }
 0x307   :  { %v3933_v4 = vpop.f32.mrf.mxu0 }
 0x308   :  { %v3976_v1 = vrot.slane %v3815_v20, 4  ;;  %v3905_v40 = vpop.f32.mrf.mxu2 }
 0x309   :  { %v3906_v41 = vadd.f32 %v3905_v40, %v3893_v7  ;;  %v7003_v40 = vld [vmem:[%s7704_s11 + $0xb0] sm:$0xff] }
 0x30a   :  { %v3977_v24 = vadd.f32 %v3976_v1, %v3815_v20  ;;  %v6991_v1 = vld [vmem:[%s7704_s11 + $0x50] sm:$0xff]  ;;  %4409 = vmatpush.bf16.msrb.mxu2 %v7003_v40 }
 0x30b   :  { %4400 = vmatpush.bf16.msrb.mxu1 %v6991_v1 }
 0x30c   :  { %v3978_v37 = vrot.slane %v3977_v24, 2 }
 0x30d   :  { %v3816_v38 = vpop.f32.mrf.mxu3 }
 0x30e   :  { %v3979_v45 = vadd.f32 %v3978_v37, %v3977_v24  ;;  %4410 = vmatpush.bf16.msrb.mxu2 %v7002_v31 }
 0x30f   :  { %v7548_v58 = vpop.f32.mrf.mxu1  ;;  %4401 = vmatpush.bf16.msrb.mxu1 %v6990_v47 }
 0x310   :  { %v3980_v50 = vrot.slane %v3979_v45, 1  ;;  %v3907_v63 = vpop.f32.mrf.mxu2 }
 0x312   :  { %v3981_v25 = vadd.f32 %v3980_v50, %v3979_v45 }
 0x314   :  { %v4000_v53 = vmul.f32 %v3981_v25, %v7400_v27 }
 0x315   :  { %v3866_v54 = vpop.f32.mrf.mxu3 }
 0x316   :  { %v7554_v55 = vsub.f32 %v3815_v20, %v4000_v53  ;;  %v3867_v56 = vadd.f32 %v3866_v54, %v3854_v36  ;;  %v6989_v53 = vld [vmem:[%s7704_s11 + $0x40] sm:$0xff] }
 0x317   :  { %v3946_v26 = vpop.f32.mrf.mxu1  ;;  %v7001_v54 = vld [vmem:[%s7704_s11 + $0xa0] sm:$0xff]  ;;  %4402 = vmatpush.bf16.msrb.mxu1 %v6989_v53 }
 0x318   :  { %v4008_v48 = vmul.f32 %v7554_v55, %v7554_v55  ;;  %v3982_v18 = vrot.slane %v3867_v56, 4  ;;  %4411 = vmatpush.bf16.msrb.mxu2 %v7001_v54 }
 0x31a   :  { %v4012_v62 = vrot.slane %v4008_v48, 4  ;;  %v3983_v19 = vadd.f32 %v3982_v18, %v3867_v56 }
 0x31c   :  { %v4013_v2 = vadd.f32 %v4012_v62, %v4008_v48  ;;  %v3984_v3 = vrot.slane %v3983_v19, 2  ;;  %v7000_v62 = vld [vmem:[%s7704_s11 + $0x98] sm:$0xff] }
 0x31d   :  { %v3868_v28 = vpop.f32.mrf.mxu3  ;;  %4412 = vmatpush.bf16.msrb.mxu2 %v7000_v62 }
 0x31e   :  { %v4014_v5 = vrot.slane %v4013_v2, 2  ;;  %v3985_v16 = vadd.f32 %v3984_v3, %v3983_v19  ;;  %v7627_v19 = vld [vmem:[%s7702_s9] sm:$0xf] }
 0x31f   :  { %v7635_v3 = vld [vmem:[%s7703_s10] sm:$0xf] }
 0x320   :  { %v4015_v52 = vadd.f32 %v4014_v5, %v4013_v2  ;;  %v3986_v33 = vrot.slane %v3985_v16, 1  ;;  %v3121_v2 = vperm.slane %v7533_v57, 3  ;;  %v4089_v5 = vperm.slane %v7627_v19, 0 }
 0x321   :  { %v4102_v57 = vperm.slane %v7635_v3, 0  ;;  %4413 = vmatpush.bf16.msrb.mxu2 %v6999_v42  ;;  %v4091_v42 = vperm.slane %v7627_v19, 2 }
 0x322   :  { %v4016_v8 = vrot.slane %v4015_v52, 1  ;;  %v3987_v9 = vadd.f32 %v3986_v33, %v3985_v16  ;;  %v3932_v33 = vadd.f32 %v7536_v60, %v3121_v2  ;;  %v6997_v60 = vld [vmem:[%s7704_s11 + $0x80] sm:$0xff] }
 0x324   :  { %v4017_v13 = vadd.f32 %v4016_v8, %v4015_v52  ;;  %v4001_v12 = vmul.f32 %v3987_v9, %v7400_v27  ;;  %v6998_v9 = vld [vmem:[%s7704_s11 + $0x88] sm:$0xff]  ;;  %v3945_v10 = vadd.f32 %v7548_v58, %v3932_v33  ;;  %v4104_v33 = vperm.slane %v7635_v3, 2 }
 0x325   :  { %v3918_v11 = vpop.f32.mrf.mxu3  ;;  %4414 = vmatpush.bf16.msrb.mxu2 %v6998_v9  ;;  %v7005_v9 = vld [vmem:[%s7704_s11 + $0xc0] sm:$0xff] }
 0x326   :  { %v4036_v14 = vmul.f32 %v4017_v13, %v7400_v27  ;;  %v7587_v39 = vsub.f32 %v3867_v56, %v4001_v12  ;;  %v3919_v35 = vadd.f32 %v3918_v11, %v3906_v41  ;;  %v7589_v15 = vpop.f32.mrf.mxu2 }
 0x328   :  { %v4040_v43 = vadd.f32 1e-05, %v4036_v14  ;;  %v4009_v30 = vmul.f32 %v7587_v39, %v7587_v39  ;;  %v3988_v20 = vrot.slane %v3919_v35, 4 }
 0x329   :  { %4415 = vmatpush.bf16.msrb.mxu2 %v6997_v60 }
 0x32a   :  { %7031 = vrsqrt.f32 %v4040_v43  ;;  %v4018_v32 = vrot.slane %v4009_v30, 4  ;;  %v3989_v4 = vadd.f32 %v3988_v20, %v3919_v35  ;;  %vm4050_vm14 = vweird.f32 %v4040_v43 }
 0x32c   :  { %v4019_v24 = vadd.f32 %v4018_v32, %v4009_v30  ;;  %v3990_v34 = vrot.slane %v3989_v4, 2 }
 0x32d   :  { %v3920_v29 = vpop.f32.mrf.mxu3 }
 0x32e   :  { %v4020_v37 = vrot.slane %v4019_v24, 2  ;;  %v3991_v38 = vadd.f32 %v3990_v34, %v3989_v4  ;;  %v3959_v45 = vpop.f32.mrf.mxu2  ;;  %v7011_v4 = vld [vmem:[%s7704_s11 + $0xf0] sm:$0xff] }
 0x32f   :  { %4422 = vmatpush.bf16.msrb.mxu3 %v7011_v4  ;;  %v7010_v45 = vld [vmem:[%s7704_s11 + $0xe8] sm:$0xff] }
 0x330   :  { %v7032_v50 = vpop.eup %7031  ;;  %v4021_v63 = vadd.f32 %v4020_v37, %v4019_v24  ;;  %v3992_v21 = vrot.slane %v3991_v38, 1  ;;  %v4090_v37 = vperm.slane %v7627_v19, 1 }
 0x331   :  { %v4045_v25 = vmul.f32 %v7032_v50, %v4040_v43  ;;  %vm4051_vm13 = vweird.f32 %v7032_v50 }
 0x332   :  { %v4022_v51 = vrot.slane %v4021_v63, 1  ;;  %v3993_v36 = vadd.f32 %v3992_v21, %v3991_v38  ;;  %vm4052_vm15 = vmor %vm4050_vm14, %vm4051_vm13 }
 0x333   :  { %v4046_v56 = vmul.f32 %v7032_v50, %v4045_v25  ;;  %4423 = vmatpush.bf16.msrb.mxu3 %v7010_v45 }
 0x334   :  { %v4023_v46 = vadd.f32 %v4022_v51, %v4021_v63  ;;  %v4002_v61 = vmul.f32 %v3993_v36, %v7400_v27  ;;  %v4103_v63 = vperm.slane %v7635_v3, 1  ;;  %v7009_v51 = vld [vmem:[%s7704_s11 + $0xe0] sm:$0xff] }
 0x335   :  { %v4047_v48 = vmul.f32 0.5, %v4046_v56 }
 0x336   :  { %v4037_v18 = vmul.f32 %v4023_v46, %v7400_v27  ;;  %v7619_v26 = vsub.f32 %v3919_v35, %v4002_v61 }
 0x337   :  { %v4048_v49 = vsub.f32 1.5, %v4047_v48  ;;  %4424 = vmatpush.bf16.msrb.mxu3 %v7009_v51 }
 0x338   :  { %v4041_v44 = vadd.f32 1e-05, %v4037_v18  ;;  %v4010_v0 = vmul.f32 %v7619_v26, %v7619_v26 }
 0x339   :  { %v4049_v28 = vmul.f32 %v7032_v50, %v4048_v49 }
 0x33a   :  { %7033 = vrsqrt.f32 %v4041_v44  ;;  %v4024_v16 = vrot.slane %v4010_v0, 4  ;;  %vm4060_vm1 = vweird.f32 %v4041_v44 }
 0x33b   :  { %v4053_v59 = vsel %vm4052_vm15, %v7032_v50, %v4049_v28 }
 0x33c   :  { %v4084_v6 = vmul.f32 %v4053_v59, %v7554_v55  ;;  %v4025_v52 = vadd.f32 %v4024_v16, %v4010_v0  ;;  %v3958_v55 = vadd.f32 %v7589_v15, %v3945_v10  ;;  %v7007_v0 = vld [vmem:[%s7704_s11 + $0xd0] sm:$0xff]  ;;  %v7006_v59 = vld [vmem:[%s7704_s11 + $0xc8] sm:$0xff] }
 0x33e   :  { %v4097_v7 = vmul.f32 %v4089_v5, %v4084_v6  ;;  %v4026_v8 = vrot.slane %v4025_v52, 2 }
 0x340   :  { %v7034_v22 = vpop.eup %7033  ;;  %v4110_v13 = vadd.f32 %v4102_v57, %v4097_v7  ;;  %v4027_v41 = vadd.f32 %v4026_v8, %v4025_v52 }
 0x341   :  { %v4055_v12 = vmul.f32 %v7034_v22, %v4041_v44  ;;  %vm4061_vm0 = vweird.f32 %v7034_v22 }
 0x342   :  { %v4114_v11 = vmax.f32 %v4110_v13, 0.0  ;;  %v4028_v14 = vrot.slane %v4027_v41, 1  ;;  %vm4062_vm2 = vmor %vm4060_vm1, %vm4061_vm0 }
 0x343   :  { %v4056_v23 = vmul.f32 %v7034_v22, %v4055_v12 }
 0x344   :  { %v4029_v43 = vadd.f32 %v4028_v14, %v4027_v41  ;;  %v4118_v30 = vpack.c.bf16 %v4114_v11, %v4114_v11 }
 0x345   :  { %v3970_v35 = vpop.f32.mrf.mxu3  ;;  %v4057_v20 = vmul.f32 0.5, %v4056_v23 }
 0x346   :  { %v3971_v58 = vadd.f32 %v3970_v35, %v3958_v55  ;;  %v4038_v15 = vmul.f32 %v4029_v43, %v7400_v27  ;;  %4390 = vmatmul.bf16.vlgmr.msrb.gmra.mxu0 %v4118_v30 }
 0x347   :  { %v4058_v1 = vsub.f32 1.5, %v4057_v20  ;;  %v4105_v20 = vperm.slane %v7635_v3, 3 }
 0x348   :  { %v3994_v32 = vrot.slane %v3971_v58, 4  ;;  %v4042_v24 = vadd.f32 1e-05, %v4038_v15 }
 0x349   :  { %v4059_v34 = vmul.f32 %v7034_v22, %v4058_v1 }
 0x34a   :  { %v3995_v40 = vadd.f32 %v3994_v32, %v3971_v58  ;;  %7035 = vrsqrt.f32 %v4042_v24  ;;  %vm4070_vm4 = vweird.f32 %v4042_v24 }
 0x34b   :  { %v4063_v47 = vsel %vm4062_vm2, %v7034_v22, %v4059_v34 }
 0x34c   :  { %v3996_v29 = vrot.slane %v3995_v40, 2  ;;  %v4085_v50 = vmul.f32 %v4063_v47, %v7587_v39  ;;  %v7008_v39 = vld [vmem:[%s7704_s11 + $0xd8] sm:$0xff] }
 0x34d   :  { %v3972_v38 = vpop.f32.mrf.mxu3  ;;  %4425 = vmatpush.bf16.msrb.mxu3 %v7008_v39 }
 0x34e   :  { %v3997_v31 = vadd.f32 %v3996_v29, %v3995_v40  ;;  %v4098_v25 = vmul.f32 %v4090_v37, %v4085_v50  ;;  %v7020_v38 = vld [vmem:[%s7705_s12] ss:$0 sm:$0xff] }
 0x350   :  { %v3998_v21 = vrot.slane %v3997_v31, 1  ;;  %v7036_v53 = vpop.eup %7035  ;;  %v4111_v54 = vadd.f32 %v4103_v63, %v4098_v25 }
 0x351   :  { %v4065_v56 = vmul.f32 %v7036_v53, %v4042_v24  ;;  %vm4071_vm3 = vweird.f32 %v7036_v53  ;;  %4426 = vmatpush.bf16.msrb.mxu3 %v7007_v0 }
 0x352   :  { %v3999_v36 = vadd.f32 %v3998_v21, %v3997_v31  ;;  %v4115_v61 = vmax.f32 %v4111_v54, 0.0  ;;  %vm4072_vm5 = vmor %vm4070_vm4, %vm4071_vm3 }
 0x353   :  { %v4066_v48 = vmul.f32 %v7036_v53, %v4065_v56 }
 0x354   :  { %v4003_v46 = vmul.f32 %v3999_v36, %v7400_v27  ;;  %v4119_v62 = vpack.c.bf16 %v4115_v61, %v4115_v61 }
 0x355   :  { %v4067_v49 = vmul.f32 0.5, %v4066_v48  ;;  %4427 = vmatpush.bf16.msrb.mxu3 %v7006_v59 }
 0x356   :  { %v4007_v18 = vsub.f32 %v3971_v58, %v4003_v46  ;;  %4403 = vmatmul.bf16.vlgmr.msrb.gmra.mxu1 %v4119_v62  ;;  %v4092_v58 = vperm.slane %v7627_v19, 3 }
 0x357   :  { %v4068_v2 = vsub.f32 1.5, %v4067_v49 }
 0x358   :  { %v4011_v44 = vmul.f32 %v4007_v18, %v4007_v18 }
 0x359   :  { %v4069_v5 = vmul.f32 %v7036_v53, %v4068_v2  ;;  %4428 = vmatpush.bf16.msrb.mxu3 %v7005_v9 }
 0x35a   :  { %v4030_v28 = vrot.slane %v4011_v44, 4 }
 0x35b   :  { %v4073_v6 = vsel %vm4072_vm5, %v7036_v53, %v4069_v5 }
 0x35c   :  { %v4031_v16 = vadd.f32 %v4030_v28, %v4011_v44  ;;  %v4086_v52 = vmul.f32 %v4073_v6, %v7619_v26 }
 0x35e   :  { %v4032_v57 = vrot.slane %v4031_v16, 2  ;;  %v4099_v8 = vmul.f32 %v4091_v42, %v4086_v52 }
 0x360   :  { %v4033_v7 = vadd.f32 %v4032_v57, %v4031_v16  ;;  %v4112_v22 = vadd.f32 %v4104_v33, %v4099_v8 }
 0x362   :  { %v4034_v10 = vrot.slane %v4033_v7, 1  ;;  %v4116_v41 = vmax.f32 %v4112_v22, 0.0 }
 0x364   :  { %v4035_v13 = vadd.f32 %v4034_v10, %v4033_v7  ;;  %v4120_v55 = vpack.c.bf16 %v4116_v41, %v4116_v41 }
 0x366   :  { %v4039_v12 = vmul.f32 %v4035_v13, %v7400_v27  ;;  %4416 = vmatmul.bf16.vlgmr.msrb.gmra.mxu2 %v4120_v55 }
 0x368   :  { %v4043_v11 = vadd.f32 1e-05, %v4039_v12 }
 0x36a   :  { %7037 = vrsqrt.f32 %v4043_v11  ;;  %vm4080_vm7 = vweird.f32 %v4043_v11 }
 0x370   :  { %v7038_v26 = vpop.eup %7037 }
 0x371   :  { %v4075_v14 = vmul.f32 %v7038_v26, %v4043_v11  ;;  %vm4081_vm6 = vweird.f32 %v7038_v26 }
 0x372   :  { %vm4082_vm8 = vmor %vm4080_vm7, %vm4081_vm6 }
 0x373   :  { %v4076_v35 = vmul.f32 %v7038_v26, %v4075_v14 }
 0x375   :  { %v4077_v60 = vmul.f32 0.5, %v4076_v35 }
 0x377   :  { %v4078_v17 = vsub.f32 1.5, %v4077_v60 }
 0x379   :  { %v4079_v23 = vmul.f32 %v7038_v26, %v4078_v17 }
 0x37b   :  { %v4083_v43 = vsel %vm4082_vm8, %v7038_v26, %v4079_v23 }
 0x37c   :  { %v4087_v30 = vmul.f32 %v4083_v43, %v4007_v18 }
 0x37e   :  { %v4100_v27 = vmul.f32 %v4092_v58, %v4087_v30 }
 0x380   :  { %v4113_v32 = vadd.f32 %v4105_v20, %v4100_v27 }
 0x382   :  { %v4117_v15 = vmax.f32 %v4113_v32, 0.0 }
 0x384   :  { %v4121_v4 = vpack.c.bf16 %v4117_v15, %v4117_v15 }
 0x386   :  { %4429 = vmatmul.bf16.vlgmr.msrb.gmra.mxu3 %v4121_v4 }
 0x3c3   :  { %v4391_v1 = vpop.f32.mrf.mxu0 }
 0x3c4   :  { %v4392_v19 = vadd.f32 %v7020_v38, %v4391_v1 }
 0x3cb   :  { %v4393_v40 = vpop.f32.mrf.mxu0 }
 0x3d3   :  { %v4404_v24 = vpop.f32.mrf.mxu1 }
 0x3d4   :  { %v4405_v45 = vadd.f32 %v4404_v24, %v4392_v19 }
 0x3db   :  { %v4406_v34 = vpop.f32.mrf.mxu1 }
 0x3e9   :  { %v4417_v29 = vpop.f32.mrf.mxu2 }
 0x3ea   :  { %v4418_v3 = vadd.f32 %v4417_v29, %v4405_v45 }
 0x3f1   :  { %v4419_v37 = vpop.f32.mrf.mxu2 }
 0x409   :  { %v4430_v47 = vpop.f32.mrf.mxu3 }
 0x40a   :  { %v4431_v31 = vadd.f32 %v4430_v47, %v4418_v3 }
 0x40c   :  { %4434 = vst [vmem:[#allocation8] sm:$0xff] %v4431_v31 }
 0x40d   :  { %4445 = dma.vmem_to_hbm [thread:$0]  %s4441_s14, 128, %s4443_s16, [#allocation4]  }
 0x411   :  { %v4432_v50 = vpop.f32.mrf.mxu3 }
 0x412   :  { %7140 = dma.done.wait [#allocation4], 128  }
 0x413   :  { %7141 = vsyncadd [#allocation4], 4294967168 }
 0x414   :  { %4450 = vsyncpa [#allocation3], 1 }
 0x415   :  { %4451 = vsyncpa [#allocation6], 1 }
 0x416   :  { %4452 = vsyncpa [#allocation4], 1 }

</bundles_post_ra>
